<compile_context>
chip_gen: v5e
topology: v5e:2x2
jax: 0.10.0
libtpu: 0.0.40
codegen_flags: <defaults>
</compile_context>

<pallas_src>
import functools

import numpy as np
import jax
import jax.numpy as jnp
from jax import lax
from jax.experimental import pallas as pl
from jax.experimental.pallas import tpu as pltpu


C_FEAT = 256          # channel width fixed by the module (ASPP / CrossModelAtt)


# ----------------------------------------------------------------------------
# Static selector for the GAP-hoisted 3x3 conv (padding=1):
#   S[tap*8 + b, :] = sum over the boundary-corrected spatial window of `tap`
# computed as one matmul  M9 @ feature  with M9 a 0/1 matrix (9*8, B*H*W)
# (8 sublanes per tap so every tap slab is sublane-aligned).
# TODO(synk): for large H*W replace this dense selector with the
# total/edge-row/edge-col sum decomposition (review item) to avoid an
# O(72*B*H*W) constant.
# ----------------------------------------------------------------------------
def _win(d, n):
    lo = 1 if d == 2 else 0
    hi = n - 1 if d == 0 else n
    return lo, hi


def _tap_selector(B, H, W):
    assert B <= 8, "tap selector packs the batch into 8 sublanes per tap"
    sel = np.zeros((9 * 8, B * H * W), np.float32)
    for dy in range(3):
        ylo, yhi = _win(dy, H)
        for dx in range(3):
            xlo, xhi = _win(dx, W)
            t = dy * 3 + dx
            for b in range(B):
                for y in range(ylo, yhi):
                    for x in range(xlo, xhi):
                        sel[t * 8 + b, b * H * W + y * W + x] = 1.0
    return sel


def _choose_tile(B, HW, max_rows=1024):
    """Row tile = nb whole batch planes (nb | B) so a tile never splits a batch."""
    nb = max(1, min(B, max_rows // max(HW, 1)))
    while B % nb:
        nb -= 1
    return nb * HW, nb


# ----------------------------------------------------------------------------
# Fused kernel.  Grid: 1-D over row tiles of the (B*H*W, C) slab ("arbitrary":
# the window-sum accumulator and the domain head reduce across it).
# ----------------------------------------------------------------------------
def _fused_kernel(clip_ref, feat_ref, wp_ref, bp_ref, gamma_ref,
                  wcf_ref, wcc_ref, bc_ref,
                  m9_ref, w9_ref, bd_ref, wpw_ref, bpw_ref,
                  w1_ref, b1_ref, g1_ref, be1_ref, w2_ref, b2_ref,
                  feat_out_ref, dom_ref,
                  s_acc_ref, *, HW, B):
    f32 = jnp.float32
    i = pl.program_id(0)
    TM, C = feat_ref.shape
    nb = TM // HW                                   # batch planes in this tile

    @pl.when(i == 0)
    def _():
        s_acc_ref[...] = jnp.zeros_like(s_acc_ref)

    # ---- CrossModelAtt: proj + rank-1 attention ------------------------------
    # perception = HW * f f^T, so per-batch terms (fmax/fmin/mm) are computed at
    # (nb, C) scale and broadcast; only cs and s need per-row lane reductions.
    F = jnp.dot(clip_ref[...], wp_ref[...],
                preferred_element_type=f32) + bp_ref[...]        # (nb, C)
    fmax = jnp.max(F, axis=1, keepdims=True)                     # (nb, 1)
    fmin = jnp.min(F, axis=1, keepdims=True)
    mmF = jnp.where(F >= 0.0, fmax, fmin)                        # (nb, C)
    # sublane-broadcast per-batch vectors to every spatial row of the tile
    F_rows = jnp.broadcast_to(F[:, None, :], (nb, HW, C)).reshape(TM, C)
    MM_rows = jnp.broadcast_to(mmF[:, None, :], (nb, HW, C)).reshape(TM, C)

    v = feat_ref[...]                                            # (TM, C) f32
    cs = jnp.sum(v, axis=1, keepdims=True)                       # (TM, 1)
    s = jnp.sum(F_rows * v, axis=1, keepdims=True)               # (TM, 1)
    # info[i,d] = HW * f_d * (mm_d * cs_i - f.v_i); gamma*HW folded to one scalar
    g = gamma_ref[0] * float(HW)
    x_clip = g * (F_rows * (MM_rows * cs - s)) + v               # (TM, C)

    # ---- torch.cat([x, x_clip], 1) + 1x1 conv (512 -> 256), concat folded ----
    feature = (jnp.dot(v, wcf_ref[...], preferred_element_type=f32)
               + jnp.dot(x_clip, wcc_ref[...], preferred_element_type=f32)
               + bc_ref[...])                                    # (TM, C)
    feat_out_ref[...] = feature
    # ReverseLayerF is identity in the forward pass (alpha scales gradients only)

    # ---- accumulate boundary-corrected window sums (GAP-hoisted 3x3 conv) ----
    s_acc_ref[...] += jnp.dot(m9_ref[...], feature,
                              preferred_element_type=f32)        # (72, C)

    # ---- finalize: fused tap matmul + pointwise + domain head ----------------
    @pl.when(i == pl.num_programs(0) - 1)
    def _():
        S = s_acc_ref[...]                                       # (72, C)
        # regroup (9 taps x 8 sublanes, C) -> (8, 9*C): lane concat of aligned
        # sublane slices, then ONE (8, 9C)@(9C, C) matmul instead of 9 tiny ones.
        Sr = jnp.concatenate([S[t * 8:(t + 1) * 8, :] for t in range(9)],
                             axis=1)                             # (8, 9*C)
        gap_all = jnp.dot(Sr, w9_ref[...], preferred_element_type=f32)   # (8, C)
        gap_dw = gap_all[:B, :] * (1.0 / HW) + bd_ref[...]       # (B, C)
        gap = jnp.dot(gap_dw, wpw_ref[...],
                      preferred_element_type=f32) + bpw_ref[...]  # (B, 128)

        # domain classifier: fc1 + BatchNorm1d (batch stats) + ReLU + fc2 + log-softmax
        # TODO(synk): BatchNorm1d uses per-batch statistics (training mode);
        # eval mode would need running stats which are not part of this forward.
        h = jnp.dot(gap, w1_ref[...], preferred_element_type=f32) + b1_ref[...]
        mean = jnp.mean(h, axis=0, keepdims=True)
        var = jnp.mean((h - mean) ** 2, axis=0, keepdims=True)
        hn = (h - mean) * lax.rsqrt(var + 1e-5) * g1_ref[...] + be1_ref[...]
        hr = jnp.maximum(hn, 0.0)
        o = jnp.dot(hr, w2_ref[...], preferred_element_type=f32) + b2_ref[...]
        m = jnp.max(o, axis=1, keepdims=True)
        lse = m + jnp.log(jnp.sum(jnp.exp(o - m), axis=1, keepdims=True))
        dom_ref[...] = o - lse


# ----------------------------------------------------------------------------
# Parameters (deterministic synthetic init; shapes from the module __init__)
# ----------------------------------------------------------------------------
def init_params(key):
    ks = jax.random.split(key, 10)
    s = 0.05
    return {
        # CrossModelAtt
        "proj_w": jax.random.normal(ks[0], (256, 512), jnp.float32) * s,
        "proj_b": jax.random.normal(ks[1], (256,), jnp.float32) * s,
        "gamma": jnp.zeros((1,), jnp.float32),          # nn.Parameter(zeros(1))
        # Model.conv: Conv2d(512, 256, 1)
        "conv_w": jax.random.normal(ks[2], (256, 512), jnp.float32) * s,
        "conv_b": jax.random.normal(ks[3], (256,), jnp.float32) * s,
        # DSCClassifier.depthwise: Conv2d(256, 256, 3, padding=1)   (dense conv)
        "dw_w": jax.random.normal(ks[4], (256, 256, 3, 3), jnp.float32) * s,
        "dw_b": jax.random.normal(ks[5], (256,), jnp.float32) * s,
        # DSCClassifier.pointwise: Conv2d(256, 128, 1)
        "pw_w": jax.random.normal(ks[6], (128, 256), jnp.float32) * s,
        "pw_b": jax.random.normal(ks[7], (128,), jnp.float32) * s,
        # domain_classifier
        "fc1_w": jax.random.normal(ks[8], (100, 128), jnp.float32) * s,
        "fc1_b": jnp.zeros((100,), jnp.float32),
        "bn1_g": jnp.ones((100,), jnp.float32),
        "bn1_b": jnp.zeros((100,), jnp.float32),
        "fc2_w": jax.random.normal(ks[9], (2, 100), jnp.float32) * s,
        "fc2_b": jnp.zeros((2,), jnp.float32),
    }


def prepare_params(params, B, H, W):
    """One-time layout plumbing, hoisted OUT of the per-call jitted path."""
    C = C_FEAT
    f32 = jnp.float32
    return {
        "wp_t": params["proj_w"].T.astype(f32),                       # (512, 256)
        "bp": params["proj_b"].reshape(1, -1).astype(f32),
        "gamma": params["gamma"].reshape(1).astype(f32),              # SMEM scalar
        "wcf_t": params["conv_w"][:, :C].T.astype(f32),               # acts on x
        "wcc_t": params["conv_w"][:, C:].T.astype(f32),               # acts on x_clip
        "bc": params["conv_b"].reshape(1, -1).astype(f32),
        # (o, ci, ky, kx) -> (ky, kx, ci, o) -> (9*C, C): pre-stacked tap weight
        "w9cat": jnp.transpose(params["dw_w"], (2, 3, 1, 0)).reshape(9 * C, C).astype(f32),
        "bd": params["dw_b"].reshape(1, -1).astype(f32),
        "wpw_t": params["pw_w"].T.astype(f32),                        # (256, 128)
        "bpw": params["pw_b"].reshape(1, -1).astype(f32),
        "w1_t": params["fc1_w"].T.astype(f32),                        # (128, 100)
        "b1": params["fc1_b"].reshape(1, -1).astype(f32),
        "g1": params["bn1_g"].reshape(1, -1).astype(f32),
        "be1": params["bn1_b"].reshape(1, -1).astype(f32),
        "w2_t": params["fc2_w"].T.astype(f32),                        # (100, 2)
        "b2": params["fc2_b"].reshape(1, -1).astype(f32),
        "m9": jnp.asarray(_tap_selector(B, H, W), f32),               # (72, B*H*W)
    }


# ----------------------------------------------------------------------------
# Model forward (the parts of Model.forward defined in the source)
# ----------------------------------------------------------------------------
def model_forward(prep, aspp_feat, clip_embed, alpha):
    # TODO(synk): build_backbone / build_aspp are external modules; `aspp_feat`
    # stands in for x = aspp(backbone(input)).
    # TODO(synk): clip.load / encode_image and Resize([224,224]) are an external
    # frozen CLIP ViT; `clip_embed` stands in for encode_image(img).float().
    # `alpha` only scales gradients (ReverseLayerF) -> unused in forward.
    B, C, H, W = aspp_feat.shape
    HW = H * W
    BHW = B * HW
    CLIP_DIM = clip_embed.shape[1]
    f32 = jnp.float32

    # Lane-dense working layout: (B*H*W, C) with C=256 on lanes.
    feat_t = jnp.transpose(aspp_feat, (0, 2, 3, 1)).reshape(BHW, C).astype(f32)

    TM, nb = _choose_tile(B, HW)              # rows per tile = nb whole planes
    n_tiles = BHW // TM
    # TODO(synk): tiles are whole batch planes; very large H*W (plane > tile
    # budget) would need an intra-plane split of the clip broadcast as well.

    kernel = functools.partial(_fused_kernel, HW=HW, B=B)

    def const2(shape):
        return pl.BlockSpec(shape, lambda i: (0, 0))   # weight resident, fetched once

    grid_spec = pltpu.PrefetchScalarGridSpec(
        num_scalar_prefetch=0,
        grid=(n_tiles,),
        in_specs=[
            pl.BlockSpec((nb, CLIP_DIM), lambda i: (i, 0)),       # clip rows of tile
            pl.BlockSpec((TM, C), lambda i: (i, 0)),              # feature rows
            const2((CLIP_DIM, C)),                                # proj weight
            const2((1, C)),                                       # proj bias
            pl.BlockSpec(memory_space=pltpu.MemorySpace.SMEM),    # gamma (scalar)
            const2((C, C)), const2((C, C)), const2((1, C)),       # conv (split) + bias
            pl.BlockSpec((72, TM), lambda i: (0, i)),             # tap selector cols
            const2((9 * C, C)), const2((1, C)),                   # stacked 3x3 taps
            const2((C, 128)), const2((1, 128)),                   # pointwise
            const2((128, 100)), const2((1, 100)),                 # fc1
            const2((1, 100)), const2((1, 100)),                   # bn1 gamma/beta
            const2((100, 2)), const2((1, 2)),                     # fc2
        ],
        out_specs=[
            pl.BlockSpec((TM, C), lambda i: (i, 0)),              # fused feature
            pl.BlockSpec((B, 2), lambda i: (0, 0)),               # domain logits
        ],
        scratch_shapes=[pltpu.VMEM((72, C), f32)],                # window-sum acc
    )

    feature_t, domain_output = pl.pallas_call(
        kernel,
        grid_spec=grid_spec,
        out_shape=(jax.ShapeDtypeStruct((BHW, C), f32),
                   jax.ShapeDtypeStruct((B, 2), f32)),
        compiler_params=pltpu.CompilerParams(
            dimension_semantics=("arbitrary",)),      # row axis carries the GAP sum
    )(clip_embed.astype(f32), feat_t,
      prep["wp_t"], prep["bp"], prep["gamma"],
      prep["wcf_t"], prep["wcc_t"], prep["bc"],
      prep["m9"], prep["w9cat"], prep["bd"], prep["wpw_t"], prep["bpw"],
      prep["w1_t"], prep["b1"], prep["g1"], prep["be1"],
      prep["w2_t"], prep["b2"])

    # TODO(synk): build_decoder and F.interpolate(bilinear, align_corners=True)
    # are external/undefined in the source; return the fused feature map in the
    # module's NCHW convention (a NHWC-consuming decoder could skip this transpose).
    seg_feature = feature_t.reshape(B, H, W, C).transpose(0, 3, 1, 2)
    return seg_feature, domain_output


if __name__ == "__main__":
    key = jax.random.PRNGKey(0)
    kp, k1, k2 = jax.random.split(key, 3)
    params = init_params(kp)

    # Small shapes: batch=2, ASPP feature (2, 256, 8, 8), CLIP embedding (2, 512)
    B, C, H, W = 2, 256, 8, 8
    aspp_feat = jax.random.normal(k1, (B, C, H, W), jnp.float32)
    clip_embed = jax.random.normal(k2, (B, 512), jnp.float32)
    alpha = jnp.float32(1.0)

    prep = prepare_params(params, B, H, W)          # one-time, outside jit

    fwd = jax.jit(model_forward)
    seg_feature, domain_output = fwd(prep, aspp_feat, clip_embed, alpha)
    jax.block_until_ready((seg_feature, domain_output))

    assert seg_feature.shape == (B, C, H, W)
    assert domain_output.shape == (B, 2)
    assert bool(jnp.all(jnp.isfinite(seg_feature)))
    assert bool(jnp.all(jnp.isfinite(domain_output)))
    print("KERNEL_OK")
</pallas_src>

<mosaic_0001>
module attributes {stable_mosaic.version = 11 : i64} {
  func.func @_fused_kernel(%arg0: i32, %arg1: memref<2x512xf32, #tpu.memory_space<vmem>>, %arg2: memref<128x256xf32, #tpu.memory_space<vmem>>, %arg3: memref<512x256xf32, #tpu.memory_space<vmem>>, %arg4: memref<1x256xf32, #tpu.memory_space<vmem>>, %arg5: memref<1xf32, #tpu.memory_space<smem>>, %arg6: memref<256x256xf32, #tpu.memory_space<vmem>>, %arg7: memref<256x256xf32, #tpu.memory_space<vmem>>, %arg8: memref<1x256xf32, #tpu.memory_space<vmem>>, %arg9: memref<72x128xf32, #tpu.memory_space<vmem>>, %arg10: memref<2304x256xf32, #tpu.memory_space<vmem>>, %arg11: memref<1x256xf32, #tpu.memory_space<vmem>>, %arg12: memref<256x128xf32, #tpu.memory_space<vmem>>, %arg13: memref<1x128xf32, #tpu.memory_space<vmem>>, %arg14: memref<128x100xf32, #tpu.memory_space<vmem>>, %arg15: memref<1x100xf32, #tpu.memory_space<vmem>>, %arg16: memref<1x100xf32, #tpu.memory_space<vmem>>, %arg17: memref<1x100xf32, #tpu.memory_space<vmem>>, %arg18: memref<100x2xf32, #tpu.memory_space<vmem>>, %arg19: memref<1x2xf32, #tpu.memory_space<vmem>>, %arg20: memref<128x256xf32, #tpu.memory_space<vmem>>, %arg21: memref<2x2xf32, #tpu.memory_space<vmem>>, %arg22: memref<72x256xf32, #tpu.memory_space<vmem>>) attributes {dimension_semantics = [#tpu.dimension_semantics<arbitrary>], iteration_bounds = array<i64: 1>, scalar_prefetch = 0 : i64, scratch_operands = 1 : i64, tpu.core_type = #tpu.core_type<tc>, window_params = [{transform_indices = @transform_0, window_bounds = array<i64: 2, 512>}, {transform_indices = @transform_1, window_bounds = array<i64: 128, 256>}, {pipeline_mode = #tpu.pipeline_mode<synchronous>, transform_indices = @transform_2, window_bounds = array<i64: 512, 256>}, {pipeline_mode = #tpu.pipeline_mode<synchronous>, transform_indices = @transform_3, window_bounds = array<i64: 1, 256>}, {transform_indices = @transform_4, window_bounds = array<i64: 1>}, {pipeline_mode = #tpu.pipeline_mode<synchronous>, transform_indices = @transform_5, window_bounds = array<i64: 256, 256>}, {pipeline_mode = #tpu.pipeline_mode<synchronous>, transform_indices = @transform_6, window_bounds = array<i64: 256, 256>}, {pipeline_mode = #tpu.pipeline_mode<synchronous>, transform_indices = @transform_7, window_bounds = array<i64: 1, 256>}, {transform_indices = @transform_8, window_bounds = array<i64: 72, 128>}, {pipeline_mode = #tpu.pipeline_mode<synchronous>, transform_indices = @transform_9, window_bounds = array<i64: 2304, 256>}, {pipeline_mode = #tpu.pipeline_mode<synchronous>, transform_indices = @transform_10, window_bounds = array<i64: 1, 256>}, {pipeline_mode = #tpu.pipeline_mode<synchronous>, transform_indices = @transform_11, window_bounds = array<i64: 256, 128>}, {pipeline_mode = #tpu.pipeline_mode<synchronous>, transform_indices = @transform_12, window_bounds = array<i64: 1, 128>}, {pipeline_mode = #tpu.pipeline_mode<synchronous>, transform_indices = @transform_13, window_bounds = array<i64: 128, 100>}, {pipeline_mode = #tpu.pipeline_mode<synchronous>, transform_indices = @transform_14, window_bounds = array<i64: 1, 100>}, {pipeline_mode = #tpu.pipeline_mode<synchronous>, transform_indices = @transform_15, window_bounds = array<i64: 1, 100>}, {pipeline_mode = #tpu.pipeline_mode<synchronous>, transform_indices = @transform_16, window_bounds = array<i64: 1, 100>}, {pipeline_mode = #tpu.pipeline_mode<synchronous>, transform_indices = @transform_17, window_bounds = array<i64: 100, 2>}, {pipeline_mode = #tpu.pipeline_mode<synchronous>, transform_indices = @transform_18, window_bounds = array<i64: 1, 2>}, {transform_indices = @transform_19, window_bounds = array<i64: 128, 256>}, {pipeline_mode = #tpu.pipeline_mode<synchronous>, transform_indices = @transform_20, window_bounds = array<i64: 2, 2>}]} {
    %c0_i32 = arith.constant 0 : i32
    %0 = arith.cmpi eq, %arg0, %c0_i32 : i32
    %1 = arith.extui %0 : i1 to i32
    %c0_i32_0 = arith.constant 0 : i32
    %2 = arith.cmpi ne, %1, %c0_i32_0 : i32
    scf.if %2 {
      %cst_34 = arith.constant 0.000000e+00 : f32
      %61 = vector.broadcast %cst_34 : f32 to vector<72x256xf32>
      %c0_35 = arith.constant 0 : index
      %c0_36 = arith.constant 0 : index
      %62 = vector.load %arg22[%c0_35, %c0_36] : memref<72x256xf32, #tpu.memory_space<vmem>>, vector<72x256xf32>
      tpu.vector_store %arg22[%c0_35, %c0_36], %61 {strides = array<i32>} : memref<72x256xf32, #tpu.memory_space<vmem>>, vector<72x256xf32>,
    } else {
    }
    %c0 = arith.constant 0 : index
    %c0_1 = arith.constant 0 : index
    %3 = vector.load %arg1[%c0, %c0_1] : memref<2x512xf32, #tpu.memory_space<vmem>>, vector<2x512xf32>
    %c0_2 = arith.constant 0 : index
    %c0_3 = arith.constant 0 : index
    %4 = vector.load %arg3[%c0_2, %c0_3] : memref<512x256xf32, #tpu.memory_space<vmem>>, vector<512x256xf32>
    %cst = arith.constant dense<0.000000e+00> : vector<2x256xf32>
    %5 = tpu.matmul %3, %4, %cst {dimension_numbers = #tpu.dot_dimension_numbers<[1], [0], [0], [1], [0, 0, 1, 1], [], []>} : vector<2x512xf32>, vector<512x256xf32>, vector<2x256xf32> -> vector<2x256xf32>
    %c0_4 = arith.constant 0 : index
    %c0_5 = arith.constant 0 : index
    %6 = vector.load %arg4[%c0_4, %c0_5] : memref<1x256xf32, #tpu.memory_space<vmem>>, vector<1x256xf32>
    %7 = vector.broadcast %6 : vector<1x256xf32> to vector<2x256xf32>
    %8 = arith.addf %5, %7 : vector<2x256xf32>
    %cst_6 = arith.constant dense<0xFF800000> : vector<2xf32>
    %9 = vector.multi_reduction <maximumf>, %8, %cst_6 [1] : vector<2x256xf32> to vector<2xf32>
    %10 = vector.shape_cast %9 : vector<2xf32> to vector<2x1xf32>
    %cst_7 = arith.constant dense<0x7F800000> : vector<2xf32>
    %11 = vector.multi_reduction <minimumf>, %8, %cst_7 [1] : vector<2x256xf32> to vector<2xf32>
    %12 = vector.shape_cast %11 : vector<2xf32> to vector<2x1xf32>
    %cst_8 = arith.constant 0.000000e+00 : f32
    %13 = vector.broadcast %cst_8 : f32 to vector<2x256xf32>
    %14 = arith.cmpf oge, %8, %13 : vector<2x256xf32>
    %15 = vector.shape_cast %10 : vector<2x1xf32> to vector<2x1xf32>
    %16 = vector.broadcast %15 : vector<2x1xf32> to vector<2x256xf32>
    %17 = vector.shape_cast %12 : vector<2x1xf32> to vector<2x1xf32>
    %18 = vector.broadcast %17 : vector<2x1xf32> to vector<2x256xf32>
    %19 = arith.select %14, %16, %18 : vector<2x256xi1>, vector<2x256xf32>
    %20 = vector.shape_cast %8 : vector<2x256xf32> to vector<2x1x256xf32>
    %21 = vector.shape_cast %20 : vector<2x1x256xf32> to vector<2x1x256xf32>
    %22 = vector.broadcast %21 : vector<2x1x256xf32> to vector<2x64x256xf32>
    %23 = vector.shape_cast %22 : vector<2x64x256xf32> to vector<128x256xf32>
    %24 = vector.shape_cast %19 : vector<2x256xf32> to vector<2x1x256xf32>
    %25 = vector.shape_cast %24 : vector<2x1x256xf32> to vector<2x1x256xf32>
    %26 = vector.broadcast %25 : vector<2x1x256xf32> to vector<2x64x256xf32>
    %27 = vector.shape_cast %26 : vector<2x64x256xf32> to vector<128x256xf32>
    %c0_9 = arith.constant 0 : index
    %c0_10 = arith.constant 0 : index
    %28 = vector.load %arg2[%c0_9, %c0_10] : memref<128x256xf32, #tpu.memory_space<vmem>>, vector<128x256xf32>
    %cst_11 = arith.constant dense<0.000000e+00> : vector<128xf32>
    %29 = vector.multi_reduction <add>, %28, %cst_11 [1] : vector<128x256xf32> to vector<128xf32>
    %30 = vector.shape_cast %29 : vector<128xf32> to vector<128x1xf32>
    %31 = arith.mulf %23, %28 : vector<128x256xf32>
    %cst_12 = arith.constant dense<0.000000e+00> : vector<128xf32>
    %32 = vector.multi_reduction <add>, %31, %cst_12 [1] : vector<128x256xf32> to vector<128xf32>
    %33 = vector.shape_cast %32 : vector<128xf32> to vector<128x1xf32>
    %c0_13 = arith.constant 0 : index
    %34 = memref.load %arg5[%c0_13] : memref<1xf32, #tpu.memory_space<smem>>
    %cst_14 = arith.constant 6.400000e+01 : f32
    %35 = arith.mulf %34, %cst_14 : f32
    %36 = vector.broadcast %30 : vector<128x1xf32> to vector<128x256xf32>
    %37 = arith.mulf %27, %36 : vector<128x256xf32>
    %38 = vector.broadcast %33 : vector<128x1xf32> to vector<128x256xf32>
    %39 = arith.subf %37, %38 : vector<128x256xf32>
    %40 = arith.mulf %23, %39 : vector<128x256xf32>
    %41 = vector.broadcast %35 : f32 to vector<128x256xf32>
    %42 = arith.mulf %41, %40 : vector<128x256xf32>
    %43 = arith.addf %42, %28 : vector<128x256xf32>
    %c0_15 = arith.constant 0 : index
    %c0_16 = arith.constant 0 : index
    %44 = vector.load %arg6[%c0_15, %c0_16] : memref<256x256xf32, #tpu.memory_space<vmem>>, vector<256x256xf32>
    %cst_17 = arith.constant dense<0.000000e+00> : vector<128x256xf32>
    %45 = tpu.matmul %28, %44, %cst_17 {dimension_numbers = #tpu.dot_dimension_numbers<[1], [0], [0], [1], [0, 0, 1, 1], [], []>} : vector<128x256xf32>, vector<256x256xf32>, vector<128x256xf32> -> vector<128x256xf32>
    %c0_18 = arith.constant 0 : index
    %c0_19 = arith.constant 0 : index
    %46 = vector.load %arg7[%c0_18, %c0_19] : memref<256x256xf32, #tpu.memory_space<vmem>>, vector<256x256xf32>
    %cst_20 = arith.constant dense<0.000000e+00> : vector<128x256xf32>
    %47 = tpu.matmul %43, %46, %cst_20 {dimension_numbers = #tpu.dot_dimension_numbers<[1], [0], [0], [1], [0, 0, 1, 1], [], []>} : vector<128x256xf32>, vector<256x256xf32>, vector<128x256xf32> -> vector<128x256xf32>
    %48 = arith.addf %45, %47 : vector<128x256xf32>
    %c0_21 = arith.constant 0 : index
    %c0_22 = arith.constant 0 : index
    %49 = vector.load %arg8[%c0_21, %c0_22] : memref<1x256xf32, #tpu.memory_space<vmem>>, vector<1x256xf32>
    %50 = vector.broadcast %49 : vector<1x256xf32> to vector<128x256xf32>
    %51 = arith.addf %48, %50 : vector<128x256xf32>
    %c0_23 = arith.constant 0 : index
    %c0_24 = arith.constant 0 : index
    %52 = vector.load %arg20[%c0_23, %c0_24] : memref<128x256xf32, #tpu.memory_space<vmem>>, vector<128x256xf32>
    tpu.vector_store %arg20[%c0_23, %c0_24], %51 {strides = array<i32>} : memref<128x256xf32, #tpu.memory_space<vmem>>, vector<128x256xf32>,
    %c0_25 = arith.constant 0 : index
    %c0_26 = arith.constant 0 : index
    %53 = vector.load %arg22[%c0_25, %c0_26] : memref<72x256xf32, #tpu.memory_space<vmem>>, vector<72x256xf32>
    %c0_27 = arith.constant 0 : index
    %c0_28 = arith.constant 0 : index
    %54 = vector.load %arg9[%c0_27, %c0_28] : memref<72x128xf32, #tpu.memory_space<vmem>>, vector<72x128xf32>
    %cst_29 = arith.constant dense<0.000000e+00> : vector<72x256xf32>
    %55 = tpu.matmul %54, %51, %cst_29 {dimension_numbers = #tpu.dot_dimension_numbers<[1], [0], [0], [1], [0, 0, 1, 1], [], []>} : vector<72x128xf32>, vector<128x256xf32>, vector<72x256xf32> -> vector<72x256xf32>
    %56 = arith.addf %53, %55 : vector<72x256xf32>
    %c0_30 = arith.constant 0 : index
    %c0_31 = arith.constant 0 : index
    %57 = vector.load %arg22[%c0_30, %c0_31] : memref<72x256xf32, #tpu.memory_space<vmem>>, vector<72x256xf32>
    tpu.vector_store %arg22[%c0_30, %c0_31], %56 {strides = array<i32>} : memref<72x256xf32, #tpu.memory_space<vmem>>, vector<72x256xf32>,
    %c0_i32_32 = arith.constant 0 : i32
    %58 = arith.cmpi eq, %arg0, %c0_i32_32 : i32
    %59 = arith.extui %58 : i1 to i32
    %c0_i32_33 = arith.constant 0 : i32
    %60 = arith.cmpi ne, %59, %c0_i32_33 : i32
    scf.if %60 {
      %c0_34 = arith.constant 0 : index
      %c0_35 = arith.constant 0 : index
      %61 = vector.load %arg22[%c0_34, %c0_35] : memref<72x256xf32, #tpu.memory_space<vmem>>, vector<72x256xf32>
      %62 = vector.extract_strided_slice %61 {offsets = [0, 0], sizes = [8, 256], strides = [1, 1]} : vector<72x256xf32> to vector<8x256xf32>
      %63 = vector.extract_strided_slice %61 {offsets = [8, 0], sizes = [8, 256], strides = [1, 1]} : vector<72x256xf32> to vector<8x256xf32>
      %64 = vector.extract_strided_slice %61 {offsets = [16, 0], sizes = [8, 256], strides = [1, 1]} : vector<72x256xf32> to vector<8x256xf32>
      %65 = vector.extract_strided_slice %61 {offsets = [24, 0], sizes = [8, 256], strides = [1, 1]} : vector<72x256xf32> to vector<8x256xf32>
      %66 = vector.extract_strided_slice %61 {offsets = [32, 0], sizes = [8, 256], strides = [1, 1]} : vector<72x256xf32> to vector<8x256xf32>
      %67 = vector.extract_strided_slice %61 {offsets = [40, 0], sizes = [8, 256], strides = [1, 1]} : vector<72x256xf32> to vector<8x256xf32>
      %68 = vector.extract_strided_slice %61 {offsets = [48, 0], sizes = [8, 256], strides = [1, 1]} : vector<72x256xf32> to vector<8x256xf32>
      %69 = vector.extract_strided_slice %61 {offsets = [56, 0], sizes = [8, 256], strides = [1, 1]} : vector<72x256xf32> to vector<8x256xf32>
      %70 = vector.extract_strided_slice %61 {offsets = [64, 0], sizes = [8, 256], strides = [1, 1]} : vector<72x256xf32> to vector<8x256xf32>
      %71 = tpu.concatenate %62, %63, %64, %65, %66, %67, %68, %69, %70 in 1 : vector<8x256xf32>, vector<8x256xf32>, vector<8x256xf32>, vector<8x256xf32>, vector<8x256xf32>, vector<8x256xf32>, vector<8x256xf32>, vector<8x256xf32>, vector<8x256xf32> -> vector<8x2304xf32>
      %c0_36 = arith.constant 0 : index
      %c0_37 = arith.constant 0 : index
      %72 = vector.load %arg10[%c0_36, %c0_37] : memref<2304x256xf32, #tpu.memory_space<vmem>>, vector<2304x256xf32>
      %cst_38 = arith.constant dense<0.000000e+00> : vector<8x256xf32>
      %73 = tpu.matmul %71, %72, %cst_38 {dimension_numbers = #tpu.dot_dimension_numbers<[1], [0], [0], [1], [0, 0, 1, 1], [], []>} : vector<8x2304xf32>, vector<2304x256xf32>, vector<8x256xf32> -> vector<8x256xf32>
      %74 = vector.extract_strided_slice %73 {offsets = [0, 0], sizes = [2, 256], strides = [1, 1]} : vector<8x256xf32> to vector<2x256xf32>
      %cst_39 = arith.constant 1.562500e-02 : f32
      %75 = vector.broadcast %cst_39 : f32 to vector<2x256xf32>
      %76 = arith.mulf %74, %75 : vector<2x256xf32>
      %c0_40 = arith.constant 0 : index
      %c0_41 = arith.constant 0 : index
      %77 = vector.load %arg11[%c0_40, %c0_41] : memref<1x256xf32, #tpu.memory_space<vmem>>, vector<1x256xf32>
      %78 = vector.broadcast %77 : vector<1x256xf32> to vector<2x256xf32>
      %79 = arith.addf %76, %78 : vector<2x256xf32>
      %c0_42 = arith.constant 0 : index
      %c0_43 = arith.constant 0 : index
      %80 = vector.load %arg12[%c0_42, %c0_43] : memref<256x128xf32, #tpu.memory_space<vmem>>, vector<256x128xf32>
      %cst_44 = arith.constant dense<0.000000e+00> : vector<2x128xf32>
      %81 = tpu.matmul %79, %80, %cst_44 {dimension_numbers = #tpu.dot_dimension_numbers<[1], [0], [0], [1], [0, 0, 1, 1], [], []>} : vector<2x256xf32>, vector<256x128xf32>, vector<2x128xf32> -> vector<2x128xf32>
      %c0_45 = arith.constant 0 : index
      %c0_46 = arith.constant 0 : index
      %82 = vector.load %arg13[%c0_45, %c0_46] : memref<1x128xf32, #tpu.memory_space<vmem>>, vector<1x128xf32>
      %83 = vector.broadcast %82 : vector<1x128xf32> to vector<2x128xf32>
      %84 = arith.addf %81, %83 : vector<2x128xf32>
      %c0_47 = arith.constant 0 : index
      %c0_48 = arith.constant 0 : index
      %85 = vector.load %arg14[%c0_47, %c0_48] : memref<128x100xf32, #tpu.memory_space<vmem>>, vector<128x100xf32>
      %cst_49 = arith.constant dense<0.000000e+00> : vector<2x100xf32>
      %86 = tpu.matmul %84, %85, %cst_49 {dimension_numbers = #tpu.dot_dimension_numbers<[1], [0], [0], [1], [0, 0, 1, 1], [], []>} : vector<2x128xf32>, vector<128x100xf32>, vector<2x100xf32> -> vector<2x100xf32>
      %c0_50 = arith.constant 0 : index
      %c0_51 = arith.constant 0 : index
      %87 = vector.load %arg15[%c0_50, %c0_51] : memref<1x100xf32, #tpu.memory_space<vmem>>, vector<1x100xf32>
      %88 = vector.broadcast %87 : vector<1x100xf32> to vector<2x100xf32>
      %89 = arith.addf %86, %88 : vector<2x100xf32>
      %cst_52 = arith.constant dense<0.000000e+00> : vector<100xf32>
      %90 = vector.multi_reduction <add>, %89, %cst_52 [0] : vector<2x100xf32> to vector<100xf32>
      %91 = vector.shape_cast %90 : vector<100xf32> to vector<1x100xf32>
      %cst_53 = arith.constant 2.000000e+00 : f32
      %92 = vector.broadcast %cst_53 : f32 to vector<1x100xf32>
      %93 = arith.divf %91, %92 : vector<1x100xf32>
      %94 = vector.broadcast %93 : vector<1x100xf32> to vector<2x100xf32>
      %95 = arith.subf %89, %94 : vector<2x100xf32>
      %96 = arith.mulf %95, %95 : vector<2x100xf32>
      %cst_54 = arith.constant dense<0.000000e+00> : vector<100xf32>
      %97 = vector.multi_reduction <add>, %96, %cst_54 [0] : vector<2x100xf32> to vector<100xf32>
      %98 = vector.shape_cast %97 : vector<100xf32> to vector<1x100xf32>
      %cst_55 = arith.constant 2.000000e+00 : f32
      %99 = vector.broadcast %cst_55 : f32 to vector<1x100xf32>
      %100 = arith.divf %98, %99 : vector<1x100xf32>
      %101 = vector.broadcast %93 : vector<1x100xf32> to vector<2x100xf32>
      %102 = arith.subf %89, %101 : vector<2x100xf32>
      %cst_56 = arith.constant 9.99999974E-6 : f32
      %103 = vector.broadcast %cst_56 : f32 to vector<1x100xf32>
      %104 = arith.addf %100, %103 : vector<1x100xf32>
      %105 = math.rsqrt %104 : vector<1x100xf32>
      %106 = vector.broadcast %105 : vector<1x100xf32> to vector<2x100xf32>
      %107 = arith.mulf %102, %106 : vector<2x100xf32>
      %c0_57 = arith.constant 0 : index
      %c0_58 = arith.constant 0 : index
      %108 = vector.load %arg16[%c0_57, %c0_58] : memref<1x100xf32, #tpu.memory_space<vmem>>, vector<1x100xf32>
      %109 = vector.broadcast %108 : vector<1x100xf32> to vector<2x100xf32>
      %110 = arith.mulf %107, %109 : vector<2x100xf32>
      %c0_59 = arith.constant 0 : index
      %c0_60 = arith.constant 0 : index
      %111 = vector.load %arg17[%c0_59, %c0_60] : memref<1x100xf32, #tpu.memory_space<vmem>>, vector<1x100xf32>
      %112 = vector.broadcast %111 : vector<1x100xf32> to vector<2x100xf32>
      %113 = arith.addf %110, %112 : vector<2x100xf32>
      %cst_61 = arith.constant 0.000000e+00 : f32
      %114 = vector.broadcast %cst_61 : f32 to vector<2x100xf32>
      %115 = arith.maximumf %113, %114 : vector<2x100xf32>
      %c0_62 = arith.constant 0 : index
      %c0_63 = arith.constant 0 : index
      %116 = vector.load %arg18[%c0_62, %c0_63] : memref<100x2xf32, #tpu.memory_space<vmem>>, vector<100x2xf32>
      %cst_64 = arith.constant dense<0.000000e+00> : vector<2x2xf32>
      %117 = tpu.matmul %115, %116, %cst_64 {dimension_numbers = #tpu.dot_dimension_numbers<[1], [0], [0], [1], [0, 0, 1, 1], [], []>} : vector<2x100xf32>, vector<100x2xf32>, vector<2x2xf32> -> vector<2x2xf32>
      %c0_65 = arith.constant 0 : index
      %c0_66 = arith.constant 0 : index
      %118 = vector.load %arg19[%c0_65, %c0_66] : memref<1x2xf32, #tpu.memory_space<vmem>>, vector<1x2xf32>
      %119 = vector.broadcast %118 : vector<1x2xf32> to vector<2x2xf32>
      %120 = arith.addf %117, %119 : vector<2x2xf32>
      %cst_67 = arith.constant dense<0xFF800000> : vector<2xf32>
      %121 = vector.multi_reduction <maximumf>, %120, %cst_67 [1] : vector<2x2xf32> to vector<2xf32>
      %122 = vector.shape_cast %121 : vector<2xf32> to vector<2x1xf32>
      %123 = vector.broadcast %122 : vector<2x1xf32> to vector<2x2xf32>
      %124 = arith.subf %120, %123 : vector<2x2xf32>
      %125 = math.exp %124 : vector<2x2xf32>
      %cst_68 = arith.constant dense<0.000000e+00> : vector<2xf32>
      %126 = vector.multi_reduction <add>, %125, %cst_68 [1] : vector<2x2xf32> to vector<2xf32>
      %127 = vector.shape_cast %126 : vector<2xf32> to vector<2x1xf32>
      %128 = math.log %127 : vector<2x1xf32>
      %129 = arith.addf %122, %128 : vector<2x1xf32>
      %130 = vector.broadcast %129 : vector<2x1xf32> to vector<2x2xf32>
      %131 = arith.subf %120, %130 : vector<2x2xf32>
      %c0_69 = arith.constant 0 : index
      %c0_70 = arith.constant 0 : index
      %132 = vector.load %arg21[%c0_69, %c0_70] : memref<2x2xf32, #tpu.memory_space<vmem>>, vector<2x2xf32>
      tpu.vector_store %arg21[%c0_69, %c0_70], %131 {strides = array<i32>} : memref<2x2xf32, #tpu.memory_space<vmem>>, vector<2x2xf32>,
    } else {
    }
    return
  }
  func.func @transform_0(%arg0: i32) -> (i32, i32) {
    %c0_i32 = arith.constant 0 : i32
    %c0_i32_0 = arith.constant 0 : i32
    return %arg0, %c0_i32 : i32, i32
  }
  func.func @transform_1(%arg0: i32) -> (i32, i32) {
    %c0_i32 = arith.constant 0 : i32
    %c0_i32_0 = arith.constant 0 : i32
    return %arg0, %c0_i32 : i32, i32
  }
  func.func @transform_2(%arg0: i32) -> (i32, i32) {
    %c0_i32 = arith.constant 0 : i32
    %c0_i32_0 = arith.constant 0 : i32
    %c0_i32_1 = arith.constant 0 : i32
    return %c0_i32, %c0_i32_0 : i32, i32
  }
  func.func @transform_3(%arg0: i32) -> (i32, i32) {
    %c0_i32 = arith.constant 0 : i32
    %c0_i32_0 = arith.constant 0 : i32
    %c0_i32_1 = arith.constant 0 : i32
    return %c0_i32, %c0_i32_0 : i32, i32
  }
  func.func @transform_4(%arg0: i32) -> i32 {
    %c0_i32 = arith.constant 0 : i32
    %c0_i32_0 = arith.constant 0 : i32
    return %c0_i32 : i32
  }
  func.func @transform_5(%arg0: i32) -> (i32, i32) {
    %c0_i32 = arith.constant 0 : i32
    %c0_i32_0 = arith.constant 0 : i32
    %c0_i32_1 = arith.constant 0 : i32
    return %c0_i32, %c0_i32_0 : i32, i32
  }
  func.func @transform_6(%arg0: i32) -> (i32, i32) {
    %c0_i32 = arith.constant 0 : i32
    %c0_i32_0 = arith.constant 0 : i32
    %c0_i32_1 = arith.constant 0 : i32
    return %c0_i32, %c0_i32_0 : i32, i32
  }
  func.func @transform_7(%arg0: i32) -> (i32, i32) {
    %c0_i32 = arith.constant 0 : i32
    %c0_i32_0 = arith.constant 0 : i32
    %c0_i32_1 = arith.constant 0 : i32
    return %c0_i32, %c0_i32_0 : i32, i32
  }
  func.func @transform_8(%arg0: i32) -> (i32, i32) {
    %c0_i32 = arith.constant 0 : i32
    %c0_i32_0 = arith.constant 0 : i32
    return %c0_i32, %arg0 : i32, i32
  }
  func.func @transform_9(%arg0: i32) -> (i32, i32) {
    %c0_i32 = arith.constant 0 : i32
    %c0_i32_0 = arith.constant 0 : i32
    %c0_i32_1 = arith.constant 0 : i32
    return %c0_i32, %c0_i32_0 : i32, i32
  }
  func.func @transform_10(%arg0: i32) -> (i32, i32) {
    %c0_i32 = arith.constant 0 : i32
    %c0_i32_0 = arith.constant 0 : i32
    %c0_i32_1 = arith.constant 0 : i32
    return %c0_i32, %c0_i32_0 : i32, i32
  }
  func.func @transform_11(%arg0: i32) -> (i32, i32) {
    %c0_i32 = arith.constant 0 : i32
    %c0_i32_0 = arith.constant 0 : i32
    %c0_i32_1 = arith.constant 0 : i32
    return %c0_i32, %c0_i32_0 : i32, i32
  }
  func.func @transform_12(%arg0: i32) -> (i32, i32) {
    %c0_i32 = arith.constant 0 : i32
    %c0_i32_0 = arith.constant 0 : i32
    %c0_i32_1 = arith.constant 0 : i32
    return %c0_i32, %c0_i32_0 : i32, i32
  }
  func.func @transform_13(%arg0: i32) -> (i32, i32) {
    %c0_i32 = arith.constant 0 : i32
    %c0_i32_0 = arith.constant 0 : i32
    %c0_i32_1 = arith.constant 0 : i32
    return %c0_i32, %c0_i32_0 : i32, i32
  }
  func.func @transform_14(%arg0: i32) -> (i32, i32) {
    %c0_i32 = arith.constant 0 : i32
    %c0_i32_0 = arith.constant 0 : i32
    %c0_i32_1 = arith.constant 0 : i32
    return %c0_i32, %c0_i32_0 : i32, i32
  }
  func.func @transform_15(%arg0: i32) -> (i32, i32) {
    %c0_i32 = arith.constant 0 : i32
    %c0_i32_0 = arith.constant 0 : i32
    %c0_i32_1 = arith.constant 0 : i32
    return %c0_i32, %c0_i32_0 : i32, i32
  }
  func.func @transform_16(%arg0: i32) -> (i32, i32) {
    %c0_i32 = arith.constant 0 : i32
    %c0_i32_0 = arith.constant 0 : i32
    %c0_i32_1 = arith.constant 0 : i32
    return %c0_i32, %c0_i32_0 : i32, i32
  }
  func.func @transform_17(%arg0: i32) -> (i32, i32) {
    %c0_i32 = arith.constant 0 : i32
    %c0_i32_0 = arith.constant 0 : i32
    %c0_i32_1 = arith.constant 0 : i32
    return %c0_i32, %c0_i32_0 : i32, i32
  }
  func.func @transform_18(%arg0: i32) -> (i32, i32) {
    %c0_i32 = arith.constant 0 : i32
    %c0_i32_0 = arith.constant 0 : i32
    %c0_i32_1 = arith.constant 0 : i32
    return %c0_i32, %c0_i32_0 : i32, i32
  }
  func.func @transform_19(%arg0: i32) -> (i32, i32) {
    %c0_i32 = arith.constant 0 : i32
    %c0_i32_0 = arith.constant 0 : i32
    return %arg0, %c0_i32 : i32, i32
  }
  func.func @transform_20(%arg0: i32) -> (i32, i32) {
    %c0_i32 = arith.constant 0 : i32
    %c0_i32_0 = arith.constant 0 : i32
    %c0_i32_1 = arith.constant 0 : i32
    return %c0_i32, %c0_i32_0 : i32, i32
  }
}

</mosaic_0001>

<bundles_post_ra>
// kernel: model_forward.1
= control target key start
LH: loop header
LB: loop body
LE: loop exit
PB: predicated region body
PF: predicated region fallthrough
CT: control target
= control target key end

     0   :  { %s4988_s0 = inlined_call_operand.hbm [shape: f32[2,512], index: 0, kind: input, shape index: {}]   ;;  %s4989_s1 = inlined_call_operand.hbm [shape: f32[128,256], index: 1, kind: input, shape index: {}]   ;;  %s4990_s2 = inlined_call_operand.hbm [shape: f32[512,256], index: 2, kind: input, shape index: {}]   ;;  %s4991_s3 = inlined_call_operand.hbm [shape: f32[1,256], index: 3, kind: input, shape index: {}]   ;;  %s4992_s4 = inlined_call_operand.<no memory space> [shape: f32[1], index: 4, kind: input, shape index: {}]   ;;  %s4993_s5 = inlined_call_operand.hbm [shape: f32[256,256], index: 5, kind: input, shape index: {}]   ;;  %s4994_s6 = inlined_call_operand.hbm [shape: f32[256,256], index: 6, kind: input, shape index: {}]   ;;  %s4995_s7 = inlined_call_operand.hbm [shape: f32[1,256], index: 7, kind: input, shape index: {}]   ;;  %s4996_s8 = inlined_call_operand.hbm [shape: f32[72,128], index: 8, kind: input, shape index: {}]   ;;  %s4997_s9 = inlined_call_operand.hbm [shape: f32[2304,256], index: 9, kind: input, shape index: {}]   ;;  %s4998_s10 = inlined_call_operand.hbm [shape: f32[1,256], index: 10, kind: input, shape index: {}]   ;;  %s4999_s11 = inlined_call_operand.hbm [shape: f32[256,128], index: 11, kind: input, shape index: {}]   ;;  %s5000_s12 = inlined_call_operand.hbm [shape: f32[1,128], index: 12, kind: input, shape index: {}]   ;;  %s5001_s13 = inlined_call_operand.vmem [shape: f32[128,100], index: 13, kind: input, shape index: {}]   ;;  %s5002_s14 = inlined_call_operand.hbm [shape: f32[1,100], index: 14, kind: input, shape index: {}]   ;;  %s5003_s15 = inlined_call_operand.hbm [shape: f32[1,100], index: 15, kind: input, shape index: {}]   ;;  %s5004_s16 = inlined_call_operand.hbm [shape: f32[1,100], index: 16, kind: input, shape index: {}]   ;;  %s5005_s17 = inlined_call_operand.vmem [shape: f32[100,2], index: 17, kind: input, shape index: {}]   ;;  %s5006_s18 = inlined_call_operand.hbm [shape: f32[1,2], index: 18, kind: input, shape index: {}]   ;;  %s5007_s19 = inlined_call_operand.hbm [shape: f32[128,256], index: 19, kind: output, shape index: {0}]   ;;  %s5008_s20 = inlined_call_operand.hbm [shape: f32[2,2], index: 20, kind: output, shape index: {1}]  }
   0x1   :  { %5012 = sst [smem:[#allocation50_spill]] %s4988_s0 }
   0x2   :  { %5013 = sst [smem:[#allocation51_spill]] %s4989_s1 }
   0x3   :  { %5014 = sst [smem:[#allocation52_spill]] %s4990_s2 }
   0x4   :  { %5015 = sst [smem:[#allocation53_spill]] %s4991_s3 }
   0x5   :  { %5016 = sst [smem:[#allocation54_spill]] %s4992_s4 }
   0x6   :  { %27 = vsyncpa [#allocation5], 0 }
   0x7   :  { %28 = vsyncpa [#allocation8], 0 }
   0x8   :  { %29 = vsyncpa [#allocation11], 0 }
   0x9   :  { %30 = vsyncpa [#allocation14], 0 }
   0xa   :  { %31 = vsyncpa [#allocation17], 0 }
   0xb   :  { %32 = vsyncpa [#allocation20], 0 }
   0xc   :  { %33 = vsyncpa [#allocation23], 0 }
   0xd   :  { %34 = vsyncpa [#allocation26], 0 }
   0xe   :  { %35 = vsyncpa [#allocation29], 0 }
   0xf   :  { %36 = vsyncpa [#allocation6], 0  ;;  %s5017_s23 = sld [smem:[#allocation51_spill]] }
  0x15   :  { %s53_s24 = sshll.u32 %s5017_s23, 4  ;;  %s54_s24 = int_to_ptr.hbm [resolvable:$true] %s53_s24 }
  0x16   :  { %37 = vsyncpa [#allocation32], 0  ;;  %s3981_s2 = smov [#allocation7]   ;;  %s5018_s27 = sld [smem:[#allocation53_spill]] }
  0x17   :  { %s55_s25 = sshll.u32 %s3981_s2, 4  ;;  %s5009_s4 = smov 256   ;;  %s56_s25 = int_to_ptr.vmem [resolvable:$true] %s55_s25 }
  0x18   :  { %s3983_s29 = smov 16   ;;  %s3984_s30 = smov [#allocation10]  }
  0x19   :  { %61 = dma.hbm_to_vmem [thread:$0]  %s54_s24, 4096, %s56_s25, [#allocation8], %s5009_s4, %s5009_s4, %s3983_s29  }
  0x1a   :  { %s82_s0 = sshll.u32 %s3984_s30, 4  ;;  %s105_s22 = sshll.u32 %s4994_s6, 4  ;;  %s83_s0 = int_to_ptr.vmem [resolvable:$true] %s82_s0  ;;  %s106_s22 = int_to_ptr.hbm [resolvable:$true] %s105_s22 }
  0x1b   :  { %s129_s3 = sshll.u32 %s4996_s8, 4  ;;  %s3985_s26 = smov [#allocation13]   ;;  %s130_s3 = int_to_ptr.hbm [resolvable:$true] %s129_s3 }
  0x1c   :  { %s80_s28 = sshll.u32 %s5018_s27, 4  ;;  %s107_s27 = sshll.u32 %s3985_s26, 4  ;;  %s81_s28 = int_to_ptr.hbm [resolvable:$true] %s80_s28  ;;  %s108_s27 = int_to_ptr.vmem [resolvable:$true] %s107_s27 }
  0x1d   :  { %85 = dma.hbm_to_vmem [thread:$0]  %s81_s28, 32, %s83_s0, [#allocation11]  }
  0x1e   :  { %113 = dma.hbm_to_vmem [thread:$0]  %s106_s22, 8192, %s108_s27, [#allocation14], %s5009_s4, %s5009_s4, %s3983_s29  }
  0x1f   :  { %s3986_s24 = smov [#allocation16]   ;;  %s5011_s30 = smov 128  }
  0x20   :  { %s131_s25 = sshll.u32 %s3986_s24, 4  ;;  %s3988_s6 = smov 8   ;;  %s132_s25 = int_to_ptr.vmem [resolvable:$true] %s131_s25 }
  0x21   :  { %137 = dma.hbm_to_vmem [thread:$0]  %s130_s3, 1152, %s132_s25, [#allocation17], %s5011_s30, %s5011_s30, %s3988_s6  }
  0x22   :  { %s156_s8 = sshll.u32 %s4998_s10, 4  ;;  %s3989_s21 = smov [#allocation19]   ;;  %s157_s8 = int_to_ptr.hbm [resolvable:$true] %s156_s8 }
  0x23   :  { %s158_s1 = sshll.u32 %s3989_s21, 4  ;;  %s180_s22 = sshll.u32 %s5000_s12, 4  ;;  %s159_s1 = int_to_ptr.vmem [resolvable:$true] %s158_s1  ;;  %s181_s22 = int_to_ptr.hbm [resolvable:$true] %s180_s22 }
  0x24   :  { %161 = dma.hbm_to_vmem [thread:$0]  %s157_s8, 32, %s159_s1, [#allocation20]  }
  0x25   :  { %s3990_s26 = smov [#allocation22]   ;;  %s204_s3 = sshll.u32 %s5003_s15, 4  ;;  %s205_s3 = int_to_ptr.hbm [resolvable:$true] %s204_s3 }
  0x26   :  { %s182_s27 = sshll.u32 %s3990_s26, 4  ;;  %s5019_s28 = sld [smem:[#allocation50_spill]]  ;;  %s183_s27 = int_to_ptr.vmem [resolvable:$true] %s182_s27 }
  0x27   :  { %185 = dma.hbm_to_vmem [thread:$0]  %s181_s22, 16, %s183_s27, [#allocation23]  }
  0x28   :  { %s3991_s21 = smov [#allocation25]   ;;  %s3992_s12 = smov [#allocation4]  }
  0x29   :  { %s206_s30 = sshll.u32 %s3991_s21, 4  ;;  %s45_s8 = sshll.u32 %s3992_s12, 4  ;;  %s207_s30 = int_to_ptr.vmem [resolvable:$true] %s206_s30  ;;  %s46_s8 = int_to_ptr.vmem [resolvable:$true] %s45_s8 }
  0x2a   :  { %209 = dma.hbm_to_vmem [thread:$0]  %s205_s3, 16, %s207_s30, [#allocation26]  }
  0x2b   :  { %s5020_s2 = sld [smem:[#allocation52_spill]]  ;;  %s92_s22 = sshll.u32 %s4993_s5, 4  ;;  %s93_s22 = int_to_ptr.hbm [resolvable:$true] %s92_s22 }
  0x2c   :  { %s43_s0 = sshll.u32 %s5019_s28, 4  ;;  %s3993_s27 = smov [#allocation9]   ;;  %s44_s0 = int_to_ptr.hbm [resolvable:$true] %s43_s0 }
  0x2d   :  { %48 = dma.hbm_to_vmem [thread:$0]  %s44_s0, 128, %s46_s8, [#allocation5]  }
  0x2e   :  { %s68_s24 = sshll.u32 %s3993_s27, 4  ;;  %s5021_s10 = smov 256   ;;  %s69_s24 = int_to_ptr.vmem [resolvable:$true] %s68_s24 }
  0x2f   :  { %s3994_s30 = smov [#allocation12]   ;;  %s119_s21 = sshll.u32 %s4995_s7, 4  ;;  %s120_s21 = int_to_ptr.hbm [resolvable:$true] %s119_s21 }
  0x30   :  { %s94_s3 = sshll.u32 %s3994_s30, 4  ;;  %s142_s12 = sshll.u32 %s4997_s9, 4  ;;  %s95_s3 = int_to_ptr.vmem [resolvable:$true] %s94_s3  ;;  %s143_s12 = int_to_ptr.hbm [resolvable:$true] %s142_s12 }
  0x31   :  { %s66_s26 = sshll.u32 %s5020_s2, 4  ;;  %s3995_s8 = smov [#allocation15]   ;;  %s67_s26 = int_to_ptr.hbm [resolvable:$true] %s66_s26 }
  0x32   :  { %74 = dma.hbm_to_vmem [thread:$0]  %s67_s26, 16384, %s69_s24, [#allocation8], %s5021_s10, %s5021_s10, %s3983_s29  }
  0x33   :  { %100 = dma.hbm_to_vmem [thread:$0]  %s93_s22, 8192, %s95_s3, [#allocation11], %s5021_s10, %s5021_s10, %s3983_s29  }
  0x34   :  { %s121_s1 = sshll.u32 %s3995_s8, 4  ;;  %s3996_s23 = smov [#allocation18]   ;;  %s122_s1 = int_to_ptr.vmem [resolvable:$true] %s121_s1 }
  0x35   :  { %124 = dma.hbm_to_vmem [thread:$0]  %s120_s21, 32, %s122_s1, [#allocation14]  }
  0x36   :  { %s144_s2 = sshll.u32 %s3996_s23, 4  ;;  %s166_s7 = sshll.u32 %s4999_s11, 4  ;;  %s145_s2 = int_to_ptr.vmem [resolvable:$true] %s144_s2  ;;  %s167_s7 = int_to_ptr.hbm [resolvable:$true] %s166_s7 }
  0x37   :  { %150 = dma.hbm_to_vmem [thread:$0]  %s143_s12, 73728, %s145_s2, [#allocation17], %s5021_s10, %s5021_s10, %s3983_s29  }
  0x38   :  { %s193_s9 = sshll.u32 %s5002_s14, 4  ;;  %s3997_s27 = smov [#allocation21]   ;;  %s194_s9 = int_to_ptr.hbm [resolvable:$true] %s193_s9 }
  0x39   :  { %s168_s24 = sshll.u32 %s3997_s27, 4  ;;  %s5022_s30 = smov 128   ;;  %s169_s24 = int_to_ptr.vmem [resolvable:$true] %s168_s24 }
  0x3a   :  { %174 = dma.hbm_to_vmem [thread:$0]  %s167_s7, 4096, %s169_s24, [#allocation20], %s5022_s30, %s5022_s30, %s3988_s6  }
  0x3b   :  { %s3998_s3 = smov [#allocation24]   ;;  %s215_s21 = sshll.u32 %s5004_s16, 4  ;;  %s216_s21 = int_to_ptr.hbm [resolvable:$true] %s215_s21 }
  0x3c   :  { %s195_s11 = sshll.u32 %s3998_s3, 4  ;;  %s228_s14 = sshll.u32 %s5006_s18, 4  ;;  %s196_s11 = int_to_ptr.vmem [resolvable:$true] %s195_s11  ;;  %s229_s14 = int_to_ptr.hbm [resolvable:$true] %s228_s14 }
  0x3d   :  { %198 = dma.hbm_to_vmem [thread:$0]  %s194_s9, 16, %s196_s11, [#allocation23]  }
  0x3e   :  { %s3999_s12 = smov [#allocation27]   ;;  %s4000_s1 = smov [#allocation28]  }
  0x3f   :  { %s217_s8 = sshll.u32 %s3999_s12, 4  ;;  %s230_s6 = sshll.u32 %s4000_s1, 4  ;;  %s218_s8 = int_to_ptr.vmem [resolvable:$true] %s217_s8  ;;  %s231_s6 = int_to_ptr.vmem [resolvable:$true] %s230_s6 }
  0x40   :  { %220 = dma.hbm_to_vmem [thread:$0]  %s216_s21, 16, %s218_s8, [#allocation26]  }
  0x41   :  { %233 = dma.hbm_to_vmem [thread:$0]  %s229_s14, 16, %s231_s6, [#allocation29]  }
  0x42   :  { %3959 = dma.done.wait [#allocation5], 128  }
  0x43   :  { %3960 = vsyncadd [#allocation5], 4294967168 }
  0x44   :  { %3961 = dma.done.wait [#allocation8], 20480  }
  0x45   :  { %3962 = vsyncadd [#allocation8], 4294946816 }
  0x46   :  { %3963 = dma.done.wait [#allocation11], 8224  }
  0x47   :  { %3964 = vsyncadd [#allocation11], 4294959072 }
  0x48   :  { %3965 = dma.done.wait [#allocation14], 8224  }
  0x49   :  { %3966 = vsyncadd [#allocation14], 4294959072 }
  0x4a   :  { %3967 = dma.done.wait [#allocation17], 74880  }
  0x4b   :  { %3968 = vsyncadd [#allocation17], 4294892416 }
  0x4c   :  { %3969 = dma.done.wait [#allocation20], 4128  }
  0x4d   :  { %3970 = vsyncadd [#allocation20], 4294963168 }
  0x4e   :  { %3971 = dma.done.wait [#allocation23], 32  }
  0x4f   :  { %3972 = vsyncadd [#allocation23], 4294967264 }
  0x50   :  { %3973 = dma.done.wait [#allocation26], 32  }
  0x51   :  { %3974 = vsyncadd [#allocation26], 4294967264 }
  0x52   :  { %3975 = dma.done.wait [#allocation29], 16  }
  0x53   :  { %3976 = vsyncadd [#allocation29], 4294967280  ;;  %v415_v0 = vld [vmem:[#allocation9 + $0x2f0] sm:$0xff]  ;;  %v413_v2 = vld [vmem:[#allocation9 + $0x2e0] sm:$0xff]  ;;  %vm625_vm0 = vcmask 1041408   ;;  %vm643_vm1 = vcmask 1040384  }
  0x54   :  { %v351_v1 = vld [vmem:[#allocation9 + $0xf0] sm:$0xff]  ;;  %505 = vmatpush.msra.mxu2 %v415_v0  ;;  %v349_v4 = vld [vmem:[#allocation9 + $0xe0] sm:$0xff]  ;;  %v416_v62 = vld [vmem:[#allocation9 + $0x2f8] sm:$0xff]  ;;  %vm645_vm2 = vcmask 1041409   ;;  %s5023_s23 = sld [smem:[#allocation54_spill]]  ;;  %vm3305_vm5 = vcmask 812032  }
  0x55   :  { %465 = vmatpush.msra.mxu0 %v351_v1  ;;  %v447_v3 = vld [vmem:[#allocation9 + $0x3f0] sm:$0xff]  ;;  %v445_v7 = vld [vmem:[#allocation9 + $0x3e0] sm:$0xff]  ;;  %v352_v0 = vld [vmem:[#allocation9 + $0xf8] sm:$0xff]  ;;  %vm3375_vm6 = vcmask 1043456   ;;  %vm3371_vm11 = vcmask 818176   ;;  %vm3399_vm12 = vcmask 9216  }
  0x56   :  { %v383_v5 = vld [vmem:[#allocation9 + $0x1f0] sm:$0xff]  ;;  %525 = vmatpush.msra.mxu3 %v447_v3  ;;  %506 = vmatpush.msra.mxu2 %v413_v2  ;;  %v381_v9 = vld [vmem:[#allocation9 + $0x1e0] sm:$0xff]  ;;  %v448_v1 = vld [vmem:[#allocation9 + $0x3f8] sm:$0xff]  ;;  %s3420_s3 = sshll.u32 %s5007_s19, 4  ;;  %s4003_s11 = smov [#allocation31]   ;;  %s3421_s3 = int_to_ptr.hbm [resolvable:$true] %s3420_s3 }
  0x57   :  { %485 = vmatpush.msra.mxu1 %v383_v5  ;;  %v411_v6 = vld [vmem:[#allocation9 + $0x2d0] sm:$0xff]  ;;  %466 = vmatpush.msra.mxu0 %v349_v4  ;;  %v409_v11 = vld [vmem:[#allocation9 + $0x2c0] sm:$0xff]  ;;  %v414_v2 = vld [vmem:[#allocation9 + $0x2e8] sm:$0xff]  ;;  %s3432_s25 = sshll.u32 %s4003_s11, 4  ;;  %s3434_s5 = sshll.u32 %s5008_s20, 4  ;;  %s3433_s25 = int_to_ptr.vmem [resolvable:$true] %s3432_s25  ;;  %s3435_s5 = int_to_ptr.hbm [resolvable:$true] %s3434_s5 }
  0x58   :  { %v347_v8 = vld [vmem:[#allocation9 + $0xd0] sm:$0xff]  ;;  %526 = vmatpush.msra.mxu3 %v445_v7  ;;  %v345_v12 = vld [vmem:[#allocation9 + $0xc0] sm:$0xff]  ;;  %507 = vmatpush.msra.mxu2 %v411_v6  ;;  %v350_v4 = vld [vmem:[#allocation9 + $0xe8] sm:$0xff] }
  0x59   :  { %v443_v10 = vld [vmem:[#allocation9 + $0x3d0] sm:$0xff]  ;;  %486 = vmatpush.msra.mxu1 %v381_v9  ;;  %467 = vmatpush.msra.mxu0 %v347_v8  ;;  %v441_v14 = vld [vmem:[#allocation9 + $0x3c0] sm:$0xff]  ;;  %v384_v5 = vld [vmem:[#allocation9 + $0x1f8] sm:$0xff] }
  0x5a   :  { %v379_v13 = vld [vmem:[#allocation9 + $0x1d0] sm:$0xff]  ;;  %v377_v15 = vld [vmem:[#allocation9 + $0x1c0] sm:$0xff]  ;;  %527 = vmatpush.msra.mxu3 %v443_v10  ;;  %508 = vmatpush.msra.mxu2 %v409_v11  ;;  %v412_v6 = vld [vmem:[#allocation9 + $0x2d8] sm:$0xff]  ;;  %s831_s2 = smul.f32 64.0, %s5023_s23 }
  0x5b   :  { %487 = vmatpush.msra.mxu1 %v379_v13  ;;  %v407_v16 = vld [vmem:[#allocation9 + $0x2b0] sm:$0xff]  ;;  %468 = vmatpush.msra.mxu0 %v345_v12  ;;  %v405_v20 = vld [vmem:[#allocation9 + $0x2a0] sm:$0xff]  ;;  %v446_v7 = vld [vmem:[#allocation9 + $0x3e8] sm:$0xff] }
  0x5c   :  { %v343_v17 = vld [vmem:[#allocation9 + $0xb0] sm:$0xff]  ;;  %528 = vmatpush.msra.mxu3 %v441_v14  ;;  %v341_v21 = vld [vmem:[#allocation9 + $0xa0] sm:$0xff]  ;;  %509 = vmatpush.msra.mxu2 %v407_v16  ;;  %v348_v8 = vld [vmem:[#allocation9 + $0xd8] sm:$0xff] }
  0x5d   :  { %v439_v18 = vld [vmem:[#allocation9 + $0x3b0] sm:$0xff]  ;;  %488 = vmatpush.msra.mxu1 %v377_v15  ;;  %469 = vmatpush.msra.mxu0 %v343_v17  ;;  %v437_v22 = vld [vmem:[#allocation9 + $0x3a0] sm:$0xff]  ;;  %v382_v9 = vld [vmem:[#allocation9 + $0x1e8] sm:$0xff] }
  0x5e   :  { %v375_v19 = vld [vmem:[#allocation9 + $0x1b0] sm:$0xff]  ;;  %v373_v23 = vld [vmem:[#allocation9 + $0x1a0] sm:$0xff]  ;;  %529 = vmatpush.msra.mxu3 %v439_v18  ;;  %510 = vmatpush.msra.mxu2 %v405_v20  ;;  %v410_v10 = vld [vmem:[#allocation9 + $0x2c8] sm:$0xff] }
  0x5f   :  { %489 = vmatpush.msra.mxu1 %v375_v19  ;;  %v403_v24 = vld [vmem:[#allocation9 + $0x290] sm:$0xff]  ;;  %470 = vmatpush.msra.mxu0 %v341_v21  ;;  %v401_v28 = vld [vmem:[#allocation9 + $0x280] sm:$0xff]  ;;  %v444_v11 = vld [vmem:[#allocation9 + $0x3d8] sm:$0xff] }
  0x60   :  { %v339_v25 = vld [vmem:[#allocation9 + $0x90] sm:$0xff]  ;;  %530 = vmatpush.msra.mxu3 %v437_v22  ;;  %v337_v29 = vld [vmem:[#allocation9 + $0x80] sm:$0xff]  ;;  %511 = vmatpush.msra.mxu2 %v403_v24  ;;  %v346_v12 = vld [vmem:[#allocation9 + $0xc8] sm:$0xff] }
  0x61   :  { %v435_v26 = vld [vmem:[#allocation9 + $0x390] sm:$0xff]  ;;  %490 = vmatpush.msra.mxu1 %v373_v23  ;;  %471 = vmatpush.msra.mxu0 %v339_v25  ;;  %v433_v30 = vld [vmem:[#allocation9 + $0x380] sm:$0xff]  ;;  %v380_v13 = vld [vmem:[#allocation9 + $0x1d8] sm:$0xff] }
  0x62   :  { %v371_v27 = vld [vmem:[#allocation9 + $0x190] sm:$0xff]  ;;  %v369_v31 = vld [vmem:[#allocation9 + $0x180] sm:$0xff]  ;;  %531 = vmatpush.msra.mxu3 %v435_v26  ;;  %512 = vmatpush.msra.mxu2 %v401_v28  ;;  %v320_v14 = vld [vmem:[#allocation4] sm:$0xff] }
  0x63   :  { %491 = vmatpush.msra.mxu1 %v371_v27  ;;  %v399_v32 = vld [vmem:[#allocation9 + $0x270] sm:$0xff]  ;;  %472 = vmatpush.msra.mxu0 %v337_v29  ;;  %v397_v36 = vld [vmem:[#allocation9 + $0x260] sm:$0xff]  ;;  %v408_v15 = vld [vmem:[#allocation9 + $0x2b8] sm:$0xff]  ;;  %456 = vst [vmem:[#allocation1] ss:$4 sm:$0xff] %v320_v14 }
  0x64   :  { %v335_v33 = vld [vmem:[#allocation9 + $0x70] sm:$0xff]  ;;  %532 = vmatpush.msra.mxu3 %v433_v30  ;;  %v333_v37 = vld [vmem:[#allocation9 + $0x60] sm:$0xff]  ;;  %513 = vmatpush.msra.mxu2 %v399_v32  ;;  %v442_v16 = vld [vmem:[#allocation9 + $0x3c8] sm:$0xff] }
  0x65   :  { %v431_v34 = vld [vmem:[#allocation9 + $0x370] sm:$0xff]  ;;  %492 = vmatpush.msra.mxu1 %v369_v31  ;;  %473 = vmatpush.msra.mxu0 %v335_v33  ;;  %v429_v38 = vld [vmem:[#allocation9 + $0x360] sm:$0xff]  ;;  %v344_v17 = vld [vmem:[#allocation9 + $0xb8] sm:$0xff] }
  0x66   :  { %v367_v35 = vld [vmem:[#allocation9 + $0x170] sm:$0xff]  ;;  %v365_v39 = vld [vmem:[#allocation9 + $0x160] sm:$0xff]  ;;  %533 = vmatpush.msra.mxu3 %v431_v34  ;;  %514 = vmatpush.msra.mxu2 %v397_v36  ;;  %v378_v18 = vld [vmem:[#allocation9 + $0x1c8] sm:$0xff] }
  0x67   :  { %493 = vmatpush.msra.mxu1 %v367_v35  ;;  %v395_v40 = vld [vmem:[#allocation9 + $0x250] sm:$0xff]  ;;  %474 = vmatpush.msra.mxu0 %v333_v37  ;;  %v393_v44 = vld [vmem:[#allocation9 + $0x240] sm:$0xff]  ;;  %v406_v19 = vld [vmem:[#allocation9 + $0x2a8] sm:$0xff] }
  0x68   :  { %v331_v41 = vld [vmem:[#allocation9 + $0x50] sm:$0xff]  ;;  %534 = vmatpush.msra.mxu3 %v429_v38  ;;  %v329_v45 = vld [vmem:[#allocation9 + $0x40] sm:$0xff]  ;;  %515 = vmatpush.msra.mxu2 %v395_v40  ;;  %v440_v20 = vld [vmem:[#allocation9 + $0x3b8] sm:$0xff] }
  0x69   :  { %v427_v42 = vld [vmem:[#allocation9 + $0x350] sm:$0xff]  ;;  %494 = vmatpush.msra.mxu1 %v365_v39  ;;  %475 = vmatpush.msra.mxu0 %v331_v41  ;;  %v425_v46 = vld [vmem:[#allocation9 + $0x340] sm:$0xff]  ;;  %v342_v21 = vld [vmem:[#allocation9 + $0xa8] sm:$0xff] }
  0x6a   :  { %v363_v43 = vld [vmem:[#allocation9 + $0x150] sm:$0xff]  ;;  %v361_v47 = vld [vmem:[#allocation9 + $0x140] sm:$0xff]  ;;  %535 = vmatpush.msra.mxu3 %v427_v42  ;;  %516 = vmatpush.msra.mxu2 %v393_v44  ;;  %v376_v22 = vld [vmem:[#allocation9 + $0x1b8] sm:$0xff] }
  0x6b   :  { %495 = vmatpush.msra.mxu1 %v363_v43  ;;  %v391_v48 = vld [vmem:[#allocation9 + $0x230] sm:$0xff]  ;;  %476 = vmatpush.msra.mxu0 %v329_v45  ;;  %v389_v52 = vld [vmem:[#allocation9 + $0x220] sm:$0xff]  ;;  %v404_v23 = vld [vmem:[#allocation9 + $0x298] sm:$0xff] }
  0x6c   :  { %v327_v49 = vld [vmem:[#allocation9 + $0x30] sm:$0xff]  ;;  %536 = vmatpush.msra.mxu3 %v425_v46  ;;  %v325_v53 = vld [vmem:[#allocation9 + $0x20] sm:$0xff]  ;;  %517 = vmatpush.msra.mxu2 %v391_v48  ;;  %v438_v24 = vld [vmem:[#allocation9 + $0x3a8] sm:$0xff] }
  0x6d   :  { %v423_v50 = vld [vmem:[#allocation9 + $0x330] sm:$0xff]  ;;  %496 = vmatpush.msra.mxu1 %v361_v47  ;;  %477 = vmatpush.msra.mxu0 %v327_v49  ;;  %v421_v54 = vld [vmem:[#allocation9 + $0x320] sm:$0xff]  ;;  %v340_v25 = vld [vmem:[#allocation9 + $0x98] sm:$0xff] }
  0x6e   :  { %v359_v51 = vld [vmem:[#allocation9 + $0x130] sm:$0xff]  ;;  %v357_v55 = vld [vmem:[#allocation9 + $0x120] sm:$0xff]  ;;  %537 = vmatpush.msra.mxu3 %v423_v50  ;;  %518 = vmatpush.msra.mxu2 %v389_v52  ;;  %v374_v26 = vld [vmem:[#allocation9 + $0x1a8] sm:$0xff] }
  0x6f   :  { %497 = vmatpush.msra.mxu1 %v359_v51  ;;  %v387_v56 = vld [vmem:[#allocation9 + $0x210] sm:$0xff]  ;;  %478 = vmatpush.msra.mxu0 %v325_v53  ;;  %v385_v60 = vld [vmem:[#allocation9 + $0x200] sm:$0xff]  ;;  %v402_v27 = vld [vmem:[#allocation9 + $0x288] sm:$0xff] }
  0x70   :  { %v323_v57 = vld [vmem:[#allocation9 + $0x10] sm:$0xff]  ;;  %538 = vmatpush.msra.mxu3 %v421_v54  ;;  %v321_v61 = vld [vmem:[#allocation9] sm:$0xff]  ;;  %519 = vmatpush.msra.mxu2 %v387_v56  ;;  %v436_v28 = vld [vmem:[#allocation9 + $0x398] sm:$0xff] }
  0x71   :  { %v419_v58 = vld [vmem:[#allocation9 + $0x310] sm:$0xff]  ;;  %498 = vmatpush.msra.mxu1 %v357_v55  ;;  %479 = vmatpush.msra.mxu0 %v323_v57  ;;  %v417_v63 = vld [vmem:[#allocation9 + $0x300] sm:$0xff]  ;;  %v338_v29 = vld [vmem:[#allocation9 + $0x88] sm:$0xff] }
  0x72   :  { %v355_v59 = vld [vmem:[#allocation9 + $0x110] sm:$0xff]  ;;  %539 = vmatpush.msra.mxu3 %v419_v58  ;;  %520 = vmatpush.msra.mxu2 %v385_v60  ;;  %v353_v3 = vld [vmem:[#allocation9 + $0x100] sm:$0xff]  ;;  %v372_v30 = vld [vmem:[#allocation9 + $0x198] sm:$0xff] }
  0x73   :  { %499 = vmatpush.msra.mxu1 %v355_v59  ;;  %480 = vmatpush.msra.mxu0 %v321_v61  ;;  %v400_v31 = vld [vmem:[#allocation9 + $0x278] sm:$0xff]  ;;  %v434_v32 = vld [vmem:[#allocation9 + $0x388] sm:$0xff]  ;;  %v459_v45 = vld.sshfl [vmem:[#allocation1 + $0x10] sm:$0xff pattern:$0x73625140] }
  0x74   :  { %585 = vmatpush.msrb.mxu2 %v416_v62  ;;  %540 = vmatpush.msra.mxu3 %v417_v63  ;;  %v336_v33 = vld [vmem:[#allocation9 + $0x78] sm:$0xff]  ;;  %v370_v34 = vld [vmem:[#allocation9 + $0x188] sm:$0xff]  ;;  %v457_v50 = vld.sshfl [vmem:[#allocation1] sm:$0xff pattern:$0x73625140] }
  0x75   :  { %545 = vmatpush.msrb.mxu0 %v352_v0  ;;  %500 = vmatpush.msra.mxu1 %v353_v3  ;;  %v398_v35 = vld [vmem:[#allocation9 + $0x268] sm:$0xff]  ;;  %v432_v36 = vld [vmem:[#allocation9 + $0x378] sm:$0xff] }
  0x76   :  { %605 = vmatpush.msrb.mxu3 %v448_v1  ;;  %586 = vmatpush.msrb.mxu2 %v414_v2  ;;  %v334_v37 = vld [vmem:[#allocation9 + $0x68] sm:$0xff]  ;;  %v368_v38 = vld [vmem:[#allocation9 + $0x178] sm:$0xff] }
  0x77   :  { %546 = vmatpush.msrb.mxu0 %v350_v4  ;;  %565 = vmatpush.msrb.mxu1 %v384_v5  ;;  %v396_v39 = vld [vmem:[#allocation9 + $0x258] sm:$0xff]  ;;  %v430_v40 = vld [vmem:[#allocation9 + $0x368] sm:$0xff]  ;;  %v4178_v5 = vld [vmem:[#allocation7 + $0x10] sm:$0xff] }
  0x78   :  { %587 = vmatpush.msrb.mxu2 %v412_v6  ;;  %606 = vmatpush.msrb.mxu3 %v446_v7  ;;  %v332_v41 = vld [vmem:[#allocation9 + $0x58] sm:$0xff]  ;;  %v366_v42 = vld [vmem:[#allocation9 + $0x168] sm:$0xff]  ;;  %v4182_v7 = vld [vmem:[#allocation7] sm:$0xff] }
  0x79   :  { %547 = vmatpush.msrb.mxu0 %v348_v8  ;;  %566 = vmatpush.msrb.mxu1 %v382_v9  ;;  %v394_v43 = vld [vmem:[#allocation9 + $0x248] sm:$0xff]  ;;  %v428_v44 = vld [vmem:[#allocation9 + $0x358] sm:$0xff] }
  0x7a   :  { %588 = vmatpush.msrb.mxu2 %v410_v10  ;;  %607 = vmatpush.msrb.mxu3 %v444_v11  ;;  %v330_v46 = vld [vmem:[#allocation9 + $0x48] sm:$0xff]  ;;  %v364_v47 = vld [vmem:[#allocation9 + $0x158] sm:$0xff]  ;;  %v449_v11 = vld [vmem:[#allocation10] sm:$0x3] }
  0x7b   :  { %548 = vmatpush.msrb.mxu0 %v346_v12  ;;  %567 = vmatpush.msrb.mxu1 %v380_v13  ;;  %v392_v48 = vld [vmem:[#allocation9 + $0x238] sm:$0xff]  ;;  %v426_v49 = vld [vmem:[#allocation9 + $0x348] sm:$0xff]  ;;  %v451_v12 = vperm.slane %v449_v11, 0 }
  0x7c   :  { %589 = vmatpush.msrb.mxu2 %v408_v15  ;;  %608 = vmatpush.msrb.mxu3 %v442_v16  ;;  %v460_v51 = vld.sshfl [vmem:[#allocation1 + $0x18] sm:$0xff pattern:$0x73625140]  ;;  %v328_v52 = vld [vmem:[#allocation9 + $0x38] sm:$0xff] }
  0x7d   :  { %549 = vmatpush.msrb.mxu0 %v344_v17  ;;  %568 = vmatpush.msrb.mxu1 %v378_v18  ;;  %v362_v53 = vld [vmem:[#allocation9 + $0x148] sm:$0xff]  ;;  %v424_v55 = vld [vmem:[#allocation9 + $0x338] sm:$0xff] }
  0x7e   :  { %590 = vmatpush.msrb.mxu2 %v406_v19  ;;  %609 = vmatpush.msrb.mxu3 %v440_v20  ;;  %v390_v54 = vld [vmem:[#allocation9 + $0x228] sm:$0xff]  ;;  %v458_v56 = vld.sshfl [vmem:[#allocation1 + $0x8] sm:$0xff pattern:$0x73625140]  ;;  %v452_v19 = vperm.slane %v449_v11, 1 }
  0x7f   :  { %550 = vmatpush.msrb.mxu0 %v342_v21  ;;  %569 = vmatpush.msrb.mxu1 %v376_v22  ;;  %v326_v57 = vld [vmem:[#allocation9 + $0x28] sm:$0xff]  ;;  %v360_v58 = vld [vmem:[#allocation9 + $0x138] sm:$0xff] }
  0x80   :  { %591 = vmatpush.msrb.mxu2 %v404_v23  ;;  %610 = vmatpush.msrb.mxu3 %v438_v24  ;;  %v388_v59 = vld [vmem:[#allocation9 + $0x218] sm:$0xff]  ;;  %v422_v60 = vld [vmem:[#allocation9 + $0x328] sm:$0xff] }
  0x81   :  { %551 = vmatpush.msrb.mxu0 %v340_v25  ;;  %570 = vmatpush.msrb.mxu1 %v374_v26  ;;  %v324_v61 = vld [vmem:[#allocation9 + $0x18] sm:$0xff]  ;;  %v358_v62 = vld [vmem:[#allocation9 + $0x128] sm:$0xff] }
  0x82   :  { %592 = vmatpush.msrb.mxu2 %v402_v27  ;;  %611 = vmatpush.msrb.mxu3 %v436_v28  ;;  %v386_v63 = vld [vmem:[#allocation9 + $0x208] sm:$0xff]  ;;  %v420_v0 = vld [vmem:[#allocation9 + $0x318] sm:$0xff] }
  0x83   :  { %552 = vmatpush.msrb.mxu0 %v338_v29  ;;  %571 = vmatpush.msrb.mxu1 %v372_v30  ;;  %v322_v1 = vld [vmem:[#allocation9 + $0x8] sm:$0xff]  ;;  %v356_v2 = vld [vmem:[#allocation9 + $0x118] sm:$0xff] }
  0x84   :  { %593 = vmatpush.msrb.mxu2 %v400_v31  ;;  %612 = vmatpush.msrb.mxu3 %v434_v32  ;;  %v418_v3 = vld [vmem:[#allocation9 + $0x308] sm:$0xff]  ;;  %v4180_v6 = vld [vmem:[#allocation7 + $0x18] sm:$0xff] }
  0x85   :  { %553 = vmatpush.msrb.mxu0 %v336_v33  ;;  %572 = vmatpush.msrb.mxu1 %v370_v34  ;;  %v354_v4 = vld [vmem:[#allocation9 + $0x108] sm:$0xff]  ;;  %v705_v8 = vadd.f32 %v4180_v6, %v4178_v5 }
  0x86   :  { %594 = vmatpush.msrb.mxu2 %v398_v35  ;;  %613 = vmatpush.msrb.mxu3 %v432_v36  ;;  %v4186_v9 = vld [vmem:[#allocation7 + $0x8] sm:$0xff] }
  0x87   :  { %554 = vmatpush.msrb.mxu0 %v334_v37  ;;  %573 = vmatpush.msrb.mxu1 %v368_v38  ;;  %v702_v10 = vadd.f32 %v4186_v9, %v4182_v7 }
  0x88   :  { %595 = vmatpush.msrb.mxu2 %v396_v39  ;;  %614 = vmatpush.msrb.mxu3 %v430_v40 }
  0x89   :  { %555 = vmatpush.msrb.mxu0 %v332_v41  ;;  %574 = vmatpush.msrb.mxu1 %v366_v42 }
  0x8a   :  { %596 = vmatpush.msrb.mxu2 %v394_v43  ;;  %615 = vmatpush.msrb.mxu3 %v428_v44 }
  0x8b   :  { %521 = vmatmul.f32.vlgmr.msra.gmra.mxu2 %v459_v45  ;;  %556 = vmatpush.msrb.mxu0 %v330_v46  ;;  %v4217_v46 = vld [vmem:[#allocation7 + $0x20] sm:$0xff] }
  0x8c   :  { %575 = vmatpush.msrb.mxu1 %v364_v47  ;;  %597 = vmatpush.msrb.mxu2 %v392_v48  ;;  %v4219_v47 = vld [vmem:[#allocation7 + $0x28] sm:$0xff]  ;;  %v4221_v48 = vld [vmem:[#allocation7 + $0x30] sm:$0xff] }
  0x8d   :  { %616 = vmatpush.msrb.mxu3 %v426_v49  ;;  %481 = vmatmul.f32.vlgmr.msra.gmra.mxu0 %v457_v50  ;;  %v4223_v49 = vld [vmem:[#allocation7 + $0x38] sm:$0xff] }
  0x8e   :  { %541 = vmatmul.f32.vlgmr.msra.gmra.mxu3 %v460_v51  ;;  %557 = vmatpush.msrb.mxu0 %v328_v52  ;;  %v711_v52 = vadd.f32 %v4223_v49, %v4221_v48 }
  0x8f   :  { %576 = vmatpush.msrb.mxu1 %v362_v53  ;;  %598 = vmatpush.msrb.mxu2 %v390_v54  ;;  %v708_v53 = vadd.f32 %v4219_v47, %v4217_v46 }
  0x90   :  { %617 = vmatpush.msrb.mxu3 %v424_v55  ;;  %501 = vmatmul.f32.vlgmr.msra.gmra.mxu1 %v458_v56  ;;  %v4233_v55 = vld [vmem:[#allocation7 + $0x40] sm:$0xff] }
  0x91   :  { %558 = vmatpush.msrb.mxu0 %v326_v57  ;;  %577 = vmatpush.msrb.mxu1 %v360_v58 }
  0x92   :  { %599 = vmatpush.msrb.mxu2 %v388_v59  ;;  %618 = vmatpush.msrb.mxu3 %v422_v60 }
  0x93   :  { %559 = vmatpush.msrb.mxu0 %v324_v61  ;;  %578 = vmatpush.msrb.mxu1 %v358_v62 }
  0x94   :  { %600 = vmatpush.msrb.mxu2 %v386_v63  ;;  %619 = vmatpush.msrb.mxu3 %v420_v0  ;;  %v4247_v0 = vld [vmem:[#allocation7 + $0x50] sm:$0xff] }
  0x95   :  { %601 = vmatmul.f32.vlgmr.msrb.gmra.mxu2 %v459_v45  ;;  %560 = vmatpush.msrb.mxu0 %v322_v1  ;;  %v4249_v1 = vld [vmem:[#allocation7 + $0x58] sm:$0xff] }
  0x96   :  { %579 = vmatpush.msrb.mxu1 %v356_v2  ;;  %620 = vmatpush.msrb.mxu3 %v418_v3  ;;  %v4251_v2 = vld [vmem:[#allocation7 + $0x60] sm:$0xff]  ;;  %v4253_v3 = vld [vmem:[#allocation7 + $0x68] sm:$0xff]  ;;  %v717_v11 = vadd.f32 %v4249_v1, %v4247_v0 }
  0x97   :  { %561 = vmatmul.f32.vlgmr.msrb.gmra.mxu0 %v457_v50  ;;  %621 = vmatmul.f32.vlgmr.msrb.gmra.mxu3 %v460_v51 }
  0x98   :  { %580 = vmatpush.msrb.mxu1 %v354_v4  ;;  %706 = vadd.xlane.f32.xlu2 %v705_v8 }
  0x99   :  { %581 = vmatmul.f32.vlgmr.msrb.gmra.mxu1 %v458_v56  ;;  %703 = vadd.xlane.f32.xlu1 %v702_v10  ;;  %v4235_v56 = vld [vmem:[#allocation7 + $0x48] sm:$0xff]  ;;  %v720_v10 = vadd.f32 %v4253_v3, %v4251_v2 }
  0x9a   :  { %v714_v61 = vadd.f32 %v4235_v56, %v4233_v55 }
 0x10a   :  { %v482_v13 = vpop.f32.mrf.mxu0 }
 0x10b   :  { %v483_v14 = vadd.f32 %v482_v13, %v451_v12  ;;  %v4263_v13 = vld [vmem:[#allocation7 + $0x70] sm:$0xff] }
 0x10d   :  { %v502_v15 = vpop.f32.mrf.mxu1 }
 0x10e   :  { %v522_v16 = vpop.f32.mrf.mxu2  ;;  %v503_v17 = vadd.f32 %v502_v15, %v483_v14  ;;  %v4265_v14 = vld [vmem:[#allocation7 + $0x78] sm:$0xff] }
 0x110   :  { %v523_v21 = vadd.f32 %v522_v16, %v503_v17 }
 0x111   :  { %v542_v18 = vpop.f32.mrf.mxu3 }
 0x112   :  { %v4190_v26 = vadd.f32 %v542_v18, %v523_v21  ;;  %v723_v21 = vadd.f32 %v4265_v14, %v4263_v13 }
 0x114   :  { %v562_v20 = vpop.f32.mrf.mxu0  ;;  %v626_v31 = vsel %vm625_vm0, %v4190_v26, -inf  ;;  %v631_v44 = vsel %vm625_vm0, %v4190_v26, inf  ;;  %vm636_vm4 = vcmp.ge.f32.partialorder %v4190_v26, 0.0 }
 0x115   :  { %v563_v22 = vadd.f32 %v562_v20, %v452_v19 }
 0x116   :  { %v582_v23 = vpop.f32.mrf.mxu1 }
 0x117   :  { %v583_v24 = vadd.f32 %v582_v23, %v563_v22 }
 0x118   :  { %v602_v25 = vpop.f32.mrf.mxu2 }
 0x119   :  { %v603_v27 = vadd.f32 %v602_v25, %v583_v24 }
 0x11a   :  { %v622_v28 = vpop.f32.mrf.mxu3 }
 0x11b   :  { %v4192_v29 = vadd.f32 %v622_v28, %v603_v27  ;;  %v4283_v27 = vld [vmem:[#allocation7 + $0x80] sm:$0xff]  ;;  %v4285_v28 = vld [vmem:[#allocation7 + $0x88] sm:$0xff] }
 0x11d   :  { %v642_v30 = vrot.slane %v4192_v29, 7  ;;  %v627_v32 = vsel %vm625_vm0, %v4192_v29, -inf  ;;  %v632_v41 = vsel %vm625_vm0, %v4192_v29, inf  ;;  %vm637_vm3 = vcmp.ge.f32.partialorder %v4192_v29, 0.0 }
 0x11e   :  { %v628_v33 = vmax.f32 %v626_v31, %v627_v32  ;;  %v633_v45 = vmin.f32 %v631_v44, %v632_v41  ;;  %v4289_v31 = vld [vmem:[#allocation7 + $0x98] sm:$0xff] }
 0x11f   :  { %v644_v34 = vsel %vm643_vm1, %v4190_v26, %v642_v30  ;;  %v646_v15 = vsel %vm645_vm2, %v4190_v26, %v642_v30  ;;  %v4287_v30 = vld [vmem:[#allocation7 + $0x90] sm:$0xff] }
 0x120   :  { %v4201_v35 = vperm.slane %v644_v34, 0  ;;  %v4203_v36 = vperm.slane %v644_v34, 1  ;;  %629 = vmax.xlane.f32.xlu0 %v628_v33  ;;  %v647_v18 = vrot.slane %v646_v15, 1  ;;  %v729_v34 = vadd.f32 %v4289_v31, %v4287_v30  ;;  %v1083_v15 = vld [vmem:[#allocation13 + $0xd0] sm:$0xff] }
 0x122   :  { %v752_v37 = vmul.f32 %v4178_v5, %v4201_v35  ;;  %v753_v38 = vmul.f32 %v4180_v6, %v4203_v36  ;;  %v750_v39 = vmul.f32 %v4182_v7, %v4201_v35  ;;  %v751_v40 = vmul.f32 %v4186_v9, %v4203_v36 }
 0x123   :  { %v754_v50 = vmul.f32 %v4217_v46, %v4201_v35  ;;  %v755_v51 = vmul.f32 %v4219_v47, %v4203_v36  ;;  %v758_v57 = vmul.f32 %v4233_v55, %v4201_v35  ;;  %v759_v58 = vmul.f32 %v4235_v56, %v4203_v36 }
 0x124   :  { %v785_v42 = vadd.f32 %v753_v38, %v752_v37  ;;  %v782_v43 = vadd.f32 %v751_v40, %v750_v39  ;;  %v756_v59 = vmul.f32 %v4221_v48, %v4201_v35  ;;  %v757_v60 = vmul.f32 %v4223_v49, %v4203_v36  ;;  %v4299_v39 = vld [vmem:[#allocation7 + $0xa0] sm:$0xff]  ;;  %v4301_v40 = vld [vmem:[#allocation7 + $0xa8] sm:$0xff] }
 0x125   :  { %v788_v54 = vadd.f32 %v755_v51, %v754_v50  ;;  %v794_v62 = vadd.f32 %v759_v58, %v758_v57  ;;  %v760_v4 = vmul.f32 %v4247_v0, %v4201_v35  ;;  %v761_v8 = vmul.f32 %v4249_v1, %v4203_v36  ;;  %v4319_v57 = vld [vmem:[#allocation7 + $0xc8] sm:$0xff]  ;;  %v1087_v58 = vld [vmem:[#allocation13 + $0xf0] sm:$0xff] }
 0x126   :  { %786 = vadd.xlane.f32.xlu2 %v785_v42  ;;  %783 = vadd.xlane.f32.xlu1 %v782_v43  ;;  %v791_v63 = vadd.f32 %v757_v60, %v756_v59  ;;  %v764_v16 = vmul.f32 %v4263_v13, %v4201_v35  ;;  %v765_v17 = vmul.f32 %v4265_v14, %v4203_v36  ;;  %v4279_v23 = vperm.slane %v647_v18, 0  ;;  %v1119_v59 = vld [vmem:[#allocation13 + $0x1f0] sm:$0xff]  ;;  %v1088_v60 = vld [vmem:[#allocation13 + $0xf8] sm:$0xff] }
 0x127   :  { %v797_v12 = vadd.f32 %v761_v8, %v760_v4  ;;  %v762_v19 = vmul.f32 %v4251_v2, %v4201_v35  ;;  %v763_v20 = vmul.f32 %v4253_v3, %v4203_v36  ;;  %v4281_v24 = vperm.slane %v647_v18, 1  ;;  %1121 = vmatpush.msra.mxu0 %v1087_v58  ;;  %1186 = vmatpush.msra.mxu1 %v1119_v59  ;;  %v1085_v4 = vld [vmem:[#allocation13 + $0xe0] sm:$0xff]  ;;  %v4347_v58 = vld [vmem:[#allocation7 + $0xf0] sm:$0xff]  ;;  %v4349_v59 = vld [vmem:[#allocation7 + $0xf8] sm:$0xff] }
 0x128   :  { %634 = vmin.xlane.f32.xlu0 %v633_v45  ;;  %v803_v22 = vadd.f32 %v765_v17, %v764_v16  ;;  %v766_v32 = vmul.f32 %v4283_v27, %v4279_v23  ;;  %v726_v37 = vadd.f32 %v4285_v28, %v4283_v27  ;;  %v770_v41 = vmul.f32 %v4299_v39, %v4279_v23  ;;  %v1117_v8 = vld [vmem:[#allocation13 + $0x1e0] sm:$0xff]  ;;  %v1115_v16 = vld [vmem:[#allocation13 + $0x1d0] sm:$0xff]  ;;  %v1084_v17 = vld [vmem:[#allocation13 + $0xd8] sm:$0xff] }
 0x129   :  { %v800_v25 = vadd.f32 %v763_v20, %v762_v19  ;;  %v767_v33 = vmul.f32 %v4285_v28, %v4281_v24  ;;  %v771_v42 = vmul.f32 %v4301_v40, %v4281_v24  ;;  %v768_v43 = vmul.f32 %v4287_v30, %v4279_v23  ;;  %1251 = vmatpush.msra.mxu2 %v1088_v60  ;;  %v1116_v19 = vld [vmem:[#allocation13 + $0x1d8] sm:$0xff] }
 0x12a   :  { %v769_v44 = vmul.f32 %v4289_v31, %v4281_v24  ;;  %v732_v45 = vadd.f32 %v4301_v40, %v4299_v39  ;;  %1122 = vmatpush.msra.mxu0 %v1085_v4  ;;  %1187 = vmatpush.msra.mxu1 %v1117_v8  ;;  %v780_v8 = vmul.f32 %v4347_v58, %v4279_v23 }
 0x12b   :  { %v806_v38 = vadd.f32 %v767_v33, %v766_v32  ;;  %v812_v50 = vadd.f32 %v771_v42, %v770_v41  ;;  %v1113_v32 = vld [vmem:[#allocation13 + $0x1c0] sm:$0xff]  ;;  %v1082_v33 = vld [vmem:[#allocation13 + $0xc8] sm:$0xff]  ;;  %v775_v42 = vmul.f32 %v4319_v57, %v4281_v24 }
 0x12c   :  { %v809_v51 = vadd.f32 %v769_v44, %v768_v43  ;;  %1123 = vmatpush.msra.mxu0 %v1083_v15  ;;  %1188 = vmatpush.msra.mxu1 %v1115_v16  ;;  %v1080_v15 = vld [vmem:[#allocation13 + $0xb8] sm:$0xff] }
 0x12d   :  { %v1112_v16 = vld [vmem:[#allocation13 + $0x1b8] sm:$0xff] }
 0x12e   :  { %712 = vadd.xlane.f32.xlu2 %v711_v52  ;;  %789 = vadd.xlane.f32.xlu1 %v788_v54  ;;  %v4313_v52 = vld [vmem:[#allocation7 + $0xb0] sm:$0xff]  ;;  %v4317_v54 = vld [vmem:[#allocation7 + $0xc0] sm:$0xff] }
 0x12f   :  { %1189 = vmatpush.msra.mxu1 %v1113_v32  ;;  %v774_v41 = vmul.f32 %v4317_v54, %v4279_v23 }
 0x130   :  { %709 = vadd.xlane.f32.xlu0 %v708_v53  ;;  %v4315_v53 = vld [vmem:[#allocation7 + $0xb8] sm:$0xff] }
 0x131   :  { %v735_v18 = vadd.f32 %v4315_v53, %v4313_v52 }
 0x136   :  { %795 = vadd.xlane.f32.xlu2 %v794_v62  ;;  %715 = vadd.xlane.f32.xlu1 %v714_v61  ;;  %v772_v61 = vmul.f32 %v4313_v52, %v4279_v23  ;;  %v773_v62 = vmul.f32 %v4315_v53, %v4281_v24 }
 0x138   :  { %792 = vadd.xlane.f32.xlu0 %v791_v63  ;;  %v1120_v63 = vld [vmem:[#allocation13 + $0x1f8] sm:$0xff]  ;;  %v815_v20 = vadd.f32 %v773_v62, %v772_v61  ;;  %v747_v62 = vadd.f32 %v4349_v59, %v4347_v58 }
 0x139   :  { %1316 = vmatpush.msra.mxu3 %v1120_v63 }
 0x13e   :  { %721 = vadd.xlane.f32.xlu2 %v720_v10  ;;  %798 = vadd.xlane.f32.xlu1 %v797_v12  ;;  %v738_v10 = vadd.f32 %v4319_v57, %v4317_v54  ;;  %v1118_v12 = vld [vmem:[#allocation13 + $0x1e8] sm:$0xff] }
 0x13f   :  { %1317 = vmatpush.msra.mxu3 %v1118_v12  ;;  %v1111_v12 = vld [vmem:[#allocation13 + $0x1b0] sm:$0xff] }
 0x140   :  { %718 = vadd.xlane.f32.xlu0 %v717_v11  ;;  %v1086_v11 = vld [vmem:[#allocation13 + $0xe8] sm:$0xff]  ;;  %1190 = vmatpush.msra.mxu1 %v1111_v12  ;;  %v1068_v12 = vld [vmem:[#allocation13 + $0x58] sm:$0xff] }
 0x141   :  { %1252 = vmatpush.msra.mxu2 %v1086_v11  ;;  %1318 = vmatpush.msra.mxu3 %v1116_v19  ;;  %v1079_v11 = vld [vmem:[#allocation13 + $0xb0] sm:$0xff]  ;;  %v1078_v19 = vld [vmem:[#allocation13 + $0xa8] sm:$0xff] }
 0x143   :  { %1253 = vmatpush.msra.mxu2 %v1084_v17  ;;  %v1077_v17 = vld [vmem:[#allocation13 + $0xa0] sm:$0xff] }
 0x145   :  { %1254 = vmatpush.msra.mxu2 %v1082_v33  ;;  %v1107_v33 = vld [vmem:[#allocation13 + $0x190] sm:$0xff] }
 0x146   :  { %804 = vadd.xlane.f32.xlu2 %v803_v22  ;;  %724 = vadd.xlane.f32.xlu1 %v723_v21  ;;  %v4329_v21 = vld [vmem:[#allocation7 + $0xd0] sm:$0xff]  ;;  %v4331_v22 = vld [vmem:[#allocation7 + $0xd8] sm:$0xff] }
 0x147   :  { %v741_v43 = vadd.f32 %v4331_v22, %v4329_v21  ;;  %1255 = vmatpush.msra.mxu2 %v1080_v15  ;;  %v1100_v15 = vld [vmem:[#allocation13 + $0x158] sm:$0xff] }
 0x148   :  { %801 = vadd.xlane.f32.xlu0 %v800_v25  ;;  %v1081_v25 = vld [vmem:[#allocation13 + $0xc0] sm:$0xff] }
 0x149   :  { %1124 = vmatpush.msra.mxu0 %v1081_v25  ;;  %v1075_v25 = vld [vmem:[#allocation13 + $0x90] sm:$0xff]  ;;  %1256 = vmatpush.msra.mxu2 %v1078_v19  ;;  %v1098_v19 = vld [vmem:[#allocation13 + $0x148] sm:$0xff] }
 0x14b   :  { %1125 = vmatpush.msra.mxu0 %v1079_v11  ;;  %v1099_v11 = vld [vmem:[#allocation13 + $0x150] sm:$0xff] }
 0x14d   :  { %1126 = vmatpush.msra.mxu0 %v1077_v17  ;;  %v1097_v17 = vld [vmem:[#allocation13 + $0x140] sm:$0xff] }
 0x14e   :  { %730 = vadd.xlane.f32.xlu2 %v729_v34  ;;  %807 = vadd.xlane.f32.xlu1 %v806_v38  ;;  %v1114_v34 = vld [vmem:[#allocation13 + $0x1c8] sm:$0xff]  ;;  %v777_v38 = vmul.f32 %v4331_v22, %v4281_v24 }
 0x14f   :  { %1319 = vmatpush.msra.mxu3 %v1114_v34  ;;  %v1076_v34 = vld [vmem:[#allocation13 + $0x98] sm:$0xff]  ;;  %1127 = vmatpush.msra.mxu0 %v1075_v25  ;;  %v1095_v25 = vld [vmem:[#allocation13 + $0x130] sm:$0xff] }
 0x150   :  { %727 = vadd.xlane.f32.xlu0 %v726_v37  ;;  %v776_v37 = vmul.f32 %v4329_v21, %v4279_v23  ;;  %1257 = vmatpush.msra.mxu2 %v1076_v34  ;;  %v1061_v34 = vld [vmem:[#allocation13 + $0x20] sm:$0xff] }
 0x151   :  { %1320 = vmatpush.msra.mxu3 %v1112_v16  ;;  %v1065_v16 = vld [vmem:[#allocation13 + $0x40] sm:$0xff] }
 0x152   :  { %v821_v44 = vadd.f32 %v777_v38, %v776_v37  ;;  %v1108_v37 = vld [vmem:[#allocation13 + $0x198] sm:$0xff]  ;;  %v1073_v38 = vld [vmem:[#allocation13 + $0x80] sm:$0xff] }
 0x153   :  { %1128 = vmatpush.msra.mxu0 %v1073_v38  ;;  %v1062_v38 = vld [vmem:[#allocation13 + $0x28] sm:$0xff] }
 0x156   :  { %813 = vadd.xlane.f32.xlu2 %v812_v50  ;;  %733 = vadd.xlane.f32.xlu1 %v732_v45  ;;  %v818_v45 = vadd.f32 %v775_v42, %v774_v41  ;;  %v4343_v50 = vld [vmem:[#allocation7 + $0xe0] sm:$0xff]  ;;  %v1074_v42 = vld [vmem:[#allocation13 + $0x88] sm:$0xff] }
 0x157   :  { %v778_v60 = vmul.f32 %v4343_v50, %v4279_v23  ;;  %v1105_v41 = vld [vmem:[#allocation13 + $0x180] sm:$0xff]  ;;  %1258 = vmatpush.msra.mxu2 %v1074_v42  ;;  %v1059_v42 = vld [vmem:[#allocation13 + $0x10] sm:$0xff] }
 0x158   :  { %810 = vadd.xlane.f32.xlu0 %v809_v51  ;;  %v4345_v51 = vld [vmem:[#allocation7 + $0xe8] sm:$0xff] }
 0x159   :  { %v779_v61 = vmul.f32 %v4345_v51, %v4281_v24  ;;  %v744_v63 = vadd.f32 %v4345_v51, %v4343_v50 }
 0x15b   :  { %v824_v4 = vadd.f32 %v779_v61, %v778_v60  ;;  %v1072_v60 = vld [vmem:[#allocation13 + $0x78] sm:$0xff] }
 0x15c   :  { %v1104_v61 = vld [vmem:[#allocation13 + $0x178] sm:$0xff]  ;;  %1259 = vmatpush.msra.mxu2 %v1072_v60  ;;  %v1057_v60 = vld [vmem:[#allocation13] sm:$0xff] }
 0x15e   :  { %739 = vadd.xlane.f32.xlu2 %v738_v10  ;;  %816 = vadd.xlane.f32.xlu1 %v815_v20  ;;  %v781_v10 = vmul.f32 %v4349_v59, %v4281_v24  ;;  %v1110_v20 = vld [vmem:[#allocation13 + $0x1a8] sm:$0xff] }
 0x15f   :  { %1321 = vmatpush.msra.mxu3 %v1110_v20  ;;  %v1063_v20 = vld [vmem:[#allocation13 + $0x30] sm:$0xff] }
 0x160   :  { %736 = vadd.xlane.f32.xlu0 %v735_v18  ;;  %v1109_v18 = vld [vmem:[#allocation13 + $0x1a0] sm:$0xff]  ;;  %v827_v32 = vadd.f32 %v781_v10, %v780_v8  ;;  %v1102_v8 = vld [vmem:[#allocation13 + $0x168] sm:$0xff]  ;;  %v1067_v10 = vld [vmem:[#allocation13 + $0x50] sm:$0xff] }
 0x161   :  { %1191 = vmatpush.msra.mxu1 %v1109_v18  ;;  %1322 = vmatpush.msra.mxu3 %v1108_v37  ;;  %v1066_v18 = vld [vmem:[#allocation13 + $0x48] sm:$0xff]  ;;  %v1093_v37 = vld [vmem:[#allocation13 + $0x120] sm:$0xff] }
 0x163   :  { %1192 = vmatpush.msra.mxu1 %v1107_v33  ;;  %v1096_v33 = vld [vmem:[#allocation13 + $0x138] sm:$0xff] }
 0x165   :  { %1193 = vmatpush.msra.mxu1 %v1105_v41  ;;  %v1094_v41 = vld [vmem:[#allocation13 + $0x128] sm:$0xff] }
 0x166   :  { %822 = vadd.xlane.f32.xlu2 %v821_v44  ;;  %742 = vadd.xlane.f32.xlu1 %v741_v43  ;;  %v1106_v43 = vld [vmem:[#allocation13 + $0x188] sm:$0xff]  ;;  %v1071_v44 = vld [vmem:[#allocation13 + $0x70] sm:$0xff] }
 0x167   :  { %1323 = vmatpush.msra.mxu3 %v1106_v43  ;;  %1129 = vmatpush.msra.mxu0 %v1071_v44  ;;  %v1091_v43 = vld [vmem:[#allocation13 + $0x110] sm:$0xff]  ;;  %v1060_v44 = vld [vmem:[#allocation13 + $0x18] sm:$0xff] }
 0x168   :  { %819 = vadd.xlane.f32.xlu0 %v818_v45  ;;  %v1103_v45 = vld [vmem:[#allocation13 + $0x170] sm:$0xff] }
 0x169   :  { %1194 = vmatpush.msra.mxu1 %v1103_v45  ;;  %1324 = vmatpush.msra.mxu3 %v1104_v61  ;;  %v1092_v45 = vld [vmem:[#allocation13 + $0x118] sm:$0xff]  ;;  %v1089_v61 = vld [vmem:[#allocation13 + $0x100] sm:$0xff] }
 0x16b   :  { %1325 = vmatpush.msra.mxu3 %v1102_v8  ;;  %v704_v8 = vpop.xlane.xlu1 %703 }
 0x16d   :  { %1326 = vmatpush.msra.mxu3 %v1100_v15 }
 0x16e   :  { %748 = vadd.xlane.f32.xlu2 %v747_v62  ;;  %825 = vadd.xlane.f32.xlu1 %v824_v4  ;;  %v1069_v62 = vld [vmem:[#allocation13 + $0x60] sm:$0xff]  ;;  %v1070_v4 = vld [vmem:[#allocation13 + $0x68] sm:$0xff] }
 0x16f   :  { %1130 = vmatpush.msra.mxu0 %v1069_v62  ;;  %1260 = vmatpush.msra.mxu2 %v1070_v4  ;;  %v1058_v62 = vld [vmem:[#allocation13 + $0x8] sm:$0xff] }
 0x170   :  { %745 = vadd.xlane.f32.xlu0 %v744_v63  ;;  %v1101_v63 = vld [vmem:[#allocation13 + $0x160] sm:$0xff]  ;;  %1327 = vmatpush.msra.mxu3 %v1098_v19 }
 0x171   :  { %1195 = vmatpush.msra.mxu1 %v1101_v63  ;;  %1131 = vmatpush.msra.mxu0 %v1067_v10  ;;  %v1090_v63 = vld [vmem:[#allocation13 + $0x108] sm:$0xff] }
 0x172   :  { %1261 = vmatpush.msra.mxu2 %v1068_v12  ;;  %1328 = vmatpush.msra.mxu3 %v1096_v33 }
 0x173   :  { %1196 = vmatpush.msra.mxu1 %v1099_v11  ;;  %1132 = vmatpush.msra.mxu0 %v1065_v16  ;;  %v707_v11 = vpop.xlane.xlu2 %706 }
 0x174   :  { %1262 = vmatpush.msra.mxu2 %v1066_v18  ;;  %1329 = vmatpush.msra.mxu3 %v1094_v41  ;;  %v4380_v41 = vstv %s831_s2 }
 0x175   :  { %1197 = vmatpush.msra.mxu1 %v1097_v17  ;;  %1133 = vmatpush.msra.mxu0 %v1063_v20 }
 0x176   :  { %1330 = vmatpush.msra.mxu3 %v1092_v45 }
 0x177   :  { %1198 = vmatpush.msra.mxu1 %v1095_v25  ;;  %1134 = vmatpush.msra.mxu0 %v1061_v34 }
 0x178   :  { %828 = vadd.xlane.f32.xlu0 %v827_v32  ;;  %v1064_v32 = vld [vmem:[#allocation13 + $0x38] sm:$0xff]  ;;  %1331 = vmatpush.msra.mxu3 %v1090_v63 }
 0x179   :  { %1263 = vmatpush.msra.mxu2 %v1064_v32  ;;  %1199 = vmatpush.msra.mxu1 %v1093_v37 }
 0x17a   :  { %1135 = vmatpush.msra.mxu0 %v1059_v42 }
 0x17b   :  { %1264 = vmatpush.msra.mxu2 %v1062_v38  ;;  %1200 = vmatpush.msra.mxu1 %v1091_v43 }
 0x17c   :  { %1136 = vmatpush.msra.mxu0 %v1057_v60 }
 0x17d   :  { %1265 = vmatpush.msra.mxu2 %v1060_v44  ;;  %1201 = vmatpush.msra.mxu1 %v1089_v61 }
 0x17f   :  { %1266 = vmatpush.msra.mxu2 %v1058_v62 }
 0x193   :  { %v630_v4 = vpop.xlane.xlu0 %629 }
 0x199   :  { %v784_v29 = vpop.xlane.xlu1 %783  ;;  %v787_v38 = vpop.xlane.xlu2 %786 }
 0x19b   :  { %v635_v10 = vpop.xlane.xlu0 %634 }
 0x19c   :  { %v639_v12 = vsel %vm637_vm3, %v630_v4, %v635_v10  ;;  %v638_v16 = vsel %vm636_vm4, %v630_v4, %v635_v10 }
 0x19d   :  { %v658_v15 = vrot.slane %v639_v12, 7 }
 0x19f   :  { %v659_v17 = vsel %vm643_vm1, %v638_v16, %v658_v15  ;;  %v4367_v18 = vsel %vm645_vm2, %v638_v16, %v658_v15 }
 0x1a0   :  { %v4369_v19 = vperm.slane %v659_v17, 0  ;;  %v4371_v20 = vperm.slane %v659_v17, 1 }
 0x1a1   :  { %v790_v15 = vpop.xlane.xlu1 %789 }
 0x1a2   :  { %v832_v25 = vmul.f32 %v704_v8, %v4369_v19  ;;  %v833_v26 = vmul.f32 %v704_v8, %v4371_v20  ;;  %v834_v32 = vmul.f32 %v707_v11, %v4369_v19  ;;  %v835_v33 = vmul.f32 %v707_v11, %v4371_v20 }
 0x1a3   :  { %v710_v42 = vpop.xlane.xlu0 %709 }
 0x1a4   :  { %v864_v34 = vsub.f32 %v832_v25, %v784_v29  ;;  %v865_v37 = vsub.f32 %v833_v26, %v784_v29  ;;  %v866_v45 = vsub.f32 %v834_v32, %v787_v38  ;;  %v867_v60 = vsub.f32 %v835_v33, %v787_v38  ;;  %v713_v26 = vpop.xlane.xlu2 %712 }
 0x1a5   :  { %v836_v63 = vmul.f32 %v710_v42, %v4369_v19  ;;  %v837_v4 = vmul.f32 %v710_v42, %v4371_v20  ;;  %v839_v38 = vmul.f32 %v713_v26, %v4371_v20 }
 0x1a6   :  { %v896_v43 = vmul.f32 %v864_v34, %v4201_v35  ;;  %v897_v44 = vmul.f32 %v865_v37, %v4203_v36  ;;  %v898_v11 = vmul.f32 %v866_v45, %v4201_v35  ;;  %v899_v12 = vmul.f32 %v867_v60, %v4203_v36 }
 0x1a7   :  { %v868_v16 = vsub.f32 %v836_v63, %v790_v15  ;;  %v869_v17 = vsub.f32 %v837_v4, %v790_v15  ;;  %v838_v37 = vmul.f32 %v713_v26, %v4369_v19 }
 0x1a8   :  { %v929_v61 = vmul.f32 %v4380_v41, %v896_v43  ;;  %v930_v62 = vmul.f32 %v4380_v41, %v897_v44  ;;  %v931_v29 = vmul.f32 %v4380_v41, %v898_v11  ;;  %v932_v25 = vmul.f32 %v4380_v41, %v899_v12 }
 0x1a9   :  { %v900_v32 = vmul.f32 %v868_v16, %v4201_v35  ;;  %v901_v33 = vmul.f32 %v869_v17, %v4203_v36  ;;  %v716_v42 = vpop.xlane.xlu1 %715 }
 0x1aa   :  { %v961_v8 = vadd.f32 %v929_v61, %v4182_v7  ;;  %v962_v10 = vadd.f32 %v930_v62, %v4186_v9  ;;  %v963_v7 = vadd.f32 %v931_v29, %v4178_v5  ;;  %v964_v9 = vadd.f32 %v932_v25, %v4180_v6 }
 0x1ab   :  { %v793_v34 = vpop.xlane.xlu0 %792  ;;  %v933_v5 = vmul.f32 %v4380_v41, %v900_v32  ;;  %v934_v6 = vmul.f32 %v4380_v41, %v901_v33  ;;  %v840_v45 = vmul.f32 %v716_v42, %v4369_v19  ;;  %v841_v60 = vmul.f32 %v716_v42, %v4371_v20 }
 0x1ac   :  { %1137 = vmatmul.f32.vlgmr.msra.gmra.mxu0 %v961_v8  ;;  %1202 = vmatmul.f32.vlgmr.msra.gmra.mxu1 %v962_v10  ;;  %v870_v43 = vsub.f32 %v838_v37, %v793_v34  ;;  %v871_v44 = vsub.f32 %v839_v38, %v793_v34 }
 0x1ad   :  { %1267 = vmatmul.f32.vlgmr.msra.gmra.mxu2 %v961_v8  ;;  %1332 = vmatmul.f32.vlgmr.msra.gmra.mxu3 %v962_v10  ;;  %v965_v63 = vadd.f32 %v933_v5, %v4217_v46  ;;  %v966_v4 = vadd.f32 %v934_v6, %v4219_v47  ;;  %v796_v8 = vpop.xlane.xlu2 %795 }
 0x1ae   :  { %v902_v61 = vmul.f32 %v870_v43, %v4201_v35  ;;  %v903_v62 = vmul.f32 %v871_v44, %v4203_v36  ;;  %v872_v10 = vsub.f32 %v840_v45, %v796_v8  ;;  %v873_v11 = vsub.f32 %v841_v60, %v796_v8 }
 0x1b0   :  { %v935_v12 = vmul.f32 %v4380_v41, %v902_v61  ;;  %v936_v15 = vmul.f32 %v4380_v41, %v903_v62  ;;  %v904_v17 = vmul.f32 %v872_v10, %v4201_v35  ;;  %v905_v29 = vmul.f32 %v873_v11, %v4203_v36 }
 0x1b1   :  { %v661_v11 = vrot.slane %v4367_v18, 1 }
 0x1b2   :  { %v967_v25 = vadd.f32 %v935_v12, %v4221_v48  ;;  %v968_v26 = vadd.f32 %v936_v15, %v4223_v49  ;;  %v937_v33 = vmul.f32 %v4380_v41, %v904_v17  ;;  %v938_v34 = vmul.f32 %v4380_v41, %v905_v29 }
 0x1b3   :  { %v719_v16 = vpop.xlane.xlu0 %718  ;;  %v4435_v29 = vperm.slane %v661_v11, 0 }
 0x1b4   :  { %1140 = vmatmul.f32.gmra.mxu0 %v963_v7  ;;  %1205 = vmatmul.f32.gmra.mxu1 %v964_v9  ;;  %v842_v46 = vmul.f32 %v719_v16, %v4369_v19  ;;  %v843_v47 = vmul.f32 %v719_v16, %v4371_v20  ;;  %v969_v38 = vadd.f32 %v937_v33, %v4233_v55 }
 0x1b5   :  { %1270 = vmatmul.f32.gmra.mxu2 %v963_v7  ;;  %1335 = vmatmul.f32.gmra.mxu3 %v964_v9  ;;  %v799_v7 = vpop.xlane.xlu1 %798  ;;  %v722_v37 = vpop.xlane.xlu2 %721  ;;  %v970_v42 = vadd.f32 %v938_v34, %v4235_v56 }
 0x1b6   :  { %v874_v9 = vsub.f32 %v842_v46, %v799_v7  ;;  %v875_v32 = vsub.f32 %v843_v47, %v799_v7  ;;  %v844_v44 = vmul.f32 %v722_v37, %v4369_v19  ;;  %v845_v5 = vmul.f32 %v722_v37, %v4371_v20 }
 0x1b7   :  { %v4437_v46 = vperm.slane %v661_v11, 1 }
 0x1b8   :  { %v906_v48 = vmul.f32 %v874_v9, %v4201_v35  ;;  %v907_v49 = vmul.f32 %v875_v32, %v4203_v36 }
 0x1ba   :  { %v939_v55 = vmul.f32 %v4380_v41, %v906_v48  ;;  %v940_v56 = vmul.f32 %v4380_v41, %v907_v49 }
 0x1bb   :  { %v802_v43 = vpop.xlane.xlu0 %801 }
 0x1bc   :  { %1143 = vmatmul.f32.gmra.mxu0 %v965_v63  ;;  %1208 = vmatmul.f32.gmra.mxu1 %v966_v4  ;;  %v876_v45 = vsub.f32 %v844_v44, %v802_v43  ;;  %v877_v60 = vsub.f32 %v845_v5, %v802_v43  ;;  %v971_v8 = vadd.f32 %v939_v55, %v4247_v0 }
 0x1bd   :  { %1273 = vmatmul.f32.gmra.mxu2 %v965_v63  ;;  %1338 = vmatmul.f32.gmra.mxu3 %v966_v4  ;;  %v725_v6 = vpop.xlane.xlu1 %724  ;;  %v972_v10 = vadd.f32 %v940_v56, %v4249_v1  ;;  %v805_v12 = vpop.xlane.xlu2 %804 }
 0x1be   :  { %v846_v61 = vmul.f32 %v725_v6, %v4369_v19  ;;  %v847_v62 = vmul.f32 %v725_v6, %v4371_v20  ;;  %v908_v63 = vmul.f32 %v876_v45, %v4201_v35  ;;  %v909_v4 = vmul.f32 %v877_v60, %v4203_v36 }
 0x1c0   :  { %v878_v15 = vsub.f32 %v846_v61, %v805_v12  ;;  %v879_v16 = vsub.f32 %v847_v62, %v805_v12  ;;  %v941_v19 = vmul.f32 %v4380_v41, %v908_v63  ;;  %v942_v20 = vmul.f32 %v4380_v41, %v909_v4  ;;  %v1023_v4 = vld [vmem:[#allocation12 + $0xf0] sm:$0xff] }
 0x1c1   :  { %1381 = vmatpush.msrb.mxu0 %v1023_v4 }
 0x1c2   :  { %v910_v0 = vmul.f32 %v878_v15, %v4201_v35  ;;  %v911_v1 = vmul.f32 %v879_v16, %v4203_v36  ;;  %v1022_v16 = vld [vmem:[#allocation12 + $0xe8] sm:$0xff] }
 0x1c3   :  { %v728_v17 = vpop.xlane.xlu0 %727 }
 0x1c4   :  { %1146 = vmatmul.f32.gmra.mxu0 %v967_v25  ;;  %1211 = vmatmul.f32.gmra.mxu1 %v968_v26  ;;  %v848_v18 = vmul.f32 %v728_v17, %v4435_v29  ;;  %v849_v47 = vmul.f32 %v728_v17, %v4437_v46  ;;  %v943_v33 = vmul.f32 %v4380_v41, %v910_v0  ;;  %v1020_v17 = vld [vmem:[#allocation12 + $0xd8] sm:$0xff]  ;;  %v1054_v0 = vld [vmem:[#allocation12 + $0x1e8] sm:$0xff] }
 0x1c5   :  { %1276 = vmatmul.f32.gmra.mxu2 %v967_v25  ;;  %1341 = vmatmul.f32.gmra.mxu3 %v968_v26  ;;  %v973_v25 = vadd.f32 %v941_v19, %v4251_v2  ;;  %v974_v26 = vadd.f32 %v942_v20, %v4253_v3  ;;  %v808_v7 = vpop.xlane.xlu1 %807  ;;  %v944_v35 = vmul.f32 %v4380_v41, %v911_v1  ;;  %v731_v36 = vpop.xlane.xlu2 %730  ;;  %v1019_v19 = vld [vmem:[#allocation12 + $0xd0] sm:$0xff]  ;;  %v1053_v20 = vld [vmem:[#allocation12 + $0x1e0] sm:$0xff] }
 0x1c6   :  { %v880_v9 = vsub.f32 %v848_v18, %v808_v7  ;;  %v881_v32 = vsub.f32 %v849_v47, %v808_v7  ;;  %v975_v34 = vadd.f32 %v943_v33, %v4263_v13  ;;  %v851_v48 = vmul.f32 %v731_v36, %v4437_v46  ;;  %v1051_v1 = vld [vmem:[#allocation12 + $0x1d0] sm:$0xff]  ;;  %v1017_v33 = vld [vmem:[#allocation12 + $0xc0] sm:$0xff] }
 0x1c7   :  { %v976_v37 = vadd.f32 %v944_v35, %v4265_v14  ;;  %v1018_v35 = vld [vmem:[#allocation12 + $0xc8] sm:$0xff] }
 0x1c8   :  { %v912_v2 = vmul.f32 %v880_v9, %v4279_v23  ;;  %v913_v3 = vmul.f32 %v881_v32, %v4281_v24 }
 0x1ca   :  { %v945_v13 = vmul.f32 %v4380_v41, %v912_v2  ;;  %v946_v14 = vmul.f32 %v4380_v41, %v913_v3  ;;  %v1049_v2 = vld [vmem:[#allocation12 + $0x1c0] sm:$0xff]  ;;  %v1016_v3 = vld [vmem:[#allocation12 + $0xb8] sm:$0xff] }
 0x1cc   :  { %1149 = vmatmul.f32.gmra.mxu0 %v969_v38  ;;  %1214 = vmatmul.f32.gmra.mxu1 %v970_v42  ;;  %v977_v55 = vadd.f32 %v945_v13, %v4283_v27  ;;  %v978_v56 = vadd.f32 %v946_v14, %v4285_v28  ;;  %v1055_v27 = vld [vmem:[#allocation12 + $0x1f0] sm:$0xff]  ;;  %v1056_v28 = vld [vmem:[#allocation12 + $0x1f8] sm:$0xff]  ;;  %v1045_v13 = vld [vmem:[#allocation12 + $0x1a0] sm:$0xff] }
 0x1cd   :  { %1279 = vmatmul.f32.gmra.mxu2 %v969_v38  ;;  %1344 = vmatmul.f32.gmra.mxu3 %v970_v42  ;;  %v811_v38 = vpop.xlane.xlu0 %810  ;;  %v850_v42 = vmul.f32 %v731_v36, %v4435_v29  ;;  %v734_v49 = vpop.xlane.xlu1 %733  ;;  %v1046_v14 = vld [vmem:[#allocation12 + $0x1a8] sm:$0xff] }
 0x1ce   :  { %v883_v44 = vsub.f32 %v851_v48, %v811_v38  ;;  %v852_v5 = vmul.f32 %v734_v49, %v4435_v29  ;;  %v853_v6 = vmul.f32 %v734_v49, %v4437_v46  ;;  %v814_v61 = vpop.xlane.xlu2 %813  ;;  %1446 = vmatpush.msrb.mxu1 %v1055_v27  ;;  %1576 = vmatpush.msrb.mxu3 %v1056_v28  ;;  %v1047_v48 = vld [vmem:[#allocation12 + $0x1b0] sm:$0xff]  ;;  %v1013_v49 = vld [vmem:[#allocation12 + $0xa0] sm:$0xff] }
 0x1cf   :  { %v882_v43 = vsub.f32 %v850_v42, %v811_v38  ;;  %v1050_v42 = vld [vmem:[#allocation12 + $0x1c8] sm:$0xff]  ;;  %v1041_v28 = vld [vmem:[#allocation12 + $0x180] sm:$0xff] }
 0x1d0   :  { %v915_v60 = vmul.f32 %v883_v44, %v4281_v24  ;;  %v884_v62 = vsub.f32 %v852_v5, %v814_v61  ;;  %v885_v63 = vsub.f32 %v853_v6, %v814_v61  ;;  %1447 = vmatpush.msrb.mxu1 %v1053_v20  ;;  %1577 = vmatpush.msrb.mxu3 %v1054_v0  ;;  %v1048_v44 = vld [vmem:[#allocation12 + $0x1b8] sm:$0xff]  ;;  %v1011_v61 = vld [vmem:[#allocation12 + $0x90] sm:$0xff] }
 0x1d1   :  { %v914_v45 = vmul.f32 %v882_v43, %v4279_v23  ;;  %v1014_v43 = vld [vmem:[#allocation12 + $0xa8] sm:$0xff]  ;;  %v1007_v20 = vld [vmem:[#allocation12 + $0x70] sm:$0xff] }
 0x1d2   :  { %v948_v15 = vmul.f32 %v4380_v41, %v915_v60  ;;  %v916_v47 = vmul.f32 %v884_v62, %v4279_v23  ;;  %1448 = vmatpush.msrb.mxu1 %v1051_v1  ;;  %v1012_v62 = vld [vmem:[#allocation12 + $0x98] sm:$0xff]  ;;  %v1039_v0 = vld [vmem:[#allocation12 + $0x170] sm:$0xff] }
 0x1d3   :  { %v947_v12 = vmul.f32 %v4380_v41, %v914_v45  ;;  %v1040_v1 = vld [vmem:[#allocation12 + $0x178] sm:$0xff] }
 0x1d4   :  { %1152 = vmatmul.f32.gmra.mxu0 %v971_v8  ;;  %1217 = vmatmul.f32.gmra.mxu1 %v972_v10  ;;  %v980_v32 = vadd.f32 %v948_v15, %v4289_v31 }
 0x1d5   :  { %1282 = vmatmul.f32.gmra.mxu2 %v971_v8  ;;  %1347 = vmatmul.f32.gmra.mxu3 %v972_v10  ;;  %v1024_v8 = vld [vmem:[#allocation12 + $0xf8] sm:$0xff]  ;;  %v1021_v10 = vld [vmem:[#allocation12 + $0xe0] sm:$0xff]  ;;  %v737_v11 = vpop.xlane.xlu0 %736  ;;  %v979_v9 = vadd.f32 %v947_v12, %v4287_v30  ;;  %v817_v36 = vpop.xlane.xlu1 %816  ;;  %v949_v30 = vmul.f32 %v4380_v41, %v916_v47 }
 0x1d6   :  { %1511 = vmatpush.msrb.mxu2 %v1024_v8  ;;  %1382 = vmatpush.msrb.mxu0 %v1021_v10  ;;  %v854_v18 = vmul.f32 %v737_v11, %v4435_v29  ;;  %v855_v7 = vmul.f32 %v737_v11, %v4437_v46  ;;  %v740_v5 = vpop.xlane.xlu2 %739  ;;  %v1043_v8 = vld [vmem:[#allocation12 + $0x190] sm:$0xff]  ;;  %v1044_v10 = vld [vmem:[#allocation12 + $0x198] sm:$0xff]  ;;  %v1010_v11 = vld [vmem:[#allocation12 + $0x88] sm:$0xff] }
 0x1d7   :  { %1449 = vmatpush.msrb.mxu1 %v1049_v2  ;;  %v981_v45 = vadd.f32 %v949_v30, %v4299_v39  ;;  %v857_v4 = vmul.f32 %v740_v5, %v4437_v46  ;;  %v1003_v2 = vld [vmem:[#allocation12 + $0x50] sm:$0xff] }
 0x1d8   :  { %1512 = vmatpush.msrb.mxu2 %v1022_v16  ;;  %1383 = vmatpush.msrb.mxu0 %v1019_v19  ;;  %v887_v38 = vsub.f32 %v855_v7, %v817_v36  ;;  %v1042_v19 = vld [vmem:[#allocation12 + $0x188] sm:$0xff] }
 0x1d9   :  { %1450 = vmatpush.msrb.mxu1 %v1047_v48  ;;  %v1001_v48 = vld [vmem:[#allocation12 + $0x40] sm:$0xff] }
 0x1da   :  { %1513 = vmatpush.msrb.mxu2 %v1020_v17  ;;  %1384 = vmatpush.msrb.mxu0 %v1017_v33  ;;  %v1008_v17 = vld [vmem:[#allocation12 + $0x78] sm:$0xff]  ;;  %v1006_v33 = vld [vmem:[#allocation12 + $0x68] sm:$0xff] }
 0x1db   :  { %1451 = vmatpush.msrb.mxu1 %v1045_v13 }
 0x1dc   :  { %1155 = vmatmul.f32.gmra.mxu0 %v973_v25  ;;  %1220 = vmatmul.f32.gmra.mxu1 %v974_v26 }
 0x1dd   :  { %1285 = vmatmul.f32.gmra.mxu2 %v973_v25  ;;  %1350 = vmatmul.f32.gmra.mxu3 %v974_v26  ;;  %v917_v25 = vmul.f32 %v885_v63, %v4281_v24  ;;  %v1052_v26 = vld [vmem:[#allocation12 + $0x1d8] sm:$0xff]  ;;  %v856_v63 = vmul.f32 %v740_v5, %v4435_v29  ;;  %v743_v12 = vpop.xlane.xlu1 %742 }
 0x1de   :  { %1578 = vmatpush.msrb.mxu3 %v1052_v26  ;;  %1514 = vmatpush.msrb.mxu2 %v1018_v35  ;;  %v859_v47 = vmul.f32 %v743_v12, %v4437_v46  ;;  %v823_v35 = vpop.xlane.xlu2 %822 }
 0x1df   :  { %v950_v31 = vmul.f32 %v4380_v41, %v917_v25  ;;  %1452 = vmatpush.msrb.mxu1 %v1043_v8  ;;  %v997_v8 = vld [vmem:[#allocation12 + $0x20] sm:$0xff] }
 0x1e0   :  { %1579 = vmatpush.msrb.mxu3 %v1050_v42  ;;  %1515 = vmatpush.msrb.mxu2 %v1016_v3  ;;  %v1004_v3 = vld [vmem:[#allocation12 + $0x58] sm:$0xff] }
 0x1e1   :  { %v982_v60 = vadd.f32 %v950_v31, %v4301_v40  ;;  %v1009_v40 = vld [vmem:[#allocation12 + $0x80] sm:$0xff]  ;;  %1453 = vmatpush.msrb.mxu1 %v1041_v28  ;;  %v1035_v31 = vld [vmem:[#allocation12 + $0x150] sm:$0xff]  ;;  %v1036_v42 = vld [vmem:[#allocation12 + $0x158] sm:$0xff] }
 0x1e2   :  { %1580 = vmatpush.msrb.mxu3 %v1048_v44  ;;  %1516 = vmatpush.msrb.mxu2 %v1014_v43  ;;  %v1033_v43 = vld [vmem:[#allocation12 + $0x140] sm:$0xff]  ;;  %v1034_v44 = vld [vmem:[#allocation12 + $0x148] sm:$0xff] }
 0x1e3   :  { %1454 = vmatpush.msrb.mxu1 %v1039_v0 }
 0x1e4   :  { %1158 = vmatmul.f32.gmra.mxu0 %v975_v34  ;;  %1223 = vmatmul.f32.gmra.mxu1 %v976_v37 }
 0x1e5   :  { %1288 = vmatmul.f32.gmra.mxu2 %v975_v34  ;;  %1353 = vmatmul.f32.gmra.mxu3 %v976_v37  ;;  %v886_v34 = vsub.f32 %v854_v18, %v817_v36  ;;  %v1015_v37 = vld [vmem:[#allocation12 + $0xb0] sm:$0xff]  ;;  %v858_v18 = vmul.f32 %v743_v12, %v4435_v29  ;;  %v1037_v36 = vld [vmem:[#allocation12 + $0x160] sm:$0xff] }
 0x1e6   :  { %1385 = vmatpush.msrb.mxu0 %v1015_v37  ;;  %1581 = vmatpush.msrb.mxu3 %v1046_v14  ;;  %v891_v37 = vsub.f32 %v859_v47, %v823_v35  ;;  %v995_v12 = vld [vmem:[#allocation12 + $0x10] sm:$0xff]  ;;  %v749_v28 = vpop.xlane.xlu2 %748  ;;  %v994_v47 = vld [vmem:[#allocation12 + $0x8] sm:$0xff] }
 0x1e7   :  { %v918_v6 = vmul.f32 %v886_v34, %v4279_v23  ;;  %1517 = vmatpush.msrb.mxu2 %v1012_v62  ;;  %v1038_v34 = vld [vmem:[#allocation12 + $0x168] sm:$0xff]  ;;  %1455 = vmatpush.msrb.mxu1 %v1037_v36  ;;  %v1031_v62 = vld [vmem:[#allocation12 + $0x130] sm:$0xff] }
 0x1e8   :  { %1386 = vmatpush.msrb.mxu0 %v1013_v49  ;;  %1582 = vmatpush.msrb.mxu3 %v1044_v10  ;;  %v1002_v49 = vld [vmem:[#allocation12 + $0x48] sm:$0xff]  ;;  %v923_v5 = vmul.f32 %v891_v37, %v4281_v24 }
 0x1e9   :  { %v951_v39 = vmul.f32 %v4380_v41, %v918_v6  ;;  %1518 = vmatpush.msrb.mxu2 %v1010_v11  ;;  %1456 = vmatpush.msrb.mxu1 %v1035_v31  ;;  %v998_v10 = vld [vmem:[#allocation12 + $0x28] sm:$0xff] }
 0x1ea   :  { %1387 = vmatpush.msrb.mxu0 %v1011_v61  ;;  %1583 = vmatpush.msrb.mxu3 %v1042_v19  ;;  %v826_v61 = vpop.xlane.xlu1 %825  ;;  %v1030_v11 = vld [vmem:[#allocation12 + $0x128] sm:$0xff] }
 0x1eb   :  { %v983_v25 = vadd.f32 %v951_v39, %v4313_v52  ;;  %1519 = vmatpush.msrb.mxu2 %v1008_v17  ;;  %v890_v52 = vsub.f32 %v858_v18, %v823_v35  ;;  %1457 = vmatpush.msrb.mxu1 %v1033_v43  ;;  %v993_v18 = vld [vmem:[#allocation12] sm:$0xff] }
 0x1ec   :  { %1161 = vmatmul.f32.gmra.mxu0 %v977_v55  ;;  %1226 = vmatmul.f32.gmra.mxu1 %v978_v56 }
 0x1ed   :  { %1291 = vmatmul.f32.gmra.mxu2 %v977_v55  ;;  %1356 = vmatmul.f32.gmra.mxu3 %v978_v56  ;;  %v919_v55 = vmul.f32 %v887_v38, %v4281_v24  ;;  %v820_v56 = vpop.xlane.xlu0 %819  ;;  %v922_v14 = vmul.f32 %v890_v52, %v4279_v23 }
 0x1ee   :  { %v888_v15 = vsub.f32 %v856_v63, %v820_v56  ;;  %v889_v27 = vsub.f32 %v857_v4, %v820_v56  ;;  %1388 = vmatpush.msrb.mxu0 %v1009_v40  ;;  %1584 = vmatpush.msrb.mxu3 %v1040_v1  ;;  %v1000_v56 = vld [vmem:[#allocation12 + $0x38] sm:$0xff]  ;;  %v1029_v40 = vld [vmem:[#allocation12 + $0x120] sm:$0xff] }
 0x1ef   :  { %v952_v16 = vmul.f32 %v4380_v41, %v919_v55  ;;  %1520 = vmatpush.msrb.mxu2 %v1006_v33  ;;  %v999_v55 = vld [vmem:[#allocation12 + $0x30] sm:$0xff]  ;;  %v1032_v63 = vld [vmem:[#allocation12 + $0x138] sm:$0xff]  ;;  %1458 = vmatpush.msrb.mxu1 %v1031_v62 }
 0x1f0   :  { %v920_v26 = vmul.f32 %v888_v15, %v4279_v23  ;;  %v921_v7 = vmul.f32 %v889_v27, %v4281_v24  ;;  %1389 = vmatpush.msrb.mxu0 %v1007_v20  ;;  %1585 = vmatpush.msrb.mxu3 %v1038_v34  ;;  %v996_v15 = vld [vmem:[#allocation12 + $0x18] sm:$0xff]  ;;  %v1027_v27 = vld [vmem:[#allocation12 + $0x110] sm:$0xff] }
 0x1f1   :  { %1521 = vmatpush.msrb.mxu2 %v1004_v3  ;;  %1459 = vmatpush.msrb.mxu1 %v1029_v40 }
 0x1f2   :  { %v954_v30 = vmul.f32 %v4380_v41, %v921_v7  ;;  %1586 = vmatpush.msrb.mxu3 %v1036_v42  ;;  %v1025_v7 = vld [vmem:[#allocation12 + $0x100] sm:$0xff] }
 0x1f3   :  { %1522 = vmatpush.msrb.mxu2 %v1002_v49  ;;  %1460 = vmatpush.msrb.mxu1 %v1027_v27  ;;  %v3506_v27 = vld [vmem:[#allocation7 + $0x58] sm:$0xff] }
 0x1f4   :  { %1164 = vmatmul.f32.gmra.mxu0 %v979_v9  ;;  %1229 = vmatmul.f32.gmra.mxu1 %v980_v32 }
 0x1f5   :  { %1294 = vmatmul.f32.gmra.mxu2 %v979_v9  ;;  %1359 = vmatmul.f32.gmra.mxu3 %v980_v32  ;;  %v984_v9 = vadd.f32 %v952_v16, %v4315_v53  ;;  %v1005_v32 = vld [vmem:[#allocation12 + $0x60] sm:$0xff]  ;;  %v746_v38 = vpop.xlane.xlu0 %745  ;;  %v953_v53 = vmul.f32 %v4380_v41, %v920_v26  ;;  %v1028_v16 = vld [vmem:[#allocation12 + $0x118] sm:$0xff]  ;;  %v863_v26 = vmul.f32 %v749_v28, %v4437_v46 }
 0x1f6   :  { %1390 = vmatpush.msrb.mxu0 %v1005_v32  ;;  %v860_v13 = vmul.f32 %v746_v38, %v4435_v29  ;;  %v861_v6 = vmul.f32 %v746_v38, %v4437_v46  ;;  %1587 = vmatpush.msrb.mxu3 %v1034_v44  ;;  %v3499_v44 = vld [vmem:[#allocation7 + $0x20] sm:$0xff] }
 0x1f7   :  { %1523 = vmatpush.msrb.mxu2 %v1000_v56  ;;  %1461 = vmatpush.msrb.mxu1 %v1025_v7  ;;  %v3502_v56 = vld [vmem:[#allocation7 + $0x38] sm:$0xff] }
 0x1f8   :  { %1391 = vmatpush.msrb.mxu0 %v1003_v2  ;;  %v892_v4 = vsub.f32 %v860_v13, %v826_v61  ;;  %v893_v39 = vsub.f32 %v861_v6, %v826_v61  ;;  %1588 = vmatpush.msrb.mxu3 %v1032_v63  ;;  %v3500_v13 = vld [vmem:[#allocation7 + $0x28] sm:$0xff] }
 0x1f9   :  { %1524 = vmatpush.msrb.mxu2 %v998_v10  ;;  %v3503_v10 = vld [vmem:[#allocation7 + $0x40] sm:$0xff] }
 0x1fa   :  { %1392 = vmatpush.msrb.mxu0 %v1001_v48  ;;  %v924_v19 = vmul.f32 %v892_v4, %v4279_v23  ;;  %1589 = vmatpush.msrb.mxu3 %v1030_v11  ;;  %v925_v0 = vmul.f32 %v893_v39, %v4281_v24  ;;  %v3504_v39 = vld [vmem:[#allocation7 + $0x48] sm:$0xff] }
 0x1fb   :  { %1525 = vmatpush.msrb.mxu2 %v996_v15  ;;  %v3505_v15 = vld [vmem:[#allocation7 + $0x50] sm:$0xff] }
 0x1fc   :  { %1167 = vmatmul.f32.gmra.mxu0 %v981_v45  ;;  %1232 = vmatmul.f32.gmra.mxu1 %v982_v60  ;;  %v958_v33 = vmul.f32 %v4380_v41, %v925_v0  ;;  %v3507_v0 = vld [vmem:[#allocation7 + $0x60] sm:$0xff] }
 0x1fd   :  { %1297 = vmatmul.f32.gmra.mxu2 %v981_v45  ;;  %1362 = vmatmul.f32.gmra.mxu3 %v982_v60  ;;  %v985_v45 = vadd.f32 %v953_v53, %v4317_v54  ;;  %v986_v60 = vadd.f32 %v954_v30, %v4319_v57  ;;  %v955_v54 = vmul.f32 %v4380_v41, %v922_v14  ;;  %v829_v1 = vpop.xlane.xlu0 %828  ;;  %v3497_v53 = vld [vmem:[#allocation7 + $0x10] sm:$0xff]  ;;  %v3498_v30 = vld [vmem:[#allocation7 + $0x18] sm:$0xff] }
 0x1fe   :  { %v956_v57 = vmul.f32 %v4380_v41, %v923_v5  ;;  %1393 = vmatpush.msrb.mxu0 %v999_v55  ;;  %1590 = vmatpush.msrb.mxu3 %v1028_v16  ;;  %v895_v32 = vsub.f32 %v863_v26, %v829_v1  ;;  %v990_v36 = vadd.f32 %v958_v33, %v4345_v51  ;;  %v3496_v51 = vld [vmem:[#allocation7 + $0x8] sm:$0xff]  ;;  %v3501_v55 = vld [vmem:[#allocation7 + $0x30] sm:$0xff] }
 0x1ff   :  { %v987_v20 = vadd.f32 %v955_v54, %v4329_v21  ;;  %v957_v21 = vmul.f32 %v4380_v41, %v924_v19  ;;  %1526 = vmatpush.msrb.mxu2 %v994_v47 }
 0x200   :  { %1394 = vmatpush.msrb.mxu0 %v997_v8  ;;  %v988_v17 = vadd.f32 %v956_v57, %v4331_v22  ;;  %v927_v46 = vmul.f32 %v895_v32, %v4281_v24 }
 0x201   :  { %v989_v35 = vadd.f32 %v957_v21, %v4343_v50  ;;  %v3495_v50 = vld [vmem:[#allocation7] sm:$0xff]  ;;  %v3510_v21 = vld [vmem:[#allocation7 + $0x78] sm:$0xff] }
 0x202   :  { %1395 = vmatpush.msrb.mxu0 %v995_v12  ;;  %v960_v52 = vmul.f32 %v4380_v41, %v927_v46 }
 0x204   :  { %1170 = vmatmul.f32.gmra.mxu0 %v983_v25  ;;  %1235 = vmatmul.f32.gmra.mxu1 %v984_v9  ;;  %v992_v2 = vadd.f32 %v960_v52, %v4349_v59 }
 0x205   :  { %1300 = vmatmul.f32.gmra.mxu2 %v983_v25  ;;  %1365 = vmatmul.f32.gmra.mxu3 %v984_v9  ;;  %v862_v25 = vmul.f32 %v749_v28, %v4435_v29  ;;  %v1026_v9 = vld [vmem:[#allocation12 + $0x108] sm:$0xff] }
 0x206   :  { %1396 = vmatpush.msrb.mxu0 %v993_v18  ;;  %1591 = vmatpush.msrb.mxu3 %v1026_v9  ;;  %v3509_v9 = vld [vmem:[#allocation7 + $0x70] sm:$0xff] }
 0x207   :  { %v894_v22 = vsub.f32 %v862_v25, %v829_v1  ;;  %v3508_v1 = vld [vmem:[#allocation7 + $0x68] sm:$0xff] }
 0x209   :  { %v926_v29 = vmul.f32 %v894_v22, %v4279_v23 }
 0x20b   :  { %v959_v34 = vmul.f32 %v4380_v41, %v926_v29 }
 0x20c   :  { %1173 = vmatmul.f32.gmra.mxu0 %v985_v45  ;;  %1238 = vmatmul.f32.gmra.mxu1 %v986_v60 }
 0x20d   :  { %1303 = vmatmul.f32.gmra.mxu2 %v985_v45  ;;  %1368 = vmatmul.f32.gmra.mxu3 %v986_v60  ;;  %v991_v37 = vadd.f32 %v959_v34, %v4347_v58 }
 0x214   :  { %1176 = vmatmul.f32.gmra.mxu0 %v987_v20  ;;  %1241 = vmatmul.f32.gmra.mxu1 %v988_v17 }
 0x215   :  { %1306 = vmatmul.f32.gmra.mxu2 %v987_v20  ;;  %1371 = vmatmul.f32.gmra.mxu3 %v988_v17 }
 0x21c   :  { %1179 = vmatmul.f32.gmra.mxu0 %v989_v35  ;;  %1244 = vmatmul.f32.gmra.mxu1 %v990_v36 }
 0x21d   :  { %1309 = vmatmul.f32.gmra.mxu2 %v989_v35  ;;  %1374 = vmatmul.f32.gmra.mxu3 %v990_v36  ;;  %v3511_v35 = vld [vmem:[#allocation7 + $0x80] sm:$0xff]  ;;  %v3512_v36 = vld [vmem:[#allocation7 + $0x88] sm:$0xff] }
 0x224   :  { %1182 = vmatmul.f32.gmra.mxu0 %v991_v37  ;;  %1247 = vmatmul.f32.gmra.mxu1 %v992_v2 }
 0x225   :  { %1312 = vmatmul.f32.gmra.mxu2 %v991_v37  ;;  %1377 = vmatmul.f32.gmra.mxu3 %v992_v2 }
 0x229   :  { %v4511_v23 = vpop.f32.mrf.mxu0  ;;  %v4513_v24 = vpop.f32.mrf.mxu1 }
 0x22c   :  { %1397 = vmatmul.f32.vlgmr.msrb.gmra.mxu0 %v3495_v50  ;;  %1462 = vmatmul.f32.vlgmr.msrb.gmra.mxu1 %v3496_v51 }
 0x22d   :  { %1527 = vmatmul.f32.vlgmr.msrb.gmra.mxu2 %v3495_v50  ;;  %1592 = vmatmul.f32.vlgmr.msrb.gmra.mxu3 %v3496_v51  ;;  %v3513_v50 = vld [vmem:[#allocation7 + $0x90] sm:$0xff]  ;;  %v3514_v51 = vld [vmem:[#allocation7 + $0x98] sm:$0xff] }
 0x230   :  { %v1268_v3 = vpop.f32.mrf.mxu2  ;;  %v1333_v41 = vpop.f32.mrf.mxu3 }
 0x231   :  { %v4515_v38 = vadd.f32 %v1333_v41, %v1268_v3  ;;  %v4517_v58 = vpop.f32.mrf.mxu0  ;;  %v4519_v59 = vpop.f32.mrf.mxu1 }
 0x234   :  { %1400 = vmatmul.f32.gmra.mxu0 %v3497_v53  ;;  %1465 = vmatmul.f32.gmra.mxu1 %v3498_v30 }
 0x235   :  { %1530 = vmatmul.f32.gmra.mxu2 %v3497_v53  ;;  %1595 = vmatmul.f32.gmra.mxu3 %v3498_v30 }
 0x238   :  { %v1271_v31 = vpop.f32.mrf.mxu2  ;;  %v1336_v42 = vpop.f32.mrf.mxu3 }
 0x239   :  { %v4521_v48 = vadd.f32 %v1336_v42, %v1271_v31  ;;  %v4523_v49 = vpop.f32.mrf.mxu0  ;;  %v4525_v43 = vpop.f32.mrf.mxu1  ;;  %v3515_v31 = vld [vmem:[#allocation7 + $0xa0] sm:$0xff]  ;;  %v3516_v42 = vld [vmem:[#allocation7 + $0xa8] sm:$0xff] }
 0x23c   :  { %1403 = vmatmul.f32.gmra.mxu0 %v3499_v44  ;;  %1468 = vmatmul.f32.gmra.mxu1 %v3500_v13 }
 0x23d   :  { %1533 = vmatmul.f32.gmra.mxu2 %v3499_v44  ;;  %1598 = vmatmul.f32.gmra.mxu3 %v3500_v13 }
 0x240   :  { %v1274_v14 = vpop.f32.mrf.mxu2  ;;  %v1339_v5 = vpop.f32.mrf.mxu3 }
 0x241   :  { %v4527_v6 = vadd.f32 %v1339_v5, %v1274_v14  ;;  %v4529_v45 = vpop.f32.mrf.mxu0  ;;  %v4531_v60 = vpop.f32.mrf.mxu1 }
 0x244   :  { %1406 = vmatmul.f32.gmra.mxu0 %v3501_v55  ;;  %1471 = vmatmul.f32.gmra.mxu1 %v3502_v56 }
 0x245   :  { %1536 = vmatmul.f32.gmra.mxu2 %v3501_v55  ;;  %1601 = vmatmul.f32.gmra.mxu3 %v3502_v56  ;;  %v3517_v55 = vld [vmem:[#allocation7 + $0xb0] sm:$0xff]  ;;  %v3518_v56 = vld [vmem:[#allocation7 + $0xb8] sm:$0xff] }
 0x248   :  { %v1277_v61 = vpop.f32.mrf.mxu2  ;;  %v1342_v62 = vpop.f32.mrf.mxu3 }
 0x249   :  { %v4533_v63 = vadd.f32 %v1342_v62, %v1277_v61  ;;  %v4535_v4 = vpop.f32.mrf.mxu0  ;;  %v4537_v8 = vpop.f32.mrf.mxu1 }
 0x24c   :  { %1409 = vmatmul.f32.gmra.mxu0 %v3503_v10  ;;  %1474 = vmatmul.f32.gmra.mxu1 %v3504_v39 }
 0x24d   :  { %1539 = vmatmul.f32.gmra.mxu2 %v3503_v10  ;;  %1604 = vmatmul.f32.gmra.mxu3 %v3504_v39 }
 0x250   :  { %v1280_v54 = vpop.f32.mrf.mxu2  ;;  %v1345_v57 = vpop.f32.mrf.mxu3 }
 0x251   :  { %v4539_v40 = vadd.f32 %v1345_v57, %v1280_v54  ;;  %v4541_v11 = vpop.f32.mrf.mxu0  ;;  %v4543_v12 = vpop.f32.mrf.mxu1  ;;  %v3519_v54 = vld [vmem:[#allocation7 + $0xc0] sm:$0xff]  ;;  %v3520_v57 = vld [vmem:[#allocation7 + $0xc8] sm:$0xff] }
 0x254   :  { %1412 = vmatmul.f32.gmra.mxu0 %v3505_v15  ;;  %1477 = vmatmul.f32.gmra.mxu1 %v3506_v27 }
 0x255   :  { %1542 = vmatmul.f32.gmra.mxu2 %v3505_v15  ;;  %1607 = vmatmul.f32.gmra.mxu3 %v3506_v27 }
 0x258   :  { %v1283_v16 = vpop.f32.mrf.mxu2  ;;  %v1348_v28 = vpop.f32.mrf.mxu3 }
 0x259   :  { %v4545_v19 = vadd.f32 %v1348_v28, %v1283_v16  ;;  %v4547_v20 = vpop.f32.mrf.mxu0  ;;  %v4549_v17 = vpop.f32.mrf.mxu1 }
 0x25c   :  { %1415 = vmatmul.f32.gmra.mxu0 %v3507_v0  ;;  %1480 = vmatmul.f32.gmra.mxu1 %v3508_v1 }
 0x25d   :  { %1545 = vmatmul.f32.gmra.mxu2 %v3507_v0  ;;  %1610 = vmatmul.f32.gmra.mxu3 %v3508_v1  ;;  %v3521_v0 = vld [vmem:[#allocation7 + $0xd0] sm:$0xff]  ;;  %v3522_v1 = vld [vmem:[#allocation7 + $0xd8] sm:$0xff] }
 0x260   :  { %v1286_v18 = vpop.f32.mrf.mxu2  ;;  %v1351_v47 = vpop.f32.mrf.mxu3 }
 0x261   :  { %v4551_v25 = vadd.f32 %v1351_v47, %v1286_v18  ;;  %v4553_v26 = vpop.f32.mrf.mxu0  ;;  %v4555_v7 = vpop.f32.mrf.mxu1 }
 0x264   :  { %1418 = vmatmul.f32.gmra.mxu0 %v3509_v9  ;;  %1483 = vmatmul.f32.gmra.mxu1 %v3510_v21 }
 0x265   :  { %1548 = vmatmul.f32.gmra.mxu2 %v3509_v9  ;;  %1613 = vmatmul.f32.gmra.mxu3 %v3510_v21 }
 0x268   :  { %v1289_v22 = vpop.f32.mrf.mxu2  ;;  %v1354_v32 = vpop.f32.mrf.mxu3 }
 0x269   :  { %v4557_v33 = vadd.f32 %v1354_v32, %v1289_v22  ;;  %v4559_v29 = vpop.f32.mrf.mxu0  ;;  %v4561_v46 = vpop.f32.mrf.mxu1  ;;  %v3523_v22 = vld [vmem:[#allocation7 + $0xe0] sm:$0xff]  ;;  %v3524_v32 = vld [vmem:[#allocation7 + $0xe8] sm:$0xff] }
 0x26c   :  { %1421 = vmatmul.f32.gmra.mxu0 %v3511_v35  ;;  %1486 = vmatmul.f32.gmra.mxu1 %v3512_v36 }
 0x26d   :  { %1551 = vmatmul.f32.gmra.mxu2 %v3511_v35  ;;  %1616 = vmatmul.f32.gmra.mxu3 %v3512_v36 }
 0x270   :  { %v4563_v34 = vpop.f32.mrf.mxu2  ;;  %v4565_v52 = vpop.f32.mrf.mxu3 }
 0x271   :  { %v4567_v37 = vpop.f32.mrf.mxu0  ;;  %v4569_v2 = vpop.f32.mrf.mxu1 }
 0x274   :  { %1424 = vmatmul.f32.gmra.mxu0 %v3513_v50  ;;  %1489 = vmatmul.f32.gmra.mxu1 %v3514_v51 }
 0x275   :  { %1554 = vmatmul.f32.gmra.mxu2 %v3513_v50  ;;  %1619 = vmatmul.f32.gmra.mxu3 %v3514_v51 }
 0x278   :  { %v4571_v3 = vpop.f32.mrf.mxu2  ;;  %v4573_v41 = vpop.f32.mrf.mxu3 }
 0x279   :  { %v4575_v53 = vpop.f32.mrf.mxu0  ;;  %v4577_v30 = vpop.f32.mrf.mxu1 }
 0x27c   :  { %1427 = vmatmul.f32.gmra.mxu0 %v3515_v31  ;;  %1492 = vmatmul.f32.gmra.mxu1 %v3516_v42 }
 0x27d   :  { %1557 = vmatmul.f32.gmra.mxu2 %v3515_v31  ;;  %1622 = vmatmul.f32.gmra.mxu3 %v3516_v42  ;;  %v3525_v31 = vld [vmem:[#allocation7 + $0xf0] sm:$0xff]  ;;  %v3526_v42 = vld [vmem:[#allocation7 + $0xf8] sm:$0xff] }
 0x280   :  { %v4579_v44 = vpop.f32.mrf.mxu2  ;;  %v4581_v13 = vpop.f32.mrf.mxu3 }
 0x281   :  { %v4583_v14 = vpop.f32.mrf.mxu0  ;;  %v4585_v5 = vpop.f32.mrf.mxu1 }
 0x284   :  { %1430 = vmatmul.f32.gmra.mxu0 %v3517_v55  ;;  %1495 = vmatmul.f32.gmra.mxu1 %v3518_v56 }
 0x285   :  { %1560 = vmatmul.f32.gmra.mxu2 %v3517_v55  ;;  %1625 = vmatmul.f32.gmra.mxu3 %v3518_v56  ;;  %v1641_v55 = vld [vmem:[#allocation15] sm:$0x3]  ;;  %v1204_v56 = vadd.f32 %v4513_v24, %v4511_v23 }
 0x288   :  { %v4587_v61 = vpop.f32.mrf.mxu2  ;;  %v4589_v62 = vpop.f32.mrf.mxu3 }
 0x289   :  { %v4591_v10 = vpop.f32.mrf.mxu0  ;;  %v4593_v39 = vpop.f32.mrf.mxu1 }
 0x28c   :  { %1433 = vmatmul.f32.gmra.mxu0 %v3519_v54  ;;  %1498 = vmatmul.f32.gmra.mxu1 %v3520_v57 }
 0x28d   :  { %1563 = vmatmul.f32.gmra.mxu2 %v3519_v54  ;;  %1628 = vmatmul.f32.gmra.mxu3 %v3520_v57 }
 0x290   :  { %v4595_v15 = vpop.f32.mrf.mxu2  ;;  %v4597_v27 = vpop.f32.mrf.mxu3 }
 0x291   :  { %v4599_v16 = vpop.f32.mrf.mxu0  ;;  %v4601_v28 = vpop.f32.mrf.mxu1 }
 0x294   :  { %1436 = vmatmul.f32.gmra.mxu0 %v3521_v0  ;;  %1501 = vmatmul.f32.gmra.mxu1 %v3522_v1 }
 0x295   :  { %1566 = vmatmul.f32.gmra.mxu2 %v3521_v0  ;;  %1631 = vmatmul.f32.gmra.mxu3 %v3522_v1 }
 0x298   :  { %v4603_v18 = vpop.f32.mrf.mxu2  ;;  %v4605_v47 = vpop.f32.mrf.mxu3 }
 0x299   :  { %v4607_v9 = vpop.f32.mrf.mxu0  ;;  %v4609_v21 = vpop.f32.mrf.mxu1 }
 0x29c   :  { %1439 = vmatmul.f32.gmra.mxu0 %v3523_v22  ;;  %1504 = vmatmul.f32.gmra.mxu1 %v3524_v32 }
 0x29d   :  { %1569 = vmatmul.f32.gmra.mxu2 %v3523_v22  ;;  %1634 = vmatmul.f32.gmra.mxu3 %v3524_v32  ;;  %v4625_v32 = vperm.slane %v1641_v55, 0 }
 0x2a0   :  { %v4611_v35 = vpop.f32.mrf.mxu2  ;;  %v4613_v36 = vpop.f32.mrf.mxu3 }
 0x2a1   :  { %5024 = vst [vmem:[#allocation44_spill] sm:$0xff] %v4611_v35  ;;  %v4615_v50 = vpop.f32.mrf.mxu0  ;;  %v4617_v51 = vpop.f32.mrf.mxu1 }
 0x2a2   :  { %5025 = vst [vmem:[#allocation45_spill] sm:$0xff] %v4613_v36 }
 0x2a3   :  { %5026 = vst [vmem:[#allocation46_spill] sm:$0xff] %v4615_v50 }
 0x2a4   :  { %5027 = vst [vmem:[#allocation47_spill] sm:$0xff] %v4617_v51  ;;  %1442 = vmatmul.f32.gmra.mxu0 %v3525_v31  ;;  %1507 = vmatmul.f32.gmra.mxu1 %v3526_v42 }
 0x2a5   :  { %1572 = vmatmul.f32.gmra.mxu2 %v3525_v31  ;;  %1637 = vmatmul.f32.gmra.mxu3 %v3526_v42  ;;  %v1207_v31 = vadd.f32 %v4519_v59, %v4517_v58  ;;  %v1210_v58 = vadd.f32 %v4525_v43, %v4523_v49  ;;  %v1213_v49 = vadd.f32 %v4531_v60, %v4529_v45 }
 0x2a6   :  { %v1216_v45 = vadd.f32 %v4537_v8, %v4535_v4  ;;  %v1219_v4 = vadd.f32 %v4543_v12, %v4541_v11  ;;  %v1222_v11 = vadd.f32 %v4549_v17, %v4547_v20  ;;  %v1225_v20 = vadd.f32 %v4555_v7, %v4553_v26 }
 0x2a7   :  { %v1228_v26 = vadd.f32 %v4561_v46, %v4559_v29  ;;  %v1358_v29 = vadd.f32 %v4565_v52, %v4563_v34  ;;  %v1231_v46 = vadd.f32 %v4569_v2, %v4567_v37  ;;  %v1361_v52 = vadd.f32 %v4573_v41, %v4571_v3 }
 0x2a8   :  { %v4621_v54 = vpop.f32.mrf.mxu2  ;;  %v4623_v57 = vpop.f32.mrf.mxu3  ;;  %v1234_v37 = vadd.f32 %v4577_v30, %v4575_v53  ;;  %v1364_v41 = vadd.f32 %v4581_v13, %v4579_v44  ;;  %v1237_v53 = vadd.f32 %v4585_v5, %v4583_v14  ;;  %v1367_v13 = vadd.f32 %v4589_v62, %v4587_v61 }
 0x2a9   :  { %5028 = vst [vmem:[#allocation48_spill] sm:$0xff] %v4621_v54  ;;  %v1398_v0 = vpop.f32.mrf.mxu0  ;;  %v1463_v1 = vpop.f32.mrf.mxu1  ;;  %v1240_v14 = vadd.f32 %v4593_v39, %v4591_v10  ;;  %v1370_v62 = vadd.f32 %v4597_v27, %v4595_v15  ;;  %v1243_v10 = vadd.f32 %v4601_v28, %v4599_v16  ;;  %v1373_v15 = vadd.f32 %v4605_v47, %v4603_v18 }
 0x2aa   :  { %5029 = vst [vmem:[#allocation49_spill] sm:$0xff] %v4623_v57  ;;  %v1399_v22 = vadd.f32 %v1398_v0, %v1204_v56  ;;  %v4634_v57 = vperm.slane %v1641_v55, 1  ;;  %v1246_v27 = vadd.f32 %v4609_v21, %v4607_v9  ;;  %v5032_v47 = vld [vmem:[#allocation46_spill] sm:$0xff] }
 0x2ac   :  { %v1464_v51 = vadd.f32 %v1463_v1, %v1399_v22 }
 0x2ae   :  { %v4628_v50 = vadd.f32 %v4625_v32, %v1464_v51 }
 0x2b0   :  { %1679 = vst [vmem:[#allocation30] sm:$0xff] %v4628_v50  ;;  %v1528_v42 = vpop.f32.mrf.mxu2  ;;  %v1593_v23 = vpop.f32.mrf.mxu3 }
 0x2b1   :  { %v1529_v24 = vadd.f32 %v1528_v42, %v4515_v38  ;;  %v1401_v54 = vpop.f32.mrf.mxu0  ;;  %v1466_v36 = vpop.f32.mrf.mxu1 }
 0x2b2   :  { %v1402_v56 = vadd.f32 %v1401_v54, %v1207_v31 }
 0x2b3   :  { %v1594_v0 = vadd.f32 %v1593_v23, %v1529_v24 }
 0x2b4   :  { %v1467_v35 = vadd.f32 %v1466_v36, %v1402_v56 }
 0x2b5   :  { %v4637_v1 = vadd.f32 %v4634_v57, %v1594_v0 }
 0x2b6   :  { %v4640_v51 = vadd.f32 %v4625_v32, %v1467_v35 }
 0x2b7   :  { %1680 = vst [vmem:[#allocation30 + $0x8] sm:$0xff] %v4637_v1 }
 0x2b8   :  { %1681 = vst [vmem:[#allocation30 + $0x10] sm:$0xff] %v4640_v51  ;;  %v1531_v38 = vpop.f32.mrf.mxu2  ;;  %v1596_v59 = vpop.f32.mrf.mxu3 }
 0x2b9   :  { %v1532_v55 = vadd.f32 %v1531_v38, %v4521_v48  ;;  %v1404_v54 = vpop.f32.mrf.mxu0  ;;  %v1469_v22 = vpop.f32.mrf.mxu1 }
 0x2ba   :  { %v1405_v36 = vadd.f32 %v1404_v54, %v1210_v58 }
 0x2bb   :  { %v1597_v31 = vadd.f32 %v1596_v59, %v1532_v55 }
 0x2bc   :  { %v1470_v42 = vadd.f32 %v1469_v22, %v1405_v36 }
 0x2bd   :  { %v4648_v23 = vadd.f32 %v4634_v57, %v1597_v31 }
 0x2be   :  { %v4651_v35 = vadd.f32 %v4625_v32, %v1470_v42 }
 0x2bf   :  { %1682 = vst [vmem:[#allocation30 + $0x18] sm:$0xff] %v4648_v23 }
 0x2c0   :  { %1683 = vst [vmem:[#allocation30 + $0x20] sm:$0xff] %v4651_v35  ;;  %v1534_v43 = vpop.f32.mrf.mxu2  ;;  %v1599_v48 = vpop.f32.mrf.mxu3 }
 0x2c1   :  { %v1535_v24 = vadd.f32 %v1534_v43, %v4527_v6  ;;  %v1407_v56 = vpop.f32.mrf.mxu0  ;;  %v1472_v0 = vpop.f32.mrf.mxu1 }
 0x2c2   :  { %v1408_v58 = vadd.f32 %v1407_v56, %v1213_v49 }
 0x2c3   :  { %v1600_v38 = vadd.f32 %v1599_v48, %v1535_v24 }
 0x2c4   :  { %v1473_v59 = vadd.f32 %v1472_v0, %v1408_v58 }
 0x2c5   :  { %v4659_v55 = vadd.f32 %v4634_v57, %v1600_v38 }
 0x2c6   :  { %v4662_v54 = vadd.f32 %v4625_v32, %v1473_v59 }
 0x2c7   :  { %1684 = vst [vmem:[#allocation30 + $0x28] sm:$0xff] %v4659_v55 }
 0x2c8   :  { %1685 = vst [vmem:[#allocation30 + $0x30] sm:$0xff] %v4662_v54  ;;  %v1537_v60 = vpop.f32.mrf.mxu2  ;;  %v1602_v6 = vpop.f32.mrf.mxu3 }
 0x2c9   :  { %v1538_v22 = vadd.f32 %v1537_v60, %v4533_v63  ;;  %v1410_v36 = vpop.f32.mrf.mxu0  ;;  %v1475_v31 = vpop.f32.mrf.mxu1 }
 0x2ca   :  { %v1411_v42 = vadd.f32 %v1410_v36, %v1216_v45 }
 0x2cb   :  { %v1603_v49 = vadd.f32 %v1602_v6, %v1538_v22 }
 0x2cc   :  { %v1476_v43 = vadd.f32 %v1475_v31, %v1411_v42 }
 0x2cd   :  { %v4670_v48 = vadd.f32 %v4634_v57, %v1603_v49 }
 0x2ce   :  { %v4673_v24 = vadd.f32 %v4625_v32, %v1476_v43 }
 0x2cf   :  { %1686 = vst [vmem:[#allocation30 + $0x38] sm:$0xff] %v4670_v48 }
 0x2d0   :  { %1687 = vst [vmem:[#allocation30 + $0x40] sm:$0xff] %v4673_v24  ;;  %v1540_v8 = vpop.f32.mrf.mxu2  ;;  %v1605_v63 = vpop.f32.mrf.mxu3 }
 0x2d1   :  { %v1541_v56 = vadd.f32 %v1540_v8, %v4539_v40  ;;  %v1413_v0 = vpop.f32.mrf.mxu0  ;;  %v1478_v58 = vpop.f32.mrf.mxu1 }
 0x2d2   :  { %v1414_v38 = vadd.f32 %v1413_v0, %v1219_v4 }
 0x2d3   :  { %v1606_v59 = vadd.f32 %v1605_v63, %v1541_v56 }
 0x2d4   :  { %v1479_v45 = vadd.f32 %v1478_v58, %v1414_v38 }
 0x2d5   :  { %v4681_v60 = vadd.f32 %v4634_v57, %v1606_v59 }
 0x2d6   :  { %v4684_v6 = vadd.f32 %v4625_v32, %v1479_v45 }
 0x2d7   :  { %1688 = vst [vmem:[#allocation30 + $0x48] sm:$0xff] %v4681_v60 }
 0x2d8   :  { %1689 = vst [vmem:[#allocation30 + $0x50] sm:$0xff] %v4684_v6  ;;  %v1543_v12 = vpop.f32.mrf.mxu2  ;;  %v1608_v40 = vpop.f32.mrf.mxu3 }
 0x2d9   :  { %v1544_v22 = vadd.f32 %v1543_v12, %v4545_v19  ;;  %v1416_v36 = vpop.f32.mrf.mxu0  ;;  %v1481_v31 = vpop.f32.mrf.mxu1 }
 0x2da   :  { %v1417_v42 = vadd.f32 %v1416_v36, %v1222_v11 }
 0x2db   :  { %v1609_v49 = vadd.f32 %v1608_v40, %v1544_v22 }
 0x2dc   :  { %v1482_v43 = vadd.f32 %v1481_v31, %v1417_v42 }
 0x2dd   :  { %v4692_v4 = vadd.f32 %v4634_v57, %v1609_v49 }
 0x2de   :  { %v4695_v8 = vadd.f32 %v4625_v32, %v1482_v43 }
 0x2df   :  { %1690 = vst [vmem:[#allocation30 + $0x58] sm:$0xff] %v4692_v4 }
 0x2e0   :  { %1691 = vst [vmem:[#allocation30 + $0x60] sm:$0xff] %v4695_v8  ;;  %v1546_v17 = vpop.f32.mrf.mxu2  ;;  %v1611_v19 = vpop.f32.mrf.mxu3 }
 0x2e1   :  { %v1547_v63 = vadd.f32 %v1546_v17, %v4551_v25  ;;  %v1419_v56 = vpop.f32.mrf.mxu0  ;;  %v1484_v0 = vpop.f32.mrf.mxu1 }
 0x2e2   :  { %v1420_v58 = vadd.f32 %v1419_v56, %v1225_v20 }
 0x2e3   :  { %v1612_v38 = vadd.f32 %v1611_v19, %v1547_v63 }
 0x2e4   :  { %v1485_v59 = vadd.f32 %v1484_v0, %v1420_v58 }
 0x2e5   :  { %v4703_v45 = vadd.f32 %v4634_v57, %v1612_v38 }
 0x2e6   :  { %v4706_v11 = vadd.f32 %v4625_v32, %v1485_v59 }
 0x2e7   :  { %1692 = vst [vmem:[#allocation30 + $0x68] sm:$0xff] %v4703_v45 }
 0x2e8   :  { %1693 = vst [vmem:[#allocation30 + $0x70] sm:$0xff] %v4706_v11  ;;  %v1549_v7 = vpop.f32.mrf.mxu2  ;;  %v1614_v25 = vpop.f32.mrf.mxu3 }
 0x2e9   :  { %v1550_v12 = vadd.f32 %v1549_v7, %v4557_v33  ;;  %v1422_v40 = vpop.f32.mrf.mxu0  ;;  %v1487_v22 = vpop.f32.mrf.mxu1 }
 0x2ea   :  { %v1423_v36 = vadd.f32 %v1422_v40, %v1228_v26 }
 0x2eb   :  { %v1615_v31 = vadd.f32 %v1614_v25, %v1550_v12 }
 0x2ec   :  { %v1488_v42 = vadd.f32 %v1487_v22, %v1423_v36 }
 0x2ed   :  { %v4714_v49 = vadd.f32 %v4634_v57, %v1615_v31 }
 0x2ee   :  { %v4717_v43 = vadd.f32 %v4625_v32, %v1488_v42 }
 0x2ef   :  { %1694 = vst [vmem:[#allocation30 + $0x78] sm:$0xff] %v4714_v49 }
 0x2f0   :  { %1695 = vst [vmem:[#allocation30 + $0x80] sm:$0xff] %v4717_v43  ;;  %v1552_v33 = vpop.f32.mrf.mxu2  ;;  %v1617_v20 = vpop.f32.mrf.mxu3 }
 0x2f1   :  { %v1553_v17 = vadd.f32 %v1552_v33, %v1358_v29  ;;  %v1425_v19 = vpop.f32.mrf.mxu0  ;;  %v1490_v63 = vpop.f32.mrf.mxu1 }
 0x2f2   :  { %v1426_v56 = vadd.f32 %v1425_v19, %v1231_v46 }
 0x2f3   :  { %v1618_v0 = vadd.f32 %v1617_v20, %v1553_v17 }
 0x2f4   :  { %v1491_v58 = vadd.f32 %v1490_v63, %v1426_v56 }
 0x2f5   :  { %v4726_v38 = vadd.f32 %v4634_v57, %v1618_v0 }
 0x2f6   :  { %v4729_v34 = vadd.f32 %v4625_v32, %v1491_v58 }
 0x2f7   :  { %1696 = vst [vmem:[#allocation30 + $0x88] sm:$0xff] %v4726_v38 }
 0x2f8   :  { %1697 = vst [vmem:[#allocation30 + $0x90] sm:$0xff] %v4729_v34  ;;  %v1555_v2 = vpop.f32.mrf.mxu2  ;;  %v1620_v59 = vpop.f32.mrf.mxu3 }
 0x2f9   :  { %v1556_v26 = vadd.f32 %v1555_v2, %v1361_v52  ;;  %v1428_v7 = vpop.f32.mrf.mxu0  ;;  %v1493_v25 = vpop.f32.mrf.mxu1 }
 0x2fa   :  { %v1429_v12 = vadd.f32 %v1428_v7, %v1234_v37 }
 0x2fb   :  { %v1621_v40 = vadd.f32 %v1620_v59, %v1556_v26 }
 0x2fc   :  { %v1494_v22 = vadd.f32 %v1493_v25, %v1429_v12 }
 0x2fd   :  { %v4738_v36 = vadd.f32 %v4634_v57, %v1621_v40 }
 0x2fe   :  { %v4741_v3 = vadd.f32 %v4625_v32, %v1494_v22 }
 0x2ff   :  { %1698 = vst [vmem:[#allocation30 + $0x98] sm:$0xff] %v4738_v36 }
 0x300   :  { %1699 = vst [vmem:[#allocation30 + $0xa0] sm:$0xff] %v4741_v3  ;;  %v1558_v30 = vpop.f32.mrf.mxu2  ;;  %v1623_v31 = vpop.f32.mrf.mxu3 }
 0x301   :  { %v1559_v42 = vadd.f32 %v1558_v30, %v1364_v41  ;;  %v1431_v29 = vpop.f32.mrf.mxu0  ;;  %v1496_v46 = vpop.f32.mrf.mxu1 }
 0x302   :  { %v1432_v33 = vadd.f32 %v1431_v29, %v1237_v53 }
 0x303   :  { %v1624_v20 = vadd.f32 %v1623_v31, %v1559_v42 }
 0x304   :  { %v1497_v17 = vadd.f32 %v1496_v46, %v1432_v33 }
 0x305   :  { %v4750_v19 = vadd.f32 %v4634_v57, %v1624_v20 }
 0x306   :  { %v4753_v44 = vadd.f32 %v4625_v32, %v1497_v17 }
 0x307   :  { %1700 = vst [vmem:[#allocation30 + $0xa8] sm:$0xff] %v4750_v19 }
 0x308   :  { %1701 = vst [vmem:[#allocation30 + $0xb0] sm:$0xff] %v4753_v44  ;;  %v1561_v5 = vpop.f32.mrf.mxu2  ;;  %v1626_v63 = vpop.f32.mrf.mxu3 }
 0x309   :  { %v1562_v56 = vadd.f32 %v1561_v5, %v1367_v13  ;;  %v1434_v0 = vpop.f32.mrf.mxu0  ;;  %v1499_v58 = vpop.f32.mrf.mxu1  ;;  %v5031_v5 = vld [vmem:[#allocation45_spill] sm:$0xff] }
 0x30a   :  { %v1435_v52 = vadd.f32 %v1434_v0, %v1240_v14  ;;  %v5030_v14 = vld [vmem:[#allocation44_spill] sm:$0xff] }
 0x30b   :  { %v1627_v37 = vadd.f32 %v1626_v63, %v1562_v56  ;;  %v1376_v18 = vadd.f32 %v5031_v5, %v5030_v14  ;;  %v5033_v63 = vld [vmem:[#allocation47_spill] sm:$0xff]  ;;  %v1885_v14 = vld [vmem:[#allocation18 + $0x10] sm:$0xff] }
 0x30c   :  { %v1500_v2 = vadd.f32 %v1499_v58, %v1435_v52  ;;  %v1249_v9 = vadd.f32 %v5033_v63, %v5032_v47  ;;  %v2133_v5 = vld [vmem:[#allocation18 + $0x7d0] sm:$0xff]  ;;  %v2095_v47 = vld [vmem:[#allocation18 + $0x6a0] sm:$0xff] }
 0x30d   :  { %v4762_v59 = vadd.f32 %v4634_v57, %v1627_v37  ;;  %v1883_v63 = vld [vmem:[#allocation18] sm:$0xff] }
 0x30e   :  { %v1671_v61 = vadd.f32 %v4625_v32, %v1500_v2 }
 0x30f   :  { %1702 = vst [vmem:[#allocation30 + $0xb8] sm:$0xff] %v4762_v59 }
 0x310   :  { %1703 = vst [vmem:[#allocation30 + $0xc0] sm:$0xff] %v1671_v61  ;;  %v1564_v39 = vpop.f32.mrf.mxu2  ;;  %v1629_v26 = vpop.f32.mrf.mxu3 }
 0x311   :  { %v1565_v7 = vadd.f32 %v1564_v39, %v1370_v62  ;;  %v1437_v25 = vpop.f32.mrf.mxu0  ;;  %v1502_v12 = vpop.f32.mrf.mxu1 }
 0x312   :  { %v1438_v40 = vadd.f32 %v1437_v25, %v1243_v10 }
 0x313   :  { %v1630_v22 = vadd.f32 %v1629_v26, %v1565_v7  ;;  %v5034_v26 = vld [vmem:[#allocation48_spill] sm:$0xff]  ;;  %v5035_v7 = vld [vmem:[#allocation49_spill] sm:$0xff] }
 0x314   :  { %v1503_v41 = vadd.f32 %v1502_v12, %v1438_v40  ;;  %v1379_v25 = vadd.f32 %v5035_v7, %v5034_v26  ;;  %v2127_v26 = vld [vmem:[#allocation18 + $0x7a0] sm:$0xff] }
 0x315   :  { %v1672_v53 = vadd.f32 %v4634_v57, %v1630_v22  ;;  %v1971_v7 = vld [vmem:[#allocation18 + $0x2c0] sm:$0xff] }
 0x316   :  { %v1673_v30 = vadd.f32 %v4625_v32, %v1503_v41 }
 0x317   :  { %1704 = vst [vmem:[#allocation30 + $0xc8] sm:$0xff] %v1672_v53 }
 0x318   :  { %1705 = vst [vmem:[#allocation30 + $0xd0] sm:$0xff] %v1673_v30  ;;  %v1567_v16 = vpop.f32.mrf.mxu2  ;;  %v1632_v28 = vpop.f32.mrf.mxu3 }
 0x319   :  { %v1568_v31 = vadd.f32 %v1567_v16, %v1373_v15  ;;  %v1440_v42 = vpop.f32.mrf.mxu0  ;;  %v1505_v29 = vpop.f32.mrf.mxu1  ;;  %v1925_v16 = vld [vmem:[#allocation18 + $0x150] sm:$0xff] }
 0x31a   :  { %v1441_v46 = vadd.f32 %v1440_v42, %v1246_v27  ;;  %v2101_v27 = vld [vmem:[#allocation18 + $0x6d0] sm:$0xff] }
 0x31b   :  { %v1633_v33 = vadd.f32 %v1632_v28, %v1568_v31  ;;  %v2137_v28 = vld [vmem:[#allocation18 + $0x7f0] sm:$0xff]  ;;  %v1734_v31 = vld [vmem:[#allocation16 + $0x28] sm:$0xff] }
 0x31c   :  { %v1506_v20 = vadd.f32 %v1505_v29, %v1441_v46  ;;  %v1889_v42 = vld [vmem:[#allocation18 + $0x30] sm:$0xff]  ;;  %v1923_v29 = vld [vmem:[#allocation18 + $0x140] sm:$0xff] }
 0x31d   :  { %v1674_v17 = vadd.f32 %v4634_v57, %v1633_v33  ;;  %v2099_v46 = vld [vmem:[#allocation18 + $0x6c0] sm:$0xff] }
 0x31e   :  { %v1675_v13 = vadd.f32 %v4625_v32, %v1506_v20  ;;  %v1887_v33 = vld [vmem:[#allocation18 + $0x20] sm:$0xff] }
 0x31f   :  { %1706 = vst [vmem:[#allocation30 + $0xd8] sm:$0xff] %v1674_v17  ;;  %v2135_v20 = vld [vmem:[#allocation18 + $0x7e0] sm:$0xff] }
 0x320   :  { %1707 = vst [vmem:[#allocation30 + $0xe0] sm:$0xff] %v1675_v13  ;;  %v1570_v21 = vpop.f32.mrf.mxu2  ;;  %v1635_v56 = vpop.f32.mrf.mxu3 }
 0x321   :  { %v1571_v0 = vadd.f32 %v1570_v21, %v1376_v18  ;;  %v1443_v58 = vpop.f32.mrf.mxu0  ;;  %v1508_v52 = vpop.f32.mrf.mxu1  ;;  %v1919_v18 = vld [vmem:[#allocation18 + $0x120] sm:$0xff]  ;;  %v1977_v21 = vld [vmem:[#allocation18 + $0x2f0] sm:$0xff] }
 0x322   :  { %v1444_v37 = vadd.f32 %v1443_v58, %v1249_v9  ;;  %v2131_v9 = vld [vmem:[#allocation18 + $0x7c0] sm:$0xff] }
 0x323   :  { %v1636_v2 = vadd.f32 %v1635_v56, %v1571_v0  ;;  %v1735_v56 = vld [vmem:[#allocation16 + $0x30] sm:$0xff]  ;;  %v1917_v0 = vld [vmem:[#allocation18 + $0x110] sm:$0xff]  ;;  %v1975_v58 = vld [vmem:[#allocation18 + $0x2e0] sm:$0xff] }
 0x324   :  { %v1509_v62 = vadd.f32 %v1508_v52, %v1444_v37  ;;  %v2093_v52 = vld [vmem:[#allocation18 + $0x690] sm:$0xff]  ;;  %v1915_v37 = vld [vmem:[#allocation18 + $0x100] sm:$0xff] }
 0x325   :  { %v1676_v10 = vadd.f32 %v4634_v57, %v1636_v2  ;;  %v2129_v2 = vld [vmem:[#allocation18 + $0x7b0] sm:$0xff] }
 0x326   :  { %v1677_v39 = vadd.f32 %v4625_v32, %v1509_v62  ;;  %v1730_v32 = vld [vmem:[#allocation16 + $0x8] sm:$0xff]  ;;  %v1973_v62 = vld [vmem:[#allocation18 + $0x2d0] sm:$0xff] }
 0x327   :  { %1708 = vst [vmem:[#allocation30 + $0xe8] sm:$0xff] %v1676_v10 }
 0x328   :  { %1709 = vst [vmem:[#allocation30 + $0xf0] sm:$0xff] %v1677_v39  ;;  %v1573_v12 = vpop.f32.mrf.mxu2  ;;  %1738 = vmatpush.msra.mxu0 %v1677_v39  ;;  %v1638_v40 = vpop.f32.mrf.mxu3  ;;  %v2091_v39 = vld [vmem:[#allocation18 + $0x680] sm:$0xff] }
 0x329   :  { %v1574_v22 = vadd.f32 %v1573_v12, %v1379_v25  ;;  %v2007_v25 = vld [vmem:[#allocation18 + $0x3e0] sm:$0xff]  ;;  %v2089_v12 = vld [vmem:[#allocation18 + $0x670] sm:$0xff] }
 0x32a   :  { %1739 = vmatpush.msra.mxu0 %v1675_v13  ;;  %v2097_v13 = vld [vmem:[#allocation18 + $0x6b0] sm:$0xff] }
 0x32b   :  { %v1639_v41 = vadd.f32 %v1638_v40, %v1574_v22  ;;  %v2125_v40 = vld [vmem:[#allocation18 + $0x790] sm:$0xff] }
 0x32c   :  { %1740 = vmatpush.msra.mxu0 %v1673_v30  ;;  %v1891_v30 = vld [vmem:[#allocation18 + $0x40] sm:$0xff]  ;;  %v1969_v22 = vld [vmem:[#allocation18 + $0x2b0] sm:$0xff] }
 0x32d   :  { %v1678_v15 = vadd.f32 %v4634_v57, %v1639_v41  ;;  %v1729_v57 = vld [vmem:[#allocation16] sm:$0xff]  ;;  %v1736_v41 = vld [vmem:[#allocation16 + $0x38] sm:$0xff] }
 0x32e   :  { %1741 = vmatpush.msra.mxu0 %v1671_v61  ;;  %v1927_v61 = vld [vmem:[#allocation18 + $0x160] sm:$0xff] }
 0x32f   :  { %1710 = vst [vmem:[#allocation30 + $0xf8] sm:$0xff] %v1678_v15  ;;  %1782 = vmatpush.msra.mxu1 %v1678_v15  ;;  %v2005_v15 = vld [vmem:[#allocation18 + $0x3d0] sm:$0xff] }
 0x330   :  { %1742 = vmatpush.msra.mxu0 %v4753_v44  ;;  %v1893_v44 = vld [vmem:[#allocation18 + $0x50] sm:$0xff] }
 0x331   :  { %1783 = vmatpush.msra.mxu1 %v1676_v10  ;;  %v2009_v10 = vld [vmem:[#allocation18 + $0x3f0] sm:$0xff] }
 0x332   :  { %1743 = vmatpush.msra.mxu0 %v4741_v3  ;;  %v1931_v3 = vld [vmem:[#allocation18 + $0x180] sm:$0xff] }
 0x333   :  { %1784 = vmatpush.msra.mxu1 %v1674_v17  ;;  %v1921_v17 = vld [vmem:[#allocation18 + $0x130] sm:$0xff] }
 0x334   :  { %1744 = vmatpush.msra.mxu0 %v4729_v34  ;;  %v1897_v34 = vld [vmem:[#allocation18 + $0x70] sm:$0xff] }
 0x335   :  { %1785 = vmatpush.msra.mxu1 %v1672_v53  ;;  %v2103_v53 = vld [vmem:[#allocation18 + $0x6e0] sm:$0xff] }
 0x336   :  { %1745 = vmatpush.msra.mxu0 %v4717_v43  ;;  %v1933_v43 = vld [vmem:[#allocation18 + $0x190] sm:$0xff] }
 0x337   :  { %1786 = vmatpush.msra.mxu1 %v4762_v59  ;;  %v2105_v59 = vld [vmem:[#allocation18 + $0x6f0] sm:$0xff] }
 0x338   :  { %1746 = vmatpush.msra.mxu0 %v4706_v11  ;;  %v1935_v11 = vld [vmem:[#allocation18 + $0x1a0] sm:$0xff] }
 0x339   :  { %1787 = vmatpush.msra.mxu1 %v4750_v19  ;;  %v1929_v19 = vld [vmem:[#allocation18 + $0x170] sm:$0xff] }
 0x33a   :  { %1747 = vmatpush.msra.mxu0 %v4695_v8  ;;  %v1937_v8 = vld [vmem:[#allocation18 + $0x1b0] sm:$0xff] }
 0x33b   :  { %1788 = vmatpush.msra.mxu1 %v4738_v36  ;;  %v1895_v36 = vld [vmem:[#allocation18 + $0x60] sm:$0xff] }
 0x33c   :  { %1748 = vmatpush.msra.mxu0 %v4684_v6  ;;  %v1905_v6 = vld [vmem:[#allocation18 + $0xb0] sm:$0xff] }
 0x33d   :  { %1789 = vmatpush.msra.mxu1 %v4726_v38  ;;  %v1733_v38 = vld [vmem:[#allocation16 + $0x20] sm:$0xff] }
 0x33e   :  { %1749 = vmatpush.msra.mxu0 %v4673_v24  ;;  %v1945_v24 = vld [vmem:[#allocation18 + $0x1f0] sm:$0xff] }
 0x33f   :  { %1790 = vmatpush.msra.mxu1 %v4714_v49  ;;  %2479 = vmatpush.msra.mxu3 %v1945_v24  ;;  %v1899_v49 = vld [vmem:[#allocation18 + $0x80] sm:$0xff]  ;;  %v2085_v24 = vld [vmem:[#allocation18 + $0x650] sm:$0xff] }
 0x340   :  { %1750 = vmatpush.msra.mxu0 %v4662_v54  ;;  %v1911_v54 = vld [vmem:[#allocation18 + $0xe0] sm:$0xff] }
 0x341   :  { %1791 = vmatpush.msra.mxu1 %v4703_v45  ;;  %v1901_v45 = vld [vmem:[#allocation18 + $0x90] sm:$0xff] }
 0x342   :  { %1751 = vmatpush.msra.mxu0 %v4651_v35  ;;  %v1731_v35 = vld [vmem:[#allocation16 + $0x10] sm:$0xff] }
 0x343   :  { %1792 = vmatpush.msra.mxu1 %v4692_v4  ;;  %v1939_v4 = vld [vmem:[#allocation18 + $0x1c0] sm:$0xff] }
 0x344   :  { %1752 = vmatpush.msra.mxu0 %v4640_v51  ;;  %v1913_v51 = vld [vmem:[#allocation18 + $0xf0] sm:$0xff] }
 0x345   :  { %1793 = vmatpush.msra.mxu1 %v4681_v60  ;;  %2459 = vmatpush.msra.mxu2 %v1913_v51  ;;  %v1941_v60 = vld [vmem:[#allocation18 + $0x1d0] sm:$0xff]  ;;  %v2123_v51 = vld [vmem:[#allocation18 + $0x780] sm:$0xff] }
 0x346   :  { %1753 = vmatpush.msra.mxu0 %v4628_v50  ;;  %v1909_v50 = vld [vmem:[#allocation18 + $0xd0] sm:$0xff] }
 0x347   :  { %1794 = vmatpush.msra.mxu1 %v4670_v48  ;;  %1754 = vmatmul.f32.vlgmr.msra.gmra.mxu0 %v1729_v57  ;;  %v1943_v48 = vld [vmem:[#allocation18 + $0x1e0] sm:$0xff] }
 0x348   :  { %2460 = vmatpush.msra.mxu2 %v1911_v54  ;;  %2480 = vmatpush.msra.mxu3 %v1943_v48  ;;  %v1965_v54 = vld [vmem:[#allocation18 + $0x290] sm:$0xff] }
 0x349   :  { %1795 = vmatpush.msra.mxu1 %v4659_v55  ;;  %v1907_v55 = vld [vmem:[#allocation18 + $0xc0] sm:$0xff]  ;;  %2579 = vmatpush.msrb.mxu0 %v2105_v59  ;;  %v2121_v48 = vld [vmem:[#allocation18 + $0x770] sm:$0xff] }
 0x34a   :  { %2461 = vmatpush.msra.mxu2 %v1909_v50  ;;  %2481 = vmatpush.msra.mxu3 %v1941_v60  ;;  %v2001_v50 = vld [vmem:[#allocation18 + $0x3b0] sm:$0xff]  ;;  %v1963_v60 = vld [vmem:[#allocation18 + $0x280] sm:$0xff] }
 0x34b   :  { %1796 = vmatpush.msra.mxu1 %v4648_v23  ;;  %v1732_v23 = vld [vmem:[#allocation16 + $0x18] sm:$0xff]  ;;  %2580 = vmatpush.msrb.mxu0 %v2103_v53  ;;  %v2075_v59 = vld [vmem:[#allocation18 + $0x600] sm:$0xff] }
 0x34c   :  { %2462 = vmatpush.msra.mxu2 %v1907_v55  ;;  %2482 = vmatpush.msra.mxu3 %v1939_v4  ;;  %v2083_v55 = vld [vmem:[#allocation18 + $0x640] sm:$0xff]  ;;  %v2081_v4 = vld [vmem:[#allocation18 + $0x630] sm:$0xff] }
 0x34d   :  { %1797 = vmatpush.msra.mxu1 %v4637_v1  ;;  %v1903_v1 = vld [vmem:[#allocation18 + $0xa0] sm:$0xff]  ;;  %2581 = vmatpush.msrb.mxu0 %v2101_v27  ;;  %v1953_v53 = vld [vmem:[#allocation18 + $0x230] sm:$0xff] }
 0x34e   :  { %1798 = vmatmul.f32.vlgmr.msra.gmra.mxu1 %v1729_v57  ;;  %2463 = vmatpush.msra.mxu2 %v1905_v6  ;;  %v1967_v57 = vld [vmem:[#allocation18 + $0x2a0] sm:$0xff] }
 0x34f   :  { %1757 = vmatmul.f32.gmra.mxu0 %v1730_v32  ;;  %2483 = vmatpush.msra.mxu3 %v1937_v8  ;;  %v2119_v6 = vld [vmem:[#allocation18 + $0x760] sm:$0xff]  ;;  %v1997_v8 = vld [vmem:[#allocation18 + $0x390] sm:$0xff] }
 0x350   :  { %2464 = vmatpush.msra.mxu2 %v1903_v1  ;;  %2599 = vmatpush.msrb.mxu1 %v2137_v28  ;;  %v1961_v1 = vld [vmem:[#allocation18 + $0x270] sm:$0xff]  ;;  %v2111_v27 = vld [vmem:[#allocation18 + $0x720] sm:$0xff] }
 0x351   :  { %2484 = vmatpush.msra.mxu3 %v1935_v11  ;;  %2582 = vmatpush.msrb.mxu0 %v2099_v46  ;;  %v2117_v11 = vld [vmem:[#allocation18 + $0x750] sm:$0xff]  ;;  %v1951_v28 = vld [vmem:[#allocation18 + $0x220] sm:$0xff] }
 0x352   :  { %2465 = vmatpush.msra.mxu2 %v1901_v45  ;;  %2600 = vmatpush.msrb.mxu1 %v2135_v20  ;;  %v1959_v45 = vld [vmem:[#allocation18 + $0x260] sm:$0xff]  ;;  %v1949_v46 = vld [vmem:[#allocation18 + $0x210] sm:$0xff]  ;;  %v1737_v20 = vld [vmem:[#allocation16 + $0x40] sm:$0xff] }
 0x353   :  { %2485 = vmatpush.msra.mxu3 %v1933_v43  ;;  %2583 = vmatpush.msrb.mxu0 %v2097_v13  ;;  %v1995_v43 = vld [vmem:[#allocation18 + $0x380] sm:$0xff] }
 0x354   :  { %2466 = vmatpush.msra.mxu2 %v1899_v49  ;;  %2601 = vmatpush.msrb.mxu1 %v2133_v5  ;;  %v2079_v49 = vld [vmem:[#allocation18 + $0x620] sm:$0xff] }
 0x355   :  { %2486 = vmatpush.msra.mxu3 %v1931_v3  ;;  %2584 = vmatpush.msrb.mxu0 %v2095_v47  ;;  %v1993_v3 = vld [vmem:[#allocation18 + $0x370] sm:$0xff]  ;;  %v1947_v13 = vld [vmem:[#allocation18 + $0x200] sm:$0xff] }
 0x356   :  { %1801 = vmatmul.f32.gmra.mxu1 %v1730_v32  ;;  %2467 = vmatpush.msra.mxu2 %v1897_v34  ;;  %v2087_v32 = vld [vmem:[#allocation18 + $0x660] sm:$0xff] }
 0x357   :  { %1760 = vmatmul.f32.gmra.mxu0 %v1731_v35  ;;  %2487 = vmatpush.msra.mxu3 %v1929_v19  ;;  %v2115_v34 = vld [vmem:[#allocation18 + $0x740] sm:$0xff] }
 0x358   :  { %2468 = vmatpush.msra.mxu2 %v1895_v36  ;;  %2602 = vmatpush.msrb.mxu1 %v2131_v9  ;;  %v2077_v36 = vld [vmem:[#allocation18 + $0x610] sm:$0xff]  ;;  %v1955_v19 = vld [vmem:[#allocation18 + $0x240] sm:$0xff] }
 0x359   :  { %2488 = vmatpush.msra.mxu3 %v1927_v61  ;;  %2585 = vmatpush.msrb.mxu0 %v2093_v52  ;;  %v1991_v61 = vld [vmem:[#allocation18 + $0x360] sm:$0xff]  ;;  %v2221_v52 = vld [vmem:[#allocation18 + $0xa90] sm:$0xff] }
 0x35a   :  { %2469 = vmatpush.msra.mxu2 %v1893_v44  ;;  %2603 = vmatpush.msrb.mxu1 %v2129_v2  ;;  %v2113_v44 = vld [vmem:[#allocation18 + $0x730] sm:$0xff]  ;;  %v2227_v5 = vld [vmem:[#allocation18 + $0xac0] sm:$0xff] }
 0x35b   :  { %2489 = vmatpush.msra.mxu3 %v1925_v16  ;;  %2586 = vmatpush.msrb.mxu0 %v2091_v39  ;;  %v1989_v16 = vld [vmem:[#allocation18 + $0x350] sm:$0xff]  ;;  %v1983_v47 = vld [vmem:[#allocation18 + $0x320] sm:$0xff] }
 0x35c   :  { %2470 = vmatpush.msra.mxu2 %v1891_v30  ;;  %2604 = vmatpush.msrb.mxu1 %v2127_v26  ;;  %v2233_v30 = vld [vmem:[#allocation18 + $0xaf0] sm:$0xff]  ;;  %v2263_v9 = vld [vmem:[#allocation18 + $0xbe0] sm:$0xff] }
 0x35d   :  { %2490 = vmatpush.msra.mxu3 %v1923_v29  ;;  %2587 = vmatpush.msrb.mxu0 %v2089_v12  ;;  %v1987_v29 = vld [vmem:[#allocation18 + $0x340] sm:$0xff] }
 0x35e   :  { %1804 = vmatmul.f32.gmra.mxu1 %v1731_v35  ;;  %2471 = vmatpush.msra.mxu2 %v1889_v42  ;;  %v2003_v35 = vld [vmem:[#allocation18 + $0x3c0] sm:$0xff]  ;;  %v2109_v42 = vld [vmem:[#allocation18 + $0x710] sm:$0xff] }
 0x35f   :  { %1763 = vmatmul.f32.gmra.mxu0 %v1732_v23  ;;  %2491 = vmatpush.msra.mxu3 %v1921_v17  ;;  %v2107_v17 = vld [vmem:[#allocation18 + $0x700] sm:$0xff] }
 0x360   :  { %2472 = vmatpush.msra.mxu2 %v1887_v33  ;;  %2605 = vmatpush.msrb.mxu1 %v2125_v40  ;;  %v2229_v33 = vld [vmem:[#allocation18 + $0xad0] sm:$0xff]  ;;  %v2219_v2 = vld [vmem:[#allocation18 + $0xa80] sm:$0xff] }
 0x361   :  { %2492 = vmatpush.msra.mxu3 %v1919_v18  ;;  %2588 = vmatpush.msrb.mxu0 %v2087_v32  ;;  %v2265_v18 = vld [vmem:[#allocation18 + $0xbf0] sm:$0xff]  ;;  %v2255_v39 = vld [vmem:[#allocation18 + $0xba0] sm:$0xff] }
 0x362   :  { %2473 = vmatpush.msra.mxu2 %v1885_v14  ;;  %2606 = vmatpush.msrb.mxu1 %v2123_v51  ;;  %v1985_v14 = vld [vmem:[#allocation18 + $0x330] sm:$0xff]  ;;  %v2215_v26 = vld [vmem:[#allocation18 + $0xa60] sm:$0xff] }
 0x363   :  { %2493 = vmatpush.msra.mxu3 %v1917_v0  ;;  %2589 = vmatpush.msrb.mxu0 %v2085_v24  ;;  %v2261_v0 = vld [vmem:[#allocation18 + $0xbd0] sm:$0xff]  ;;  %v2251_v12 = vld [vmem:[#allocation18 + $0xb80] sm:$0xff] }
 0x364   :  { %2474 = vmatpush.msra.mxu2 %v1883_v63  ;;  %2607 = vmatpush.msrb.mxu1 %v2121_v48  ;;  %v2225_v63 = vld [vmem:[#allocation18 + $0xab0] sm:$0xff]  ;;  %v2211_v40 = vld [vmem:[#allocation18 + $0xa40] sm:$0xff] }
 0x365   :  { %2494 = vmatpush.msra.mxu3 %v1915_v37  ;;  %2590 = vmatpush.msrb.mxu0 %v2083_v55  ;;  %v2259_v37 = vld [vmem:[#allocation18 + $0xbc0] sm:$0xff]  ;;  %v2245_v32 = vld [vmem:[#allocation18 + $0xb50] sm:$0xff] }
 0x366   :  { %1807 = vmatmul.f32.gmra.mxu1 %v1732_v23  ;;  %2499 = vmatpush.msrb.mxu2 %v1977_v21  ;;  %v1999_v23 = vld [vmem:[#allocation18 + $0x3a0] sm:$0xff]  ;;  %v1981_v21 = vld [vmem:[#allocation18 + $0x310] sm:$0xff] }
 0x367   :  { %1766 = vmatmul.f32.gmra.mxu0 %v1733_v38  ;;  %2519 = vmatpush.msrb.mxu3 %v2009_v10  ;;  %v2217_v10 = vld [vmem:[#allocation18 + $0xa70] sm:$0xff]  ;;  %v2243_v51 = vld [vmem:[#allocation18 + $0xb40] sm:$0xff] }
 0x368   :  { %2500 = vmatpush.msrb.mxu2 %v1975_v58  ;;  %2608 = vmatpush.msrb.mxu1 %v2119_v6  ;;  %v1979_v58 = vld [vmem:[#allocation18 + $0x300] sm:$0xff]  ;;  %v2241_v24 = vld [vmem:[#allocation18 + $0xb30] sm:$0xff] }
 0x369   :  { %2520 = vmatpush.msrb.mxu3 %v2007_v25  ;;  %2591 = vmatpush.msrb.mxu0 %v2081_v4  ;;  %v2213_v25 = vld [vmem:[#allocation18 + $0xa50] sm:$0xff]  ;;  %v2235_v55 = vld [vmem:[#allocation18 + $0xb00] sm:$0xff] }
 0x36a   :  { %2501 = vmatpush.msrb.mxu2 %v1973_v62  ;;  %2609 = vmatpush.msrb.mxu1 %v2117_v11  ;;  %v2257_v62 = vld [vmem:[#allocation18 + $0xbb0] sm:$0xff]  ;;  %v2039_v6 = vld [vmem:[#allocation18 + $0x4e0] sm:$0xff] }
 0x36b   :  { %2521 = vmatpush.msrb.mxu3 %v2005_v15  ;;  %2592 = vmatpush.msrb.mxu0 %v2079_v49  ;;  %v2247_v15 = vld [vmem:[#allocation18 + $0xb60] sm:$0xff]  ;;  %v2237_v48 = vld [vmem:[#allocation18 + $0xb10] sm:$0xff] }
 0x36c   :  { %2502 = vmatpush.msrb.mxu2 %v1971_v7  ;;  %2610 = vmatpush.msrb.mxu1 %v2115_v34  ;;  %v2253_v7 = vld [vmem:[#allocation18 + $0xb90] sm:$0xff]  ;;  %v2035_v4 = vld [vmem:[#allocation18 + $0x4c0] sm:$0xff] }
 0x36d   :  { %2522 = vmatpush.msrb.mxu3 %v2003_v35  ;;  %2593 = vmatpush.msrb.mxu0 %v2077_v36  ;;  %v2205_v35 = vld [vmem:[#allocation18 + $0xa10] sm:$0xff] }
 0x36e   :  { %1810 = vmatmul.f32.gmra.mxu1 %v1733_v38  ;;  %2503 = vmatpush.msrb.mxu2 %v1969_v22  ;;  %v1957_v38 = vld [vmem:[#allocation18 + $0x250] sm:$0xff] }
 0x36f   :  { %1769 = vmatmul.f32.gmra.mxu0 %v1734_v31  ;;  %2523 = vmatpush.msrb.mxu3 %v2001_v50  ;;  %v2249_v22 = vld [vmem:[#allocation18 + $0xb70] sm:$0xff]  ;;  %v2239_v50 = vld [vmem:[#allocation18 + $0xb20] sm:$0xff] }
 0x370   :  { %2504 = vmatpush.msrb.mxu2 %v1967_v57  ;;  %2611 = vmatpush.msrb.mxu1 %v2113_v44  ;;  %v2207_v57 = vld [vmem:[#allocation18 + $0xa20] sm:$0xff]  ;;  %v2033_v11 = vld [vmem:[#allocation18 + $0x4b0] sm:$0xff] }
 0x371   :  { %2524 = vmatpush.msrb.mxu3 %v1999_v23  ;;  %2594 = vmatpush.msrb.mxu0 %v2075_v59  ;;  %v2069_v34 = vld [vmem:[#allocation18 + $0x5d0] sm:$0xff] }
 0x372   :  { %2505 = vmatpush.msrb.mxu2 %v1965_v54  ;;  %2612 = vmatpush.msrb.mxu1 %v2111_v27  ;;  %v2203_v54 = vld [vmem:[#allocation18 + $0xa00] sm:$0xff]  ;;  %v2029_v36 = vld [vmem:[#allocation18 + $0x490] sm:$0xff] }
 0x373   :  { %2525 = vmatpush.msrb.mxu3 %v1997_v8  ;;  %2659 = vmatpush.msra.mxu0 %v2233_v30  ;;  %v2073_v8 = vld [vmem:[#allocation18 + $0x5f0] sm:$0xff]  ;;  %v2063_v30 = vld [vmem:[#allocation18 + $0x5a0] sm:$0xff] }
 0x374   :  { %2506 = vmatpush.msrb.mxu2 %v1963_v60  ;;  %2613 = vmatpush.msrb.mxu1 %v2109_v42  ;;  %v2041_v60 = vld [vmem:[#allocation18 + $0x4f0] sm:$0xff]  ;;  %v2023_v27 = vld [vmem:[#allocation18 + $0x460] sm:$0xff] }
 0x375   :  { %2526 = vmatpush.msrb.mxu3 %v1995_v43  ;;  %v2071_v43 = vld [vmem:[#allocation18 + $0x5e0] sm:$0xff]  ;;  %v2065_v44 = vld [vmem:[#allocation18 + $0x5b0] sm:$0xff] }
 0x376   :  { %1813 = vmatmul.f32.gmra.mxu1 %v1734_v31  ;;  %2507 = vmatpush.msrb.mxu2 %v1961_v1  ;;  %v2231_v31 = vld [vmem:[#allocation18 + $0xae0] sm:$0xff]  ;;  %v2037_v1 = vld [vmem:[#allocation18 + $0x4d0] sm:$0xff] }
 0x377   :  { %1772 = vmatmul.f32.gmra.mxu0 %v1735_v56  ;;  %2527 = vmatpush.msrb.mxu3 %v1993_v3  ;;  %v2067_v3 = vld [vmem:[#allocation18 + $0x5c0] sm:$0xff] }
 0x378   :  { %2508 = vmatpush.msrb.mxu2 %v1959_v45  ;;  %2660 = vmatpush.msra.mxu0 %v2231_v31  ;;  %v2059_v31 = vld [vmem:[#allocation18 + $0x580] sm:$0xff] }
 0x379   :  { %2528 = vmatpush.msrb.mxu3 %v1991_v61  ;;  %2614 = vmatpush.msrb.mxu1 %v2107_v17  ;;  %v2025_v61 = vld [vmem:[#allocation18 + $0x470] sm:$0xff]  ;;  %v2019_v42 = vld [vmem:[#allocation18 + $0x440] sm:$0xff] }
 0x37a   :  { %2509 = vmatpush.msrb.mxu2 %v1957_v38  ;;  %2661 = vmatpush.msra.mxu0 %v2229_v33  ;;  %v2031_v38 = vld [vmem:[#allocation18 + $0x4a0] sm:$0xff]  ;;  %v2017_v33 = vld [vmem:[#allocation18 + $0x430] sm:$0xff] }
 0x37b   :  { %2529 = vmatpush.msrb.mxu3 %v1989_v16  ;;  %2679 = vmatpush.msra.mxu1 %v2265_v18  ;;  %v2061_v16 = vld [vmem:[#allocation18 + $0x590] sm:$0xff] }
 0x37c   :  { %2510 = vmatpush.msrb.mxu2 %v1955_v19  ;;  %2662 = vmatpush.msra.mxu0 %v2227_v5  ;;  %v2027_v19 = vld [vmem:[#allocation18 + $0x480] sm:$0xff]  ;;  %v2053_v18 = vld [vmem:[#allocation18 + $0x550] sm:$0xff] }
 0x37d   :  { %2530 = vmatpush.msrb.mxu3 %v1987_v29  ;;  %2680 = vmatpush.msra.mxu1 %v2263_v9  ;;  %v2057_v29 = vld [vmem:[#allocation18 + $0x570] sm:$0xff]  ;;  %v2359_v5 = vld [vmem:[#allocation18 + $0xee0] sm:$0xff] }
 0x37e   :  { %1816 = vmatmul.f32.gmra.mxu1 %v1735_v56  ;;  %2511 = vmatpush.msrb.mxu2 %v1953_v53  ;;  %v2223_v56 = vld [vmem:[#allocation18 + $0xaa0] sm:$0xff] }
 0x37f   :  { %1775 = vmatmul.f32.gmra.mxu0 %v1736_v41  ;;  %2531 = vmatpush.msrb.mxu3 %v1985_v14  ;;  %v2015_v14 = vld [vmem:[#allocation18 + $0x420] sm:$0xff] }
 0x380   :  { %2512 = vmatpush.msrb.mxu2 %v1951_v28  ;;  %2663 = vmatpush.msra.mxu0 %v2225_v63  ;;  %v2021_v28 = vld [vmem:[#allocation18 + $0x450] sm:$0xff]  ;;  %v2051_v9 = vld [vmem:[#allocation18 + $0x540] sm:$0xff] }
 0x381   :  { %2532 = vmatpush.msrb.mxu3 %v1983_v47  ;;  %2681 = vmatpush.msra.mxu1 %v2261_v0  ;;  %v2013_v47 = vld [vmem:[#allocation18 + $0x410] sm:$0xff]  ;;  %v2355_v0 = vld [vmem:[#allocation18 + $0xec0] sm:$0xff] }
 0x382   :  { %2513 = vmatpush.msrb.mxu2 %v1949_v46  ;;  %2664 = vmatpush.msra.mxu0 %v2223_v56  ;;  %v2357_v63 = vld [vmem:[#allocation18 + $0xed0] sm:$0xff] }
 0x383   :  { %2533 = vmatpush.msrb.mxu3 %v1981_v21  ;;  %2682 = vmatpush.msra.mxu1 %v2259_v37  ;;  %v2011_v21 = vld [vmem:[#allocation18 + $0x400] sm:$0xff]  ;;  %v2049_v56 = vld [vmem:[#allocation18 + $0x530] sm:$0xff] }
 0x384   :  { %2514 = vmatpush.msrb.mxu2 %v1947_v13  ;;  %2665 = vmatpush.msra.mxu0 %v2221_v52  ;;  %v2055_v13 = vld [vmem:[#allocation18 + $0x560] sm:$0xff]  ;;  %v2393_v52 = vld [vmem:[#allocation18 + $0xff0] sm:$0xff] }
 0x385   :  { %2534 = vmatpush.msrb.mxu3 %v1979_v58  ;;  %2683 = vmatpush.msra.mxu1 %v2257_v62  ;;  %v2169_v37 = vld [vmem:[#allocation18 + $0x8f0] sm:$0xff] }
 0x386   :  { %1819 = vmatmul.f32.gmra.mxu1 %v1736_v41  ;;  %2666 = vmatpush.msra.mxu0 %v2219_v2  ;;  %v2209_v41 = vld [vmem:[#allocation18 + $0xa30] sm:$0xff]  ;;  %v2047_v2 = vld [vmem:[#allocation18 + $0x520] sm:$0xff] }
 0x387   :  { %1778 = vmatmul.f32.gmra.mxu0 %v1737_v20  ;;  %2684 = vmatpush.msra.mxu1 %v2255_v39  ;;  %v2353_v62 = vld [vmem:[#allocation18 + $0xeb0] sm:$0xff]  ;;  %v2167_v39 = vld [vmem:[#allocation18 + $0x8e0] sm:$0xff] }
 0x388   :  { %2667 = vmatpush.msra.mxu0 %v2217_v10  ;;  %v2391_v10 = vld [vmem:[#allocation18 + $0xfe0] sm:$0xff] }
 0x389   :  { %2685 = vmatpush.msra.mxu1 %v2253_v7  ;;  %v2351_v7 = vld [vmem:[#allocation18 + $0xea0] sm:$0xff] }
 0x38a   :  { %2668 = vmatpush.msra.mxu0 %v2215_v26  ;;  %v2045_v26 = vld [vmem:[#allocation18 + $0x510] sm:$0xff] }
 0x38b   :  { %2686 = vmatpush.msra.mxu1 %v2251_v12  ;;  %v2165_v12 = vld [vmem:[#allocation18 + $0x8d0] sm:$0xff] }
 0x38c   :  { %2669 = vmatpush.msra.mxu0 %v2213_v25  ;;  %v2389_v25 = vld [vmem:[#allocation18 + $0xfd0] sm:$0xff] }
 0x38d   :  { %2687 = vmatpush.msra.mxu1 %v2249_v22  ;;  %v2349_v22 = vld [vmem:[#allocation18 + $0xe90] sm:$0xff] }
 0x38e   :  { %1822 = vmatmul.f32.gmra.mxu1 %v1737_v20  ;;  %2670 = vmatpush.msra.mxu0 %v2211_v40  ;;  %v2361_v20 = vld [vmem:[#allocation18 + $0xef0] sm:$0xff]  ;;  %v2043_v40 = vld [vmem:[#allocation18 + $0x500] sm:$0xff] }
 0x38f   :  { %2688 = vmatpush.msra.mxu1 %v2247_v15  ;;  %v2163_v15 = vld [vmem:[#allocation18 + $0x8c0] sm:$0xff] }
 0x390   :  { %2671 = vmatpush.msra.mxu0 %v2209_v41  ;;  %v2387_v41 = vld [vmem:[#allocation18 + $0xfc0] sm:$0xff] }
 0x391   :  { %2689 = vmatpush.msra.mxu1 %v2245_v32  ;;  %v2347_v32 = vld [vmem:[#allocation18 + $0xe80] sm:$0xff] }
 0x392   :  { %2672 = vmatpush.msra.mxu0 %v2207_v57  ;;  %v2201_v57 = vld [vmem:[#allocation18 + $0x9f0] sm:$0xff] }
 0x393   :  { %2690 = vmatpush.msra.mxu1 %v2243_v51  ;;  %v2161_v51 = vld [vmem:[#allocation18 + $0x8b0] sm:$0xff] }
 0x394   :  { %2673 = vmatpush.msra.mxu0 %v2205_v35  ;;  %v2385_v35 = vld [vmem:[#allocation18 + $0xfb0] sm:$0xff] }
 0x395   :  { %2691 = vmatpush.msra.mxu1 %v2241_v24  ;;  %v2345_v24 = vld [vmem:[#allocation18 + $0xe70] sm:$0xff] }
 0x396   :  { %2674 = vmatpush.msra.mxu0 %v2203_v54  ;;  %v2199_v54 = vld [vmem:[#allocation18 + $0x9e0] sm:$0xff] }
 0x397   :  { %2692 = vmatpush.msra.mxu1 %v2239_v50  ;;  %v2383_v50 = vld [vmem:[#allocation18 + $0xfa0] sm:$0xff] }
 0x399   :  { %2693 = vmatpush.msra.mxu1 %v2237_v48  ;;  %v2159_v48 = vld [vmem:[#allocation18 + $0x8a0] sm:$0xff] }
 0x39b   :  { %2694 = vmatpush.msra.mxu1 %v2235_v55  ;;  %v2343_v55 = vld [vmem:[#allocation18 + $0xe60] sm:$0xff] }
 0x3c4   :  { %v4811_v23 = vpop.f32.mrf.mxu0 }
 0x3c5   :  { %2475 = vmatmul.f32.vlgmr.msra.gmra.mxu2 %v4811_v23 }
 0x3c6   :  { %2539 = vmatpush.msra.mxu2 %v2041_v60  ;;  %v2197_v60 = vld [vmem:[#allocation18 + $0x9d0] sm:$0xff] }
 0x3c8   :  { %2540 = vmatpush.msra.mxu2 %v2039_v6  ;;  %v2381_v6 = vld [vmem:[#allocation18 + $0xf90] sm:$0xff] }
 0x3ca   :  { %2541 = vmatpush.msra.mxu2 %v2037_v1  ;;  %v2157_v1 = vld [vmem:[#allocation18 + $0x890] sm:$0xff] }
 0x3cb   :  { %v4814_v45 = vpop.f32.mrf.mxu1 }
 0x3cc   :  { %2495 = vmatmul.f32.vlgmr.msra.gmra.mxu3 %v4814_v45  ;;  %2542 = vmatpush.msra.mxu2 %v2035_v4  ;;  %v4817_v49 = vpop.f32.mrf.mxu0  ;;  %v2195_v4 = vld [vmem:[#allocation18 + $0x9c0] sm:$0xff] }
 0x3cd   :  { %2559 = vmatpush.msra.mxu3 %v2073_v8  ;;  %2515 = vmatmul.f32.vlgmr.msrb.gmra.mxu2 %v4817_v49  ;;  %v2341_v8 = vld [vmem:[#allocation18 + $0xe50] sm:$0xff] }
 0x3ce   :  { %2543 = vmatpush.msra.mxu2 %v2033_v11  ;;  %v2379_v11 = vld [vmem:[#allocation18 + $0xf80] sm:$0xff] }
 0x3cf   :  { %2560 = vmatpush.msra.mxu3 %v2071_v43  ;;  %v2155_v43 = vld [vmem:[#allocation18 + $0x880] sm:$0xff] }
 0x3d0   :  { %2544 = vmatpush.msra.mxu2 %v2031_v38  ;;  %v2193_v38 = vld [vmem:[#allocation18 + $0x9b0] sm:$0xff] }
 0x3d1   :  { %2561 = vmatpush.msra.mxu3 %v2069_v34 }
 0x3d2   :  { %2545 = vmatpush.msra.mxu2 %v2029_v36  ;;  %v2339_v36 = vld [vmem:[#allocation18 + $0xe40] sm:$0xff] }
 0x3d3   :  { %2562 = vmatpush.msra.mxu3 %v2067_v3  ;;  %v4820_v59 = vpop.f32.mrf.mxu1  ;;  %v2377_v3 = vld [vmem:[#allocation18 + $0xf70] sm:$0xff] }
 0x3d4   :  { %2535 = vmatmul.f32.vlgmr.msrb.gmra.mxu3 %v4820_v59  ;;  %2546 = vmatpush.msra.mxu2 %v2027_v19  ;;  %v4823_v53 = vpop.f32.mrf.mxu0  ;;  %v2153_v19 = vld [vmem:[#allocation18 + $0x870] sm:$0xff] }
 0x3d5   :  { %2563 = vmatpush.msra.mxu3 %v2065_v44  ;;  %v2191_v44 = vld [vmem:[#allocation18 + $0x9a0] sm:$0xff] }
 0x3d6   :  { %2547 = vmatpush.msra.mxu2 %v2025_v61  ;;  %v2337_v61 = vld [vmem:[#allocation18 + $0xe30] sm:$0xff] }
 0x3d7   :  { %2564 = vmatpush.msra.mxu3 %v2063_v30  ;;  %v2375_v30 = vld [vmem:[#allocation18 + $0xf60] sm:$0xff] }
 0x3d8   :  { %2548 = vmatpush.msra.mxu2 %v2023_v27  ;;  %v2151_v27 = vld [vmem:[#allocation18 + $0x860] sm:$0xff] }
 0x3d9   :  { %2565 = vmatpush.msra.mxu3 %v2061_v16  ;;  %v2189_v16 = vld [vmem:[#allocation18 + $0x990] sm:$0xff] }
 0x3da   :  { %2549 = vmatpush.msra.mxu2 %v2021_v28  ;;  %v2335_v28 = vld [vmem:[#allocation18 + $0xe20] sm:$0xff] }
 0x3db   :  { %2566 = vmatpush.msra.mxu3 %v2059_v31  ;;  %v4825_v46 = vpop.f32.mrf.mxu1  ;;  %v2373_v31 = vld [vmem:[#allocation18 + $0xf50] sm:$0xff] }
 0x3dc   :  { %2550 = vmatpush.msra.mxu2 %v2019_v42  ;;  %v4827_v17 = vpop.f32.mrf.mxu0  ;;  %v2149_v42 = vld [vmem:[#allocation18 + $0x850] sm:$0xff] }
 0x3dd   :  { %2567 = vmatpush.msra.mxu3 %v2057_v29  ;;  %2595 = vmatmul.f32.vlgmr.msrb.gmra.mxu0 %v4827_v17  ;;  %v2187_v29 = vld [vmem:[#allocation18 + $0x980] sm:$0xff] }
 0x3de   :  { %2551 = vmatpush.msra.mxu2 %v2017_v33  ;;  %2739 = vmatpush.msrb.mxu0 %v2361_v20  ;;  %v2333_v33 = vld [vmem:[#allocation18 + $0xe10] sm:$0xff] }
 0x3df   :  { %2568 = vmatpush.msra.mxu3 %v2055_v13  ;;  %v2371_v13 = vld [vmem:[#allocation18 + $0xf40] sm:$0xff] }
 0x3e0   :  { %2552 = vmatpush.msra.mxu2 %v2015_v14  ;;  %2740 = vmatpush.msrb.mxu0 %v2359_v5  ;;  %v2147_v14 = vld [vmem:[#allocation18 + $0x840] sm:$0xff]  ;;  %v2185_v5 = vld [vmem:[#allocation18 + $0x970] sm:$0xff] }
 0x3e1   :  { %2569 = vmatpush.msra.mxu3 %v2053_v18  ;;  %v2331_v18 = vld [vmem:[#allocation18 + $0xe00] sm:$0xff] }
 0x3e2   :  { %2553 = vmatpush.msra.mxu2 %v2013_v47  ;;  %2741 = vmatpush.msrb.mxu0 %v2357_v63  ;;  %v2369_v47 = vld [vmem:[#allocation18 + $0xf30] sm:$0xff] }
 0x3e3   :  { %2570 = vmatpush.msra.mxu3 %v2051_v9  ;;  %v4830_v58 = vpop.f32.mrf.mxu1  ;;  %v2145_v63 = vld [vmem:[#allocation18 + $0x830] sm:$0xff] }
 0x3e4   :  { %2554 = vmatpush.msra.mxu2 %v2011_v21  ;;  %2615 = vmatmul.f32.vlgmr.msrb.gmra.mxu1 %v4830_v58  ;;  %v4835_v34 = vpop.f32.mrf.mxu0  ;;  %v2183_v21 = vld [vmem:[#allocation18 + $0x960] sm:$0xff] }
 0x3e5   :  { %2571 = vmatpush.msra.mxu3 %v2049_v56  ;;  %2742 = vmatpush.msrb.mxu0 %v2355_v0  ;;  %v1914_v56 = vld [vmem:[#allocation18 + $0xf8] sm:$0xff]  ;;  %v2367_v0 = vld [vmem:[#allocation18 + $0xf20] sm:$0xff] }
 0x3e6   :  { %2759 = vmatpush.msrb.mxu1 %v2393_v52  ;;  %2555 = vmatmul.f32.vlgmr.msra.gmra.mxu2 %v4823_v53  ;;  %v2143_v52 = vld [vmem:[#allocation18 + $0x820] sm:$0xff] }
 0x3e7   :  { %2619 = vmatpush.msrb.mxu2 %v2169_v37  ;;  %2572 = vmatpush.msra.mxu3 %v2047_v2  ;;  %v2181_v37 = vld [vmem:[#allocation18 + $0x950] sm:$0xff]  ;;  %v1912_v2 = vld [vmem:[#allocation18 + $0xe8] sm:$0xff] }
 0x3e8   :  { %2743 = vmatpush.msrb.mxu0 %v2353_v62  ;;  %2760 = vmatpush.msrb.mxu1 %v2391_v10  ;;  %v2365_v62 = vld [vmem:[#allocation18 + $0xf10] sm:$0xff] }
 0x3e9   :  { %2620 = vmatpush.msrb.mxu2 %v2167_v39  ;;  %2573 = vmatpush.msra.mxu3 %v2045_v26  ;;  %v2141_v10 = vld [vmem:[#allocation18 + $0x810] sm:$0xff]  ;;  %v2179_v39 = vld [vmem:[#allocation18 + $0x940] sm:$0xff]  ;;  %v1910_v26 = vld [vmem:[#allocation18 + $0xd8] sm:$0xff] }
 0x3ea   :  { %2744 = vmatpush.msrb.mxu0 %v2351_v7  ;;  %2761 = vmatpush.msrb.mxu1 %v2389_v25  ;;  %v2363_v7 = vld [vmem:[#allocation18 + $0xf00] sm:$0xff] }
 0x3eb   :  { %2621 = vmatpush.msrb.mxu2 %v2165_v12  ;;  %2574 = vmatpush.msra.mxu3 %v2043_v40  ;;  %v4837_v20 = vpop.f32.mrf.mxu1  ;;  %v2139_v25 = vld [vmem:[#allocation18 + $0x800] sm:$0xff]  ;;  %v2177_v12 = vld [vmem:[#allocation18 + $0x930] sm:$0xff] }
 0x3ec   :  { %2745 = vmatpush.msrb.mxu0 %v2349_v22  ;;  %2762 = vmatpush.msrb.mxu1 %v2387_v41  ;;  %v4839_v9 = vpop.f32.mrf.mxu0  ;;  %v1908_v22 = vld [vmem:[#allocation18 + $0xc8] sm:$0xff]  ;;  %v1946_v41 = vld [vmem:[#allocation18 + $0x1f8] sm:$0xff] }
 0x3ed   :  { %2575 = vmatmul.f32.vlgmr.msra.gmra.mxu3 %v4825_v46  ;;  %2622 = vmatpush.msrb.mxu2 %v2163_v15  ;;  %v2297_v15 = vld [vmem:[#allocation18 + $0xcf0] sm:$0xff] }
 0x3ee   :  { %2639 = vmatpush.msrb.mxu3 %v2201_v57  ;;  %2746 = vmatpush.msrb.mxu0 %v2347_v32  ;;  %v2175_v57 = vld [vmem:[#allocation18 + $0x920] sm:$0xff]  ;;  %v1906_v32 = vld [vmem:[#allocation18 + $0xb8] sm:$0xff] }
 0x3ef   :  { %2763 = vmatpush.msrb.mxu1 %v2385_v35  ;;  %2623 = vmatpush.msrb.mxu2 %v2161_v51  ;;  %v1944_v35 = vld [vmem:[#allocation18 + $0x1e8] sm:$0xff]  ;;  %v2295_v51 = vld [vmem:[#allocation18 + $0xce0] sm:$0xff] }
 0x3f0   :  { %2640 = vmatpush.msrb.mxu3 %v2199_v54  ;;  %2747 = vmatpush.msrb.mxu0 %v2345_v24  ;;  %v2173_v54 = vld [vmem:[#allocation18 + $0x910] sm:$0xff]  ;;  %v1904_v24 = vld [vmem:[#allocation18 + $0xa8] sm:$0xff] }
 0x3f1   :  { %2764 = vmatpush.msrb.mxu1 %v2383_v50  ;;  %2624 = vmatpush.msrb.mxu2 %v2159_v48  ;;  %v1942_v50 = vld [vmem:[#allocation18 + $0x1d8] sm:$0xff]  ;;  %v2293_v48 = vld [vmem:[#allocation18 + $0xcd0] sm:$0xff] }
 0x3f2   :  { %2641 = vmatpush.msrb.mxu3 %v2197_v60  ;;  %2748 = vmatpush.msrb.mxu0 %v2343_v55  ;;  %v2171_v60 = vld [vmem:[#allocation18 + $0x900] sm:$0xff]  ;;  %v1902_v55 = vld [vmem:[#allocation18 + $0x98] sm:$0xff] }
 0x3f3   :  { %2765 = vmatpush.msrb.mxu1 %v2381_v6  ;;  %2625 = vmatpush.msrb.mxu2 %v2157_v1  ;;  %v4842_v40 = vpop.f32.mrf.mxu1  ;;  %v1940_v6 = vld [vmem:[#allocation18 + $0x1c8] sm:$0xff]  ;;  %v2291_v1 = vld [vmem:[#allocation18 + $0xcc0] sm:$0xff] }
 0x3f4   :  { %2642 = vmatpush.msrb.mxu3 %v2195_v4  ;;  %2749 = vmatpush.msrb.mxu0 %v2341_v8  ;;  %v2329_v4 = vld [vmem:[#allocation18 + $0xdf0] sm:$0xff]  ;;  %v4846_v8 = vpop.f32.mrf.mxu0 }
 0x3f5   :  { %2766 = vmatpush.msrb.mxu1 %v2379_v11  ;;  %2626 = vmatpush.msrb.mxu2 %v2155_v43  ;;  %v1900_v11 = vld [vmem:[#allocation18 + $0x88] sm:$0xff]  ;;  %v1938_v43 = vld [vmem:[#allocation18 + $0x1b8] sm:$0xff] }
 0x3f6   :  { %2643 = vmatpush.msrb.mxu3 %v2193_v38  ;;  %2750 = vmatpush.msrb.mxu0 %v2339_v36  ;;  %v2289_v38 = vld [vmem:[#allocation18 + $0xcb0] sm:$0xff]  ;;  %v2327_v36 = vld [vmem:[#allocation18 + $0xde0] sm:$0xff] }
 0x3f7   :  { %2767 = vmatpush.msrb.mxu1 %v2377_v3  ;;  %2627 = vmatpush.msrb.mxu2 %v2153_v19  ;;  %v1898_v3 = vld [vmem:[#allocation18 + $0x78] sm:$0xff]  ;;  %v1936_v19 = vld [vmem:[#allocation18 + $0x1a8] sm:$0xff] }
 0x3f8   :  { %2644 = vmatpush.msrb.mxu3 %v2191_v44  ;;  %2751 = vmatpush.msrb.mxu0 %v2337_v61  ;;  %v2287_v44 = vld [vmem:[#allocation18 + $0xca0] sm:$0xff]  ;;  %v2325_v61 = vld [vmem:[#allocation18 + $0xdd0] sm:$0xff] }
 0x3f9   :  { %2768 = vmatpush.msrb.mxu1 %v2375_v30  ;;  %2628 = vmatpush.msrb.mxu2 %v2151_v27  ;;  %v1896_v30 = vld [vmem:[#allocation18 + $0x68] sm:$0xff]  ;;  %v1934_v27 = vld [vmem:[#allocation18 + $0x198] sm:$0xff] }
 0x3fa   :  { %2645 = vmatpush.msrb.mxu3 %v2189_v16  ;;  %2752 = vmatpush.msrb.mxu0 %v2335_v28  ;;  %v2285_v16 = vld [vmem:[#allocation18 + $0xc90] sm:$0xff]  ;;  %v2323_v28 = vld [vmem:[#allocation18 + $0xdc0] sm:$0xff] }
 0x3fb   :  { %2769 = vmatpush.msrb.mxu1 %v2373_v31  ;;  %2629 = vmatpush.msrb.mxu2 %v2149_v42  ;;  %v1894_v31 = vld [vmem:[#allocation18 + $0x58] sm:$0xff]  ;;  %v4849_v42 = vpop.f32.mrf.mxu1 }
 0x3fc   :  { %2646 = vmatpush.msrb.mxu3 %v2187_v29  ;;  %2753 = vmatpush.msrb.mxu0 %v2333_v33  ;;  %v1932_v29 = vld [vmem:[#allocation18 + $0x188] sm:$0xff]  ;;  %v2283_v33 = vld [vmem:[#allocation18 + $0xc80] sm:$0xff] }
 0x3fd   :  { %2770 = vmatpush.msrb.mxu1 %v2371_v13  ;;  %2630 = vmatpush.msrb.mxu2 %v2147_v14  ;;  %v2321_v13 = vld [vmem:[#allocation18 + $0xdb0] sm:$0xff]  ;;  %v1892_v14 = vld [vmem:[#allocation18 + $0x48] sm:$0xff] }
 0x3fe   :  { %2647 = vmatpush.msrb.mxu3 %v2185_v5  ;;  %2754 = vmatpush.msrb.mxu0 %v2331_v18  ;;  %v1930_v5 = vld [vmem:[#allocation18 + $0x178] sm:$0xff]  ;;  %v2281_v18 = vld [vmem:[#allocation18 + $0xc70] sm:$0xff] }
 0x3ff   :  { %2771 = vmatpush.msrb.mxu1 %v2369_v47  ;;  %2631 = vmatpush.msrb.mxu2 %v2145_v63  ;;  %v4851_v47 = vpop.f32.mrf.mxu0  ;;  %v2319_v63 = vld [vmem:[#allocation18 + $0xda0] sm:$0xff] }
 0x400   :  { %2648 = vmatpush.msrb.mxu3 %v2183_v21  ;;  %2675 = vmatmul.f32.vlgmr.msra.gmra.mxu0 %v4839_v9  ;;  %v1890_v21 = vld [vmem:[#allocation18 + $0x38] sm:$0xff] }
 0x401   :  { %2819 = vmatpush.msra.mxu0 %v1914_v56  ;;  %2772 = vmatpush.msrb.mxu1 %v2367_v0  ;;  %v1928_v56 = vld [vmem:[#allocation18 + $0x168] sm:$0xff]  ;;  %v2279_v0 = vld [vmem:[#allocation18 + $0xc60] sm:$0xff] }
 0x402   :  { %2632 = vmatpush.msrb.mxu2 %v2143_v52  ;;  %2649 = vmatpush.msrb.mxu3 %v2181_v37  ;;  %v2317_v52 = vld [vmem:[#allocation18 + $0xd90] sm:$0xff]  ;;  %v1888_v37 = vld [vmem:[#allocation18 + $0x28] sm:$0xff] }
 0x403   :  { %2820 = vmatpush.msra.mxu0 %v1912_v2  ;;  %2773 = vmatpush.msrb.mxu1 %v2365_v62  ;;  %v1926_v2 = vld [vmem:[#allocation18 + $0x158] sm:$0xff]  ;;  %v2277_v62 = vld [vmem:[#allocation18 + $0xc50] sm:$0xff] }
 0x404   :  { %2633 = vmatpush.msrb.mxu2 %v2141_v10  ;;  %2650 = vmatpush.msrb.mxu3 %v2179_v39  ;;  %v2315_v10 = vld [vmem:[#allocation18 + $0xd80] sm:$0xff]  ;;  %v1886_v39 = vld [vmem:[#allocation18 + $0x18] sm:$0xff] }
 0x405   :  { %2821 = vmatpush.msra.mxu0 %v1910_v26  ;;  %2774 = vmatpush.msrb.mxu1 %v2363_v7  ;;  %v1924_v26 = vld [vmem:[#allocation18 + $0x148] sm:$0xff]  ;;  %v2275_v7 = vld [vmem:[#allocation18 + $0xc40] sm:$0xff] }
 0x406   :  { %2634 = vmatpush.msrb.mxu2 %v2139_v25  ;;  %2651 = vmatpush.msrb.mxu3 %v2177_v12  ;;  %v2313_v25 = vld [vmem:[#allocation18 + $0xd70] sm:$0xff]  ;;  %v4854_v12 = vpop.f32.mrf.mxu1 }
 0x407   :  { %2695 = vmatmul.f32.vlgmr.msra.gmra.mxu1 %v4842_v40  ;;  %2822 = vmatpush.msra.mxu0 %v1908_v22  ;;  %v1884_v22 = vld [vmem:[#allocation18 + $0x8] sm:$0xff] }
 0x408   :  { %2839 = vmatpush.msra.mxu1 %v1946_v41  ;;  %2635 = vmatmul.f32.vlgmr.msrb.gmra.mxu2 %v4835_v34  ;;  %v1922_v41 = vld [vmem:[#allocation18 + $0x138] sm:$0xff] }
 0x409   :  { %2699 = vmatpush.msra.mxu2 %v2297_v15  ;;  %2652 = vmatpush.msrb.mxu3 %v2175_v57  ;;  %v2273_v15 = vld [vmem:[#allocation18 + $0xc30] sm:$0xff]  ;;  %v2311_v57 = vld [vmem:[#allocation18 + $0xd60] sm:$0xff] }
 0x40a   :  { %2823 = vmatpush.msra.mxu0 %v1906_v32  ;;  %2840 = vmatpush.msra.mxu1 %v1944_v35  ;;  %v2042_v32 = vld [vmem:[#allocation18 + $0x4f8] sm:$0xff]  ;;  %v1920_v35 = vld [vmem:[#allocation18 + $0x128] sm:$0xff] }
 0x40b   :  { %2700 = vmatpush.msra.mxu2 %v2295_v51  ;;  %2653 = vmatpush.msrb.mxu3 %v2173_v54  ;;  %v2271_v51 = vld [vmem:[#allocation18 + $0xc20] sm:$0xff]  ;;  %v2309_v54 = vld [vmem:[#allocation18 + $0xd50] sm:$0xff] }
 0x40c   :  { %2824 = vmatpush.msra.mxu0 %v1904_v24  ;;  %2841 = vmatpush.msra.mxu1 %v1942_v50  ;;  %v2040_v24 = vld [vmem:[#allocation18 + $0x4e8] sm:$0xff]  ;;  %v1918_v50 = vld [vmem:[#allocation18 + $0x118] sm:$0xff] }
 0x40d   :  { %2701 = vmatpush.msra.mxu2 %v2293_v48  ;;  %2654 = vmatpush.msrb.mxu3 %v2171_v60  ;;  %v2269_v48 = vld [vmem:[#allocation18 + $0xc10] sm:$0xff]  ;;  %v2307_v60 = vld [vmem:[#allocation18 + $0xd40] sm:$0xff] }
 0x40e   :  { %2825 = vmatpush.msra.mxu0 %v1902_v55  ;;  %2842 = vmatpush.msra.mxu1 %v1940_v6  ;;  %v2038_v55 = vld [vmem:[#allocation18 + $0x4d8] sm:$0xff]  ;;  %v1916_v6 = vld [vmem:[#allocation18 + $0x108] sm:$0xff] }
 0x40f   :  { %2655 = vmatmul.f32.vlgmr.msrb.gmra.mxu3 %v4837_v20  ;;  %2702 = vmatpush.msra.mxu2 %v2291_v1  ;;  %v2267_v1 = vld [vmem:[#allocation18 + $0xc00] sm:$0xff] }
 0x410   :  { %2719 = vmatpush.msra.mxu3 %v2329_v4  ;;  %2826 = vmatpush.msra.mxu0 %v1900_v11  ;;  %v2305_v4 = vld [vmem:[#allocation18 + $0xd30] sm:$0xff]  ;;  %v2036_v11 = vld [vmem:[#allocation18 + $0x4c8] sm:$0xff] }
 0x411   :  { %2843 = vmatpush.msra.mxu1 %v1938_v43  ;;  %2703 = vmatpush.msra.mxu2 %v2289_v38  ;;  %v2425_v43 = vld [vmem:[#allocation18 + $0x10f0] sm:$0xff]  ;;  %v2303_v38 = vld [vmem:[#allocation18 + $0xd20] sm:$0xff] }
 0x412   :  { %2720 = vmatpush.msra.mxu3 %v2327_v36  ;;  %2827 = vmatpush.msra.mxu0 %v1898_v3  ;;  %v2034_v36 = vld [vmem:[#allocation18 + $0x4b8] sm:$0xff]  ;;  %v2072_v3 = vld [vmem:[#allocation18 + $0x5e8] sm:$0xff] }
 0x413   :  { %2844 = vmatpush.msra.mxu1 %v1936_v19  ;;  %2704 = vmatpush.msra.mxu2 %v2287_v44  ;;  %v2423_v19 = vld [vmem:[#allocation18 + $0x10e0] sm:$0xff]  ;;  %v2301_v44 = vld [vmem:[#allocation18 + $0xd10] sm:$0xff] }
 0x414   :  { %2721 = vmatpush.msra.mxu3 %v2325_v61  ;;  %2828 = vmatpush.msra.mxu0 %v1896_v30  ;;  %v2032_v61 = vld [vmem:[#allocation18 + $0x4a8] sm:$0xff]  ;;  %v2070_v30 = vld [vmem:[#allocation18 + $0x5d8] sm:$0xff] }
 0x415   :  { %2845 = vmatpush.msra.mxu1 %v1934_v27  ;;  %2705 = vmatpush.msra.mxu2 %v2285_v16  ;;  %v2421_v27 = vld [vmem:[#allocation18 + $0x10d0] sm:$0xff]  ;;  %v2299_v16 = vld [vmem:[#allocation18 + $0xd00] sm:$0xff] }
 0x416   :  { %2722 = vmatpush.msra.mxu3 %v2323_v28  ;;  %2829 = vmatpush.msra.mxu0 %v1894_v31  ;;  %v2030_v28 = vld [vmem:[#allocation18 + $0x498] sm:$0xff]  ;;  %v2419_v31 = vld [vmem:[#allocation18 + $0x10c0] sm:$0xff] }
 0x417   :  { %2846 = vmatpush.msra.mxu1 %v1932_v29  ;;  %2706 = vmatpush.msra.mxu2 %v2283_v33  ;;  %v2457_v29 = vld [vmem:[#allocation18 + $0x11f0] sm:$0xff]  ;;  %v2028_v33 = vld [vmem:[#allocation18 + $0x488] sm:$0xff] }
 0x418   :  { %2723 = vmatpush.msra.mxu3 %v2321_v13  ;;  %2830 = vmatpush.msra.mxu0 %v1892_v14  ;;  %v2066_v13 = vld [vmem:[#allocation18 + $0x5b8] sm:$0xff]  ;;  %v2417_v14 = vld [vmem:[#allocation18 + $0x10b0] sm:$0xff] }
 0x419   :  { %2847 = vmatpush.msra.mxu1 %v1930_v5  ;;  %2707 = vmatpush.msra.mxu2 %v2281_v18  ;;  %v2455_v5 = vld [vmem:[#allocation18 + $0x11e0] sm:$0xff]  ;;  %v2026_v18 = vld [vmem:[#allocation18 + $0x478] sm:$0xff] }
 0x41a   :  { %2724 = vmatpush.msra.mxu3 %v2319_v63  ;;  %2755 = vmatmul.f32.vlgmr.msrb.gmra.mxu0 %v4851_v47  ;;  %v2064_v63 = vld [vmem:[#allocation18 + $0x5a8] sm:$0xff] }
 0x41b   :  { %2831 = vmatpush.msra.mxu0 %v1890_v21  ;;  %2848 = vmatpush.msra.mxu1 %v1928_v56  ;;  %v2415_v21 = vld [vmem:[#allocation18 + $0x10a0] sm:$0xff]  ;;  %v2453_v56 = vld [vmem:[#allocation18 + $0x11d0] sm:$0xff] }
 0x41c   :  { %2708 = vmatpush.msra.mxu2 %v2279_v0  ;;  %2725 = vmatpush.msra.mxu3 %v2317_v52  ;;  %v2024_v0 = vld [vmem:[#allocation18 + $0x468] sm:$0xff]  ;;  %v2062_v52 = vld [vmem:[#allocation18 + $0x598] sm:$0xff] }
 0x41d   :  { %2832 = vmatpush.msra.mxu0 %v1888_v37  ;;  %2849 = vmatpush.msra.mxu1 %v1926_v2  ;;  %v2413_v37 = vld [vmem:[#allocation18 + $0x1090] sm:$0xff]  ;;  %v2451_v2 = vld [vmem:[#allocation18 + $0x11c0] sm:$0xff] }
 0x41e   :  { %2709 = vmatpush.msra.mxu2 %v2277_v62  ;;  %2726 = vmatpush.msra.mxu3 %v2315_v10  ;;  %v2022_v62 = vld [vmem:[#allocation18 + $0x458] sm:$0xff]  ;;  %v2060_v10 = vld [vmem:[#allocation18 + $0x588] sm:$0xff] }
 0x41f   :  { %2833 = vmatpush.msra.mxu0 %v1886_v39  ;;  %2850 = vmatpush.msra.mxu1 %v1924_v26  ;;  %v2411_v39 = vld [vmem:[#allocation18 + $0x1080] sm:$0xff]  ;;  %v2449_v26 = vld [vmem:[#allocation18 + $0x11b0] sm:$0xff] }
 0x420   :  { %2710 = vmatpush.msra.mxu2 %v2275_v7  ;;  %2727 = vmatpush.msra.mxu3 %v2313_v25  ;;  %v2020_v7 = vld [vmem:[#allocation18 + $0x448] sm:$0xff]  ;;  %v2058_v25 = vld [vmem:[#allocation18 + $0x578] sm:$0xff] }
 0x421   :  { %2775 = vmatmul.f32.vlgmr.msrb.gmra.mxu1 %v4854_v12  ;;  %2834 = vmatpush.msra.mxu0 %v1884_v22  ;;  %v2409_v22 = vld [vmem:[#allocation18 + $0x1070] sm:$0xff] }
 0x422   :  { %2851 = vmatpush.msra.mxu1 %v1922_v41  ;;  %2711 = vmatpush.msra.mxu2 %v2273_v15  ;;  %v2447_v41 = vld [vmem:[#allocation18 + $0x11a0] sm:$0xff]  ;;  %v2018_v15 = vld [vmem:[#allocation18 + $0x438] sm:$0xff] }
 0x423   :  { %2728 = vmatpush.msra.mxu3 %v2311_v57  ;;  %2835 = vmatmul.f32.vlgmr.msra.gmra.mxu0 %v4811_v23  ;;  %v2074_v23 = vld [vmem:[#allocation18 + $0x5f8] sm:$0xff]  ;;  %v2056_v57 = vld [vmem:[#allocation18 + $0x568] sm:$0xff] }
 0x424   :  { %2899 = vmatpush.msrb.mxu0 %v2042_v32  ;;  %2852 = vmatpush.msra.mxu1 %v1920_v35  ;;  %v2407_v32 = vld [vmem:[#allocation18 + $0x1060] sm:$0xff]  ;;  %v2445_v35 = vld [vmem:[#allocation18 + $0x1190] sm:$0xff] }
 0x425   :  { %2712 = vmatpush.msra.mxu2 %v2271_v51  ;;  %2729 = vmatpush.msra.mxu3 %v2309_v54  ;;  %v2016_v51 = vld [vmem:[#allocation18 + $0x428] sm:$0xff]  ;;  %v2054_v54 = vld [vmem:[#allocation18 + $0x558] sm:$0xff] }
 0x426   :  { %2900 = vmatpush.msrb.mxu0 %v2040_v24  ;;  %2853 = vmatpush.msra.mxu1 %v1918_v50  ;;  %v2405_v24 = vld [vmem:[#allocation18 + $0x1050] sm:$0xff]  ;;  %v2443_v50 = vld [vmem:[#allocation18 + $0x1180] sm:$0xff] }
 0x427   :  { %2713 = vmatpush.msra.mxu2 %v2269_v48  ;;  %2730 = vmatpush.msra.mxu3 %v2307_v60  ;;  %v2014_v48 = vld [vmem:[#allocation18 + $0x418] sm:$0xff]  ;;  %v2052_v60 = vld [vmem:[#allocation18 + $0x548] sm:$0xff] }
 0x428   :  { %2901 = vmatpush.msrb.mxu0 %v2038_v55  ;;  %2854 = vmatpush.msra.mxu1 %v1916_v6  ;;  %v2403_v55 = vld [vmem:[#allocation18 + $0x1040] sm:$0xff]  ;;  %v2441_v6 = vld [vmem:[#allocation18 + $0x1170] sm:$0xff] }
 0x429   :  { %2714 = vmatpush.msra.mxu2 %v2267_v1  ;;  %2731 = vmatpush.msra.mxu3 %v2305_v4  ;;  %v2012_v1 = vld [vmem:[#allocation18 + $0x408] sm:$0xff]  ;;  %v2050_v4 = vld [vmem:[#allocation18 + $0x538] sm:$0xff] }
 0x42a   :  { %2855 = vmatmul.f32.vlgmr.msra.gmra.mxu1 %v4814_v45  ;;  %2902 = vmatpush.msrb.mxu0 %v2036_v11  ;;  %v2068_v45 = vld [vmem:[#allocation18 + $0x5c8] sm:$0xff]  ;;  %v2401_v11 = vld [vmem:[#allocation18 + $0x1030] sm:$0xff] }
 0x42b   :  { %2919 = vmatpush.msrb.mxu1 %v2074_v23  ;;  %2715 = vmatmul.f32.vlgmr.msra.gmra.mxu2 %v4846_v8  ;;  %v2439_v23 = vld [vmem:[#allocation18 + $0x1160] sm:$0xff] }
 0x42c   :  { %2779 = vmatpush.msrb.mxu2 %v2425_v43  ;;  %2732 = vmatpush.msra.mxu3 %v2303_v38  ;;  %v2170_v43 = vld [vmem:[#allocation18 + $0x8f8] sm:$0xff]  ;;  %v2048_v38 = vld [vmem:[#allocation18 + $0x528] sm:$0xff] }
 0x42d   :  { %2903 = vmatpush.msrb.mxu0 %v2034_v36  ;;  %2920 = vmatpush.msrb.mxu1 %v2072_v3  ;;  %v2399_v36 = vld [vmem:[#allocation18 + $0x1020] sm:$0xff]  ;;  %v2437_v3 = vld [vmem:[#allocation18 + $0x1150] sm:$0xff] }
 0x42e   :  { %2780 = vmatpush.msrb.mxu2 %v2423_v19  ;;  %2733 = vmatpush.msra.mxu3 %v2301_v44  ;;  %v2168_v19 = vld [vmem:[#allocation18 + $0x8e8] sm:$0xff]  ;;  %v2046_v44 = vld [vmem:[#allocation18 + $0x518] sm:$0xff] }
 0x42f   :  { %2904 = vmatpush.msrb.mxu0 %v2032_v61  ;;  %2921 = vmatpush.msrb.mxu1 %v2070_v30  ;;  %v2397_v61 = vld [vmem:[#allocation18 + $0x1010] sm:$0xff]  ;;  %v2435_v30 = vld [vmem:[#allocation18 + $0x1140] sm:$0xff] }
 0x430   :  { %2781 = vmatpush.msrb.mxu2 %v2421_v27  ;;  %2734 = vmatpush.msra.mxu3 %v2299_v16  ;;  %v2166_v27 = vld [vmem:[#allocation18 + $0x8d8] sm:$0xff]  ;;  %v2044_v16 = vld [vmem:[#allocation18 + $0x508] sm:$0xff] }
 0x431   :  { %2905 = vmatpush.msrb.mxu0 %v2030_v28  ;;  %2922 = vmatpush.msrb.mxu1 %v2068_v45  ;;  %v2395_v28 = vld [vmem:[#allocation18 + $0x1000] sm:$0xff]  ;;  %v2433_v45 = vld [vmem:[#allocation18 + $0x1130] sm:$0xff] }
 0x432   :  { %2735 = vmatmul.f32.vlgmr.msra.gmra.mxu3 %v4849_v42  ;;  %2782 = vmatpush.msrb.mxu2 %v2419_v31  ;;  %v2164_v31 = vld [vmem:[#allocation18 + $0x8c8] sm:$0xff] }
 0x433   :  { %2799 = vmatpush.msrb.mxu3 %v2457_v29  ;;  %2906 = vmatpush.msrb.mxu0 %v2028_v33  ;;  %v2202_v29 = vld [vmem:[#allocation18 + $0x9f8] sm:$0xff] }
 0x434   :  { %2923 = vmatpush.msrb.mxu1 %v2066_v13  ;;  %2783 = vmatpush.msrb.mxu2 %v2417_v14  ;;  %v1978_v33 = vld [vmem:[#allocation18 + $0x2f8] sm:$0xff]  ;;  %v2431_v13 = vld [vmem:[#allocation18 + $0x1120] sm:$0xff] }
 0x435   :  { %2800 = vmatpush.msrb.mxu3 %v2455_v5  ;;  %2907 = vmatpush.msrb.mxu0 %v2026_v18  ;;  %v2162_v14 = vld [vmem:[#allocation18 + $0x8b8] sm:$0xff]  ;;  %v2200_v5 = vld [vmem:[#allocation18 + $0x9e8] sm:$0xff] }
 0x436   :  { %2924 = vmatpush.msrb.mxu1 %v2064_v63  ;;  %2784 = vmatpush.msrb.mxu2 %v2415_v21  ;;  %v1976_v18 = vld [vmem:[#allocation18 + $0x2e8] sm:$0xff]  ;;  %v2429_v63 = vld [vmem:[#allocation18 + $0x1110] sm:$0xff] }
 0x437   :  { %2801 = vmatpush.msrb.mxu3 %v2453_v56  ;;  %2908 = vmatpush.msrb.mxu0 %v2024_v0  ;;  %v2160_v21 = vld [vmem:[#allocation18 + $0x8a8] sm:$0xff]  ;;  %v2198_v56 = vld [vmem:[#allocation18 + $0x9d8] sm:$0xff] }
 0x438   :  { %2925 = vmatpush.msrb.mxu1 %v2062_v52  ;;  %2785 = vmatpush.msrb.mxu2 %v2413_v37  ;;  %v1974_v0 = vld [vmem:[#allocation18 + $0x2d8] sm:$0xff]  ;;  %v2427_v52 = vld [vmem:[#allocation18 + $0x1100] sm:$0xff] }
 0x439   :  { %2802 = vmatpush.msrb.mxu3 %v2451_v2  ;;  %2909 = vmatpush.msrb.mxu0 %v2022_v62  ;;  %v2158_v37 = vld [vmem:[#allocation18 + $0x898] sm:$0xff]  ;;  %v4866_v2 = vpop.f32.mrf.mxu1  ;;  %v1972_v62 = vld [vmem:[#allocation18 + $0x2c8] sm:$0xff] }
 0x43a   :  { %2926 = vmatpush.msrb.mxu1 %v2060_v10  ;;  %2786 = vmatpush.msrb.mxu2 %v2411_v39  ;;  %v2010_v10 = vld [vmem:[#allocation18 + $0x3f8] sm:$0xff]  ;;  %v2156_v39 = vld [vmem:[#allocation18 + $0x888] sm:$0xff] }
 0x43b   :  { %2803 = vmatpush.msrb.mxu3 %v2449_v26  ;;  %2910 = vmatpush.msrb.mxu0 %v2020_v7  ;;  %v2194_v26 = vld [vmem:[#allocation18 + $0x9b8] sm:$0xff] }
 0x43c   :  { %2927 = vmatpush.msrb.mxu1 %v2058_v25  ;;  %2787 = vmatpush.msrb.mxu2 %v2409_v22  ;;  %v1970_v7 = vld [vmem:[#allocation18 + $0x2b8] sm:$0xff]  ;;  %v2008_v25 = vld [vmem:[#allocation18 + $0x3e8] sm:$0xff] }
 0x43d   :  { %2804 = vmatpush.msrb.mxu3 %v2447_v41  ;;  %2911 = vmatpush.msrb.mxu0 %v2018_v15  ;;  %v2154_v22 = vld [vmem:[#allocation18 + $0x878] sm:$0xff]  ;;  %v2192_v41 = vld [vmem:[#allocation18 + $0x9a8] sm:$0xff] }
 0x43e   :  { %2928 = vmatpush.msrb.mxu1 %v2056_v57  ;;  %2788 = vmatpush.msrb.mxu2 %v2407_v32  ;;  %v1968_v15 = vld [vmem:[#allocation18 + $0x2a8] sm:$0xff]  ;;  %v2006_v57 = vld [vmem:[#allocation18 + $0x3d8] sm:$0xff] }
 0x43f   :  { %2805 = vmatpush.msrb.mxu3 %v2445_v35  ;;  %2912 = vmatpush.msrb.mxu0 %v2016_v51  ;;  %v2152_v32 = vld [vmem:[#allocation18 + $0x868] sm:$0xff]  ;;  %v2190_v35 = vld [vmem:[#allocation18 + $0x998] sm:$0xff] }
 0x440   :  { %2929 = vmatpush.msrb.mxu1 %v2054_v54  ;;  %2789 = vmatpush.msrb.mxu2 %v2405_v24  ;;  %v1966_v51 = vld [vmem:[#allocation18 + $0x298] sm:$0xff]  ;;  %v2004_v54 = vld [vmem:[#allocation18 + $0x3c8] sm:$0xff] }
 0x441   :  { %2806 = vmatpush.msrb.mxu3 %v2443_v50  ;;  %2913 = vmatpush.msrb.mxu0 %v2014_v48  ;;  %v2150_v24 = vld [vmem:[#allocation18 + $0x858] sm:$0xff]  ;;  %v2188_v50 = vld [vmem:[#allocation18 + $0x988] sm:$0xff] }
 0x442   :  { %2930 = vmatpush.msrb.mxu1 %v2052_v60  ;;  %2790 = vmatpush.msrb.mxu2 %v2403_v55  ;;  %v1964_v48 = vld [vmem:[#allocation18 + $0x288] sm:$0xff]  ;;  %v2002_v60 = vld [vmem:[#allocation18 + $0x3b8] sm:$0xff] }
 0x443   :  { %2807 = vmatpush.msrb.mxu3 %v2441_v6  ;;  %2914 = vmatpush.msrb.mxu0 %v2012_v1  ;;  %v2148_v55 = vld [vmem:[#allocation18 + $0x848] sm:$0xff]  ;;  %v2186_v6 = vld [vmem:[#allocation18 + $0x978] sm:$0xff] }
 0x444   :  { %2931 = vmatpush.msrb.mxu1 %v2050_v4  ;;  %2791 = vmatpush.msrb.mxu2 %v2401_v11  ;;  %v1962_v1 = vld [vmem:[#allocation18 + $0x278] sm:$0xff]  ;;  %v2000_v4 = vld [vmem:[#allocation18 + $0x3a8] sm:$0xff] }
 0x445   :  { %2808 = vmatpush.msrb.mxu3 %v2439_v23  ;;  %2915 = vmatmul.f32.vlgmr.msrb.gmra.mxu0 %v4823_v53  ;;  %v4862_v53 = vpop.f32.mrf.mxu0  ;;  %v2146_v11 = vld [vmem:[#allocation18 + $0x838] sm:$0xff]  ;;  %v2184_v23 = vld [vmem:[#allocation18 + $0x968] sm:$0xff] }
 0x446   :  { %2979 = vmatpush.msra.mxu0 %v2170_v43  ;;  %2932 = vmatpush.msrb.mxu1 %v2048_v38  ;;  %v1960_v43 = vld [vmem:[#allocation18 + $0x268] sm:$0xff]  ;;  %v1998_v38 = vld [vmem:[#allocation18 + $0x398] sm:$0xff] }
 0x447   :  { %2792 = vmatpush.msrb.mxu2 %v2399_v36  ;;  %2809 = vmatpush.msrb.mxu3 %v2437_v3  ;;  %v2144_v36 = vld [vmem:[#allocation18 + $0x828] sm:$0xff]  ;;  %v2182_v3 = vld [vmem:[#allocation18 + $0x958] sm:$0xff] }
 0x448   :  { %2980 = vmatpush.msra.mxu0 %v2168_v19  ;;  %2933 = vmatpush.msrb.mxu1 %v2046_v44  ;;  %v1958_v19 = vld [vmem:[#allocation18 + $0x258] sm:$0xff]  ;;  %v1996_v44 = vld [vmem:[#allocation18 + $0x388] sm:$0xff] }
 0x449   :  { %2793 = vmatpush.msrb.mxu2 %v2397_v61  ;;  %2810 = vmatpush.msrb.mxu3 %v2435_v30  ;;  %v2142_v61 = vld [vmem:[#allocation18 + $0x818] sm:$0xff]  ;;  %v2180_v30 = vld [vmem:[#allocation18 + $0x948] sm:$0xff] }
 0x44a   :  { %2981 = vmatpush.msra.mxu0 %v2166_v27  ;;  %2934 = vmatpush.msrb.mxu1 %v2044_v16  ;;  %v1956_v27 = vld [vmem:[#allocation18 + $0x248] sm:$0xff]  ;;  %v1994_v16 = vld [vmem:[#allocation18 + $0x378] sm:$0xff] }
 0x44b   :  { %2794 = vmatpush.msrb.mxu2 %v2395_v28  ;;  %2811 = vmatpush.msrb.mxu3 %v2433_v45  ;;  %v2140_v28 = vld [vmem:[#allocation18 + $0x808] sm:$0xff]  ;;  %v2178_v45 = vld [vmem:[#allocation18 + $0x938] sm:$0xff] }
 0x44c   :  { %2935 = vmatmul.f32.vlgmr.msrb.gmra.mxu1 %v4825_v46  ;;  %2982 = vmatpush.msra.mxu0 %v2164_v31  ;;  %v2196_v46 = vld [vmem:[#allocation18 + $0x9c8] sm:$0xff]  ;;  %v1954_v31 = vld [vmem:[#allocation18 + $0x238] sm:$0xff] }
 0x44d   :  { %2999 = vmatpush.msra.mxu1 %v2202_v29  ;;  %2795 = vmatmul.f32.vlgmr.msrb.gmra.mxu2 %v4862_v53  ;;  %v1992_v29 = vld [vmem:[#allocation18 + $0x368] sm:$0xff] }
 0x44e   :  { %2859 = vmatpush.msra.mxu2 %v1978_v33  ;;  %2812 = vmatpush.msrb.mxu3 %v2431_v13  ;;  %v2298_v33 = vld [vmem:[#allocation18 + $0xcf8] sm:$0xff]  ;;  %v2176_v13 = vld [vmem:[#allocation18 + $0x928] sm:$0xff] }
 0x44f   :  { %2983 = vmatpush.msra.mxu0 %v2162_v14  ;;  %3000 = vmatpush.msra.mxu1 %v2200_v5  ;;  %v1952_v14 = vld [vmem:[#allocation18 + $0x228] sm:$0xff]  ;;  %v1990_v5 = vld [vmem:[#allocation18 + $0x358] sm:$0xff] }
 0x450   :  { %2860 = vmatpush.msra.mxu2 %v1976_v18  ;;  %2813 = vmatpush.msrb.mxu3 %v2429_v63  ;;  %v2296_v18 = vld [vmem:[#allocation18 + $0xce8] sm:$0xff]  ;;  %v2174_v63 = vld [vmem:[#allocation18 + $0x918] sm:$0xff] }
 0x451   :  { %2984 = vmatpush.msra.mxu0 %v2160_v21  ;;  %3001 = vmatpush.msra.mxu1 %v2198_v56  ;;  %v1950_v21 = vld [vmem:[#allocation18 + $0x218] sm:$0xff]  ;;  %v1988_v56 = vld [vmem:[#allocation18 + $0x348] sm:$0xff] }
 0x452   :  { %2861 = vmatpush.msra.mxu2 %v1974_v0  ;;  %2814 = vmatpush.msrb.mxu3 %v2427_v52  ;;  %v2294_v0 = vld [vmem:[#allocation18 + $0xcd8] sm:$0xff]  ;;  %v2172_v52 = vld [vmem:[#allocation18 + $0x908] sm:$0xff] }
 0x453   :  { %2985 = vmatpush.msra.mxu0 %v2158_v37  ;;  %3002 = vmatpush.msra.mxu1 %v2196_v46  ;;  %v1948_v37 = vld [vmem:[#allocation18 + $0x208] sm:$0xff]  ;;  %v1986_v46 = vld [vmem:[#allocation18 + $0x338] sm:$0xff] }
 0x454   :  { %2815 = vmatmul.f32.vlgmr.msrb.gmra.mxu3 %v4866_v2  ;;  %2862 = vmatpush.msra.mxu2 %v1972_v62  ;;  %v2292_v62 = vld [vmem:[#allocation18 + $0xcc8] sm:$0xff] }
 0x455   :  { %2879 = vmatpush.msra.mxu3 %v2010_v10  ;;  %2986 = vmatpush.msra.mxu0 %v2156_v39  ;;  %v2106_v10 = vld [vmem:[#allocation18 + $0x6f8] sm:$0xff]  ;;  %v1984_v39 = vld [vmem:[#allocation18 + $0x328] sm:$0xff] }
 0x456   :  { %3003 = vmatpush.msra.mxu1 %v2194_v26  ;;  %2863 = vmatpush.msra.mxu2 %v1970_v7  ;;  %v2290_v26 = vld [vmem:[#allocation18 + $0xcb8] sm:$0xff]  ;;  %v2328_v7 = vld [vmem:[#allocation18 + $0xde8] sm:$0xff] }
 0x457   :  { %2880 = vmatpush.msra.mxu3 %v2008_v25  ;;  %2987 = vmatpush.msra.mxu0 %v2154_v22  ;;  %v2104_v25 = vld [vmem:[#allocation18 + $0x6e8] sm:$0xff]  ;;  %v1982_v22 = vld [vmem:[#allocation18 + $0x318] sm:$0xff] }
 0x458   :  { %3004 = vmatpush.msra.mxu1 %v2192_v41  ;;  %2864 = vmatpush.msra.mxu2 %v1968_v15  ;;  %v2288_v41 = vld [vmem:[#allocation18 + $0xca8] sm:$0xff]  ;;  %v2326_v15 = vld [vmem:[#allocation18 + $0xdd8] sm:$0xff] }
 0x459   :  { %2881 = vmatpush.msra.mxu3 %v2006_v57  ;;  %2988 = vmatpush.msra.mxu0 %v2152_v32  ;;  %v2102_v57 = vld [vmem:[#allocation18 + $0x6d8] sm:$0xff]  ;;  %v1980_v32 = vld [vmem:[#allocation18 + $0x308] sm:$0xff] }
 0x45a   :  { %3005 = vmatpush.msra.mxu1 %v2190_v35  ;;  %2865 = vmatpush.msra.mxu2 %v1966_v51  ;;  %v2286_v35 = vld [vmem:[#allocation18 + $0xc98] sm:$0xff]  ;;  %v2100_v51 = vld [vmem:[#allocation18 + $0x6c8] sm:$0xff] }
 0x45b   :  { %2882 = vmatpush.msra.mxu3 %v2004_v54  ;;  %2989 = vmatpush.msra.mxu0 %v2150_v24  ;;  %v2284_v54 = vld [vmem:[#allocation18 + $0xc88] sm:$0xff]  ;;  %v2322_v24 = vld [vmem:[#allocation18 + $0xdb8] sm:$0xff] }
 0x45c   :  { %3006 = vmatpush.msra.mxu1 %v2188_v50  ;;  %2866 = vmatpush.msra.mxu2 %v1964_v48  ;;  %v2098_v50 = vld [vmem:[#allocation18 + $0x6b8] sm:$0xff]  ;;  %v2136_v48 = vld [vmem:[#allocation18 + $0x7e8] sm:$0xff] }
 0x45d   :  { %2883 = vmatpush.msra.mxu3 %v2002_v60  ;;  %2990 = vmatpush.msra.mxu0 %v2148_v55  ;;  %v2282_v60 = vld [vmem:[#allocation18 + $0xc78] sm:$0xff]  ;;  %v2320_v55 = vld [vmem:[#allocation18 + $0xda8] sm:$0xff] }
 0x45e   :  { %3007 = vmatpush.msra.mxu1 %v2186_v6  ;;  %2867 = vmatpush.msra.mxu2 %v1962_v1  ;;  %v2096_v6 = vld [vmem:[#allocation18 + $0x6a8] sm:$0xff]  ;;  %v2134_v1 = vld [vmem:[#allocation18 + $0x7d8] sm:$0xff] }
 0x45f   :  { %2884 = vmatpush.msra.mxu3 %v2000_v4  ;;  %2991 = vmatpush.msra.mxu0 %v2146_v11  ;;  %v2280_v4 = vld [vmem:[#allocation18 + $0xc68] sm:$0xff]  ;;  %v2318_v11 = vld [vmem:[#allocation18 + $0xd98] sm:$0xff] }
 0x460   :  { %3008 = vmatpush.msra.mxu1 %v2184_v23  ;;  %2868 = vmatpush.msra.mxu2 %v1960_v43  ;;  %v2094_v23 = vld [vmem:[#allocation18 + $0x698] sm:$0xff]  ;;  %v2132_v43 = vld [vmem:[#allocation18 + $0x7c8] sm:$0xff] }
 0x461   :  { %2885 = vmatpush.msra.mxu3 %v1998_v38  ;;  %2992 = vmatpush.msra.mxu0 %v2144_v36  ;;  %v2278_v38 = vld [vmem:[#allocation18 + $0xc58] sm:$0xff]  ;;  %v2092_v36 = vld [vmem:[#allocation18 + $0x688] sm:$0xff] }
 0x462   :  { %3009 = vmatpush.msra.mxu1 %v2182_v3  ;;  %2869 = vmatpush.msra.mxu2 %v1958_v19  ;;  %v2130_v3 = vld [vmem:[#allocation18 + $0x7b8] sm:$0xff]  ;;  %v2276_v19 = vld [vmem:[#allocation18 + $0xc48] sm:$0xff] }
 0x463   :  { %2886 = vmatpush.msra.mxu3 %v1996_v44  ;;  %2993 = vmatpush.msra.mxu0 %v2142_v61  ;;  %v2314_v44 = vld [vmem:[#allocation18 + $0xd78] sm:$0xff] }
 0x464   :  { %3010 = vmatpush.msra.mxu1 %v2180_v30  ;;  %2870 = vmatpush.msra.mxu2 %v1956_v27  ;;  %v2090_v61 = vld [vmem:[#allocation18 + $0x678] sm:$0xff]  ;;  %v2128_v30 = vld [vmem:[#allocation18 + $0x7a8] sm:$0xff] }
 0x465   :  { %2887 = vmatpush.msra.mxu3 %v1994_v16  ;;  %2994 = vmatpush.msra.mxu0 %v2140_v28  ;;  %v2274_v27 = vld [vmem:[#allocation18 + $0xc38] sm:$0xff]  ;;  %v2312_v16 = vld [vmem:[#allocation18 + $0xd68] sm:$0xff] }
 0x466   :  { %3011 = vmatpush.msra.mxu1 %v2178_v45  ;;  %2871 = vmatpush.msra.mxu2 %v1954_v31  ;;  %v2088_v28 = vld [vmem:[#allocation18 + $0x668] sm:$0xff]  ;;  %v2126_v45 = vld [vmem:[#allocation18 + $0x798] sm:$0xff] }
 0x467   :  { %2888 = vmatpush.msra.mxu3 %v1992_v29  ;;  %2995 = vmatmul.f32.vlgmr.msra.gmra.mxu0 %v4835_v34  ;;  %v2330_v34 = vld [vmem:[#allocation18 + $0xdf8] sm:$0xff]  ;;  %v2272_v31 = vld [vmem:[#allocation18 + $0xc28] sm:$0xff] }
 0x468   :  { %3059 = vmatpush.msrb.mxu0 %v2298_v33  ;;  %3012 = vmatpush.msra.mxu1 %v2176_v13  ;;  %v2310_v29 = vld [vmem:[#allocation18 + $0xd58] sm:$0xff]  ;;  %v2124_v13 = vld [vmem:[#allocation18 + $0x788] sm:$0xff] }
 0x469   :  { %2872 = vmatpush.msra.mxu2 %v1952_v14  ;;  %2889 = vmatpush.msra.mxu3 %v1990_v5  ;;  %v2086_v33 = vld [vmem:[#allocation18 + $0x658] sm:$0xff]  ;;  %v2308_v5 = vld [vmem:[#allocation18 + $0xd48] sm:$0xff] }
 0x46a   :  { %3060 = vmatpush.msrb.mxu0 %v2296_v18  ;;  %3013 = vmatpush.msra.mxu1 %v2174_v63  ;;  %v2270_v14 = vld [vmem:[#allocation18 + $0xc18] sm:$0xff]  ;;  %v2084_v18 = vld [vmem:[#allocation18 + $0x648] sm:$0xff] }
 0x46b   :  { %2873 = vmatpush.msra.mxu2 %v1950_v21  ;;  %2890 = vmatpush.msra.mxu3 %v1988_v56  ;;  %v2122_v63 = vld [vmem:[#allocation18 + $0x778] sm:$0xff]  ;;  %v2268_v21 = vld [vmem:[#allocation18 + $0xc08] sm:$0xff] }
 0x46c   :  { %3061 = vmatpush.msrb.mxu0 %v2294_v0  ;;  %3014 = vmatpush.msra.mxu1 %v2172_v52  ;;  %v2306_v56 = vld [vmem:[#allocation18 + $0xd38] sm:$0xff]  ;;  %v2120_v52 = vld [vmem:[#allocation18 + $0x768] sm:$0xff] }
 0x46d   :  { %2874 = vmatpush.msra.mxu2 %v1948_v37  ;;  %2891 = vmatpush.msra.mxu3 %v1986_v46  ;;  %v2082_v0 = vld [vmem:[#allocation18 + $0x638] sm:$0xff]  ;;  %v2304_v46 = vld [vmem:[#allocation18 + $0xd28] sm:$0xff] }
 0x46e   :  { %3015 = vmatmul.f32.vlgmr.msra.gmra.mxu1 %v4837_v20  ;;  %3062 = vmatpush.msrb.mxu0 %v2292_v62  ;;  %v2324_v20 = vld [vmem:[#allocation18 + $0xdc8] sm:$0xff]  ;;  %v2426_v37 = vld [vmem:[#allocation18 + $0x10f8] sm:$0xff] }
 0x46f   :  { %3079 = vmatpush.msrb.mxu1 %v2330_v34  ;;  %2875 = vmatmul.f32.vlgmr.msra.gmra.mxu2 %v4817_v49  ;;  %v2138_v49 = vld [vmem:[#allocation18 + $0x7f8] sm:$0xff]  ;;  %v2080_v62 = vld [vmem:[#allocation18 + $0x628] sm:$0xff] }
 0x470   :  { %2939 = vmatpush.msrb.mxu2 %v2106_v10  ;;  %2892 = vmatpush.msra.mxu3 %v1984_v39  ;;  %v2118_v34 = vld [vmem:[#allocation18 + $0x758] sm:$0xff]  ;;  %v2424_v10 = vld [vmem:[#allocation18 + $0x10e8] sm:$0xff] }
 0x471   :  { %3063 = vmatpush.msrb.mxu0 %v2290_v26  ;;  %3080 = vmatpush.msrb.mxu1 %v2328_v7  ;;  %v2302_v39 = vld [vmem:[#allocation18 + $0xd18] sm:$0xff]  ;;  %v2116_v7 = vld [vmem:[#allocation18 + $0x748] sm:$0xff] }
 0x472   :  { %2940 = vmatpush.msrb.mxu2 %v2104_v25  ;;  %2893 = vmatpush.msra.mxu3 %v1982_v22  ;;  %v2078_v26 = vld [vmem:[#allocation18 + $0x618] sm:$0xff]  ;;  %v2300_v22 = vld [vmem:[#allocation18 + $0xd08] sm:$0xff] }
 0x473   :  { %3064 = vmatpush.msrb.mxu0 %v2288_v41  ;;  %3081 = vmatpush.msrb.mxu1 %v2326_v15  ;;  %v2422_v25 = vld [vmem:[#allocation18 + $0x10d8] sm:$0xff]  ;;  %v2076_v41 = vld [vmem:[#allocation18 + $0x608] sm:$0xff] }
 0x474   :  { %2941 = vmatpush.msrb.mxu2 %v2102_v57  ;;  %2894 = vmatpush.msra.mxu3 %v1980_v32  ;;  %v2114_v15 = vld [vmem:[#allocation18 + $0x738] sm:$0xff]  ;;  %v2420_v57 = vld [vmem:[#allocation18 + $0x10c8] sm:$0xff] }
 0x475   :  { %3065 = vmatpush.msrb.mxu0 %v2286_v35  ;;  %3082 = vmatpush.msrb.mxu1 %v2324_v20  ;;  %v2234_v32 = vld [vmem:[#allocation18 + $0xaf8] sm:$0xff]  ;;  %v2112_v35 = vld [vmem:[#allocation18 + $0x728] sm:$0xff] }
 0x476   :  { %2895 = vmatmul.f32.vlgmr.msra.gmra.mxu3 %v4820_v59  ;;  %2942 = vmatpush.msrb.mxu2 %v2100_v51  ;;  %v2316_v59 = vld [vmem:[#allocation18 + $0xd88] sm:$0xff]  ;;  %v2418_v20 = vld [vmem:[#allocation18 + $0x10b8] sm:$0xff] }
 0x477   :  { %2959 = vmatpush.msrb.mxu3 %v2138_v49  ;;  %3066 = vmatpush.msrb.mxu0 %v2284_v54  ;;  %v2456_v51 = vld [vmem:[#allocation18 + $0x11e8] sm:$0xff]  ;;  %v2110_v54 = vld [vmem:[#allocation18 + $0x718] sm:$0xff] }
 0x478   :  { %3083 = vmatpush.msrb.mxu1 %v2322_v24  ;;  %2943 = vmatpush.msrb.mxu2 %v2098_v50  ;;  %v2232_v49 = vld [vmem:[#allocation18 + $0xae8] sm:$0xff]  ;;  %v2454_v50 = vld [vmem:[#allocation18 + $0x11d8] sm:$0xff] }
 0x479   :  { %2960 = vmatpush.msrb.mxu3 %v2136_v48  ;;  %3067 = vmatpush.msrb.mxu0 %v2282_v60  ;;  %v2416_v24 = vld [vmem:[#allocation18 + $0x10a8] sm:$0xff]  ;;  %v2230_v48 = vld [vmem:[#allocation18 + $0xad8] sm:$0xff] }
 0x47a   :  { %3084 = vmatpush.msrb.mxu1 %v2320_v55  ;;  %2944 = vmatpush.msrb.mxu2 %v2096_v6  ;;  %v2108_v60 = vld [vmem:[#allocation18 + $0x708] sm:$0xff]  ;;  %v2414_v55 = vld [vmem:[#allocation18 + $0x1098] sm:$0xff] }
 0x47b   :  { %2961 = vmatpush.msrb.mxu3 %v2134_v1  ;;  %3068 = vmatpush.msrb.mxu0 %v2280_v4  ;;  %v2228_v6 = vld [vmem:[#allocation18 + $0xac8] sm:$0xff]  ;;  %v2450_v4 = vld [vmem:[#allocation18 + $0x11b8] sm:$0xff] }
 0x47c   :  { %3085 = vmatpush.msrb.mxu1 %v2318_v11  ;;  %2945 = vmatpush.msrb.mxu2 %v2094_v23  ;;  %v2412_v1 = vld [vmem:[#allocation18 + $0x1088] sm:$0xff]  ;;  %v2226_v11 = vld [vmem:[#allocation18 + $0xab8] sm:$0xff] }
 0x47d   :  { %2962 = vmatpush.msrb.mxu3 %v2132_v43  ;;  %3069 = vmatpush.msrb.mxu0 %v2278_v38  ;;  %v2264_v23 = vld [vmem:[#allocation18 + $0xbe8] sm:$0xff]  ;;  %v2410_v43 = vld [vmem:[#allocation18 + $0x1078] sm:$0xff] }
 0x47e   :  { %3086 = vmatpush.msrb.mxu1 %v2316_v59  ;;  %2946 = vmatpush.msrb.mxu2 %v2092_v36  ;;  %v2448_v38 = vld [vmem:[#allocation18 + $0x11a8] sm:$0xff]  ;;  %v2262_v36 = vld [vmem:[#allocation18 + $0xbd8] sm:$0xff] }
 0x47f   :  { %2963 = vmatpush.msrb.mxu3 %v2130_v3  ;;  %3070 = vmatpush.msrb.mxu0 %v2276_v19  ;;  %v2224_v59 = vld [vmem:[#allocation18 + $0xaa8] sm:$0xff]  ;;  %v2446_v19 = vld [vmem:[#allocation18 + $0x1198] sm:$0xff] }
 0x480   :  { %3087 = vmatpush.msrb.mxu1 %v2314_v44  ;;  %2947 = vmatpush.msrb.mxu2 %v2090_v61  ;;  %v2408_v3 = vld [vmem:[#allocation18 + $0x1068] sm:$0xff]  ;;  %v2222_v44 = vld [vmem:[#allocation18 + $0xa98] sm:$0xff] }
 0x481   :  { %2964 = vmatpush.msrb.mxu3 %v2128_v30  ;;  %3071 = vmatpush.msrb.mxu0 %v2274_v27  ;;  %v2260_v61 = vld [vmem:[#allocation18 + $0xbc8] sm:$0xff]  ;;  %v2406_v30 = vld [vmem:[#allocation18 + $0x1058] sm:$0xff] }
 0x482   :  { %3088 = vmatpush.msrb.mxu1 %v2312_v16  ;;  %2948 = vmatpush.msrb.mxu2 %v2088_v28  ;;  %v2220_v27 = vld [vmem:[#allocation18 + $0xa88] sm:$0xff]  ;;  %v2258_v16 = vld [vmem:[#allocation18 + $0xbb8] sm:$0xff] }
 0x483   :  { %2965 = vmatpush.msrb.mxu3 %v2126_v45  ;;  %3072 = vmatpush.msrb.mxu0 %v2272_v31  ;;  %v2404_v28 = vld [vmem:[#allocation18 + $0x1048] sm:$0xff]  ;;  %v2442_v45 = vld [vmem:[#allocation18 + $0x1178] sm:$0xff] }
 0x484   :  { %3089 = vmatpush.msrb.mxu1 %v2310_v29  ;;  %2949 = vmatpush.msrb.mxu2 %v2086_v33  ;;  %v2218_v31 = vld [vmem:[#allocation18 + $0xa78] sm:$0xff]  ;;  %v2256_v29 = vld [vmem:[#allocation18 + $0xba8] sm:$0xff] }
 0x485   :  { %2966 = vmatpush.msrb.mxu3 %v2124_v13  ;;  %3073 = vmatpush.msrb.mxu0 %v2270_v14  ;;  %v2402_v33 = vld [vmem:[#allocation18 + $0x1038] sm:$0xff]  ;;  %v2440_v13 = vld [vmem:[#allocation18 + $0x1168] sm:$0xff] }
 0x486   :  { %3090 = vmatpush.msrb.mxu1 %v2308_v5  ;;  %2950 = vmatpush.msrb.mxu2 %v2084_v18  ;;  %v2216_v14 = vld [vmem:[#allocation18 + $0xa68] sm:$0xff]  ;;  %v2254_v5 = vld [vmem:[#allocation18 + $0xb98] sm:$0xff] }
 0x487   :  { %2967 = vmatpush.msrb.mxu3 %v2122_v63  ;;  %3074 = vmatpush.msrb.mxu0 %v2268_v21  ;;  %v2400_v18 = vld [vmem:[#allocation18 + $0x1028] sm:$0xff]  ;;  %v2438_v63 = vld [vmem:[#allocation18 + $0x1158] sm:$0xff] }
 0x488   :  { %3091 = vmatpush.msrb.mxu1 %v2306_v56  ;;  %2951 = vmatpush.msrb.mxu2 %v2082_v0  ;;  %v2214_v21 = vld [vmem:[#allocation18 + $0xa58] sm:$0xff]  ;;  %v2252_v56 = vld [vmem:[#allocation18 + $0xb88] sm:$0xff] }
 0x489   :  { %2968 = vmatpush.msrb.mxu3 %v2120_v52  ;;  %3075 = vmatmul.f32.vlgmr.msrb.gmra.mxu0 %v4846_v8  ;;  %v2458_v8 = vld [vmem:[#allocation18 + $0x11f8] sm:$0xff]  ;;  %v2436_v52 = vld [vmem:[#allocation18 + $0x1148] sm:$0xff] }
 0x48a   :  { %3139 = vmatpush.msra.mxu0 %v2426_v37  ;;  %3092 = vmatpush.msrb.mxu1 %v2304_v46  ;;  %v2398_v0 = vld [vmem:[#allocation18 + $0x1018] sm:$0xff]  ;;  %v2212_v37 = vld [vmem:[#allocation18 + $0xa48] sm:$0xff] }
 0x48b   :  { %2952 = vmatpush.msrb.mxu2 %v2080_v62  ;;  %2969 = vmatpush.msrb.mxu3 %v2118_v34  ;;  %v2250_v46 = vld [vmem:[#allocation18 + $0xb78] sm:$0xff]  ;;  %v2396_v62 = vld [vmem:[#allocation18 + $0x1008] sm:$0xff] }
 0x48c   :  { %3140 = vmatpush.msra.mxu0 %v2424_v10  ;;  %3093 = vmatpush.msrb.mxu1 %v2302_v39  ;;  %v2434_v34 = vld [vmem:[#allocation18 + $0x1138] sm:$0xff]  ;;  %v2248_v39 = vld [vmem:[#allocation18 + $0xb68] sm:$0xff] }
 0x48d   :  { %2953 = vmatpush.msrb.mxu2 %v2078_v26  ;;  %2970 = vmatpush.msrb.mxu3 %v2116_v7  ;;  %v2210_v10 = vld [vmem:[#allocation18 + $0xa38] sm:$0xff]  ;;  %v2432_v26 = vld [vmem:[#allocation18 + $0x1128] sm:$0xff] }
 0x48e   :  { %3141 = vmatpush.msra.mxu0 %v2422_v25  ;;  %3094 = vmatpush.msrb.mxu1 %v2300_v22  ;;  %v2208_v7 = vld [vmem:[#allocation18 + $0xa28] sm:$0xff]  ;;  %v2246_v25 = vld [vmem:[#allocation18 + $0xb58] sm:$0xff] }
 0x48f   :  { %2954 = vmatpush.msrb.mxu2 %v2076_v41  ;;  %2971 = vmatpush.msrb.mxu3 %v2114_v15  ;;  %v2430_v22 = vld [vmem:[#allocation18 + $0x1118] sm:$0xff]  ;;  %v2244_v15 = vld [vmem:[#allocation18 + $0xb48] sm:$0xff] }
 0x490   :  { %3095 = vmatmul.f32.vlgmr.msrb.gmra.mxu1 %v4849_v42  ;;  %3142 = vmatpush.msra.mxu0 %v2420_v57  ;;  %v2452_v42 = vld [vmem:[#allocation18 + $0x11c8] sm:$0xff]  ;;  %v2206_v41 = vld [vmem:[#allocation18 + $0xa18] sm:$0xff]  ;;  %v2476_v57 = vpop.f32.mrf.mxu2 }
 0x491   :  { %3159 = vmatpush.msra.mxu1 %v2458_v8  ;;  %2955 = vmatmul.f32.vlgmr.msrb.gmra.mxu2 %v4827_v17  ;;  %v2266_v17 = vld [vmem:[#allocation18 + $0xbf8] sm:$0xff]  ;;  %v2428_v8 = vld [vmem:[#allocation18 + $0x1108] sm:$0xff] }
 0x492   :  { %3019 = vmatpush.msra.mxu2 %v2234_v32  ;;  %2972 = vmatpush.msrb.mxu3 %v2112_v35  ;;  %v2204_v32 = vld [vmem:[#allocation18 + $0xa08] sm:$0xff]  ;;  %v2242_v35 = vld [vmem:[#allocation18 + $0xb38] sm:$0xff] }
 0x493   :  { %3143 = vmatpush.msra.mxu0 %v2418_v20  ;;  %3160 = vmatpush.msra.mxu1 %v2456_v51  ;;  %v2496_v20 = vpop.f32.mrf.mxu3  ;;  %v2362_v51 = vld [vmem:[#allocation18 + $0xef8] sm:$0xff] }
 0x494   :  { %3020 = vmatpush.msra.mxu2 %v2232_v49  ;;  %2973 = vmatpush.msrb.mxu3 %v2110_v54  ;;  %v2240_v49 = vld [vmem:[#allocation18 + $0xb28] sm:$0xff]  ;;  %v2238_v54 = vld [vmem:[#allocation18 + $0xb18] sm:$0xff] }
 0x495   :  { %3144 = vmatpush.msra.mxu0 %v2416_v24  ;;  %3161 = vmatpush.msra.mxu1 %v2454_v50  ;;  %v2358_v24 = vld [vmem:[#allocation18 + $0xed8] sm:$0xff]  ;;  %v2236_v50 = vld [vmem:[#allocation18 + $0xb08] sm:$0xff] }
 0x496   :  { %3021 = vmatpush.msra.mxu2 %v2230_v48  ;;  %2974 = vmatpush.msrb.mxu3 %v2108_v60  ;;  %v2356_v48 = vld [vmem:[#allocation18 + $0xec8] sm:$0xff]  ;;  %v2394_v60 = vld [vmem:[#allocation18 + $0xff8] sm:$0xff] }
 0x497   :  { %3145 = vmatpush.msra.mxu0 %v2414_v55  ;;  %3162 = vmatpush.msra.mxu1 %v2452_v42  ;;  %v2354_v42 = vld [vmem:[#allocation18 + $0xeb8] sm:$0xff] }
 0x498   :  { %2975 = vmatmul.f32.vlgmr.msrb.gmra.mxu3 %v4830_v58  ;;  %3022 = vmatpush.msra.mxu2 %v2228_v6  ;;  %v2444_v58 = vld [vmem:[#allocation18 + $0x1188] sm:$0xff]  ;;  %v2516_v55 = vpop.f32.mrf.mxu2 }
 0x499   :  { %3039 = vmatpush.msra.mxu3 %v2266_v17  ;;  %3146 = vmatpush.msra.mxu0 %v2412_v1  ;;  %v2392_v6 = vld [vmem:[#allocation18 + $0xfe8] sm:$0xff]  ;;  %v2390_v1 = vld [vmem:[#allocation18 + $0xfd8] sm:$0xff] }
 0x49a   :  { %3163 = vmatpush.msra.mxu1 %v2450_v4  ;;  %3023 = vmatpush.msra.mxu2 %v2226_v11  ;;  %v2352_v17 = vld [vmem:[#allocation18 + $0xea8] sm:$0xff]  ;;  %v2350_v4 = vld [vmem:[#allocation18 + $0xe98] sm:$0xff] }
 0x49b   :  { %3040 = vmatpush.msra.mxu3 %v2264_v23  ;;  %3147 = vmatpush.msra.mxu0 %v2410_v43  ;;  %v2388_v11 = vld [vmem:[#allocation18 + $0xfc8] sm:$0xff] }
 0x49c   :  { %3164 = vmatpush.msra.mxu1 %v2448_v38  ;;  %3024 = vmatpush.msra.mxu2 %v2224_v59  ;;  %v2348_v43 = vld [vmem:[#allocation18 + $0xe88] sm:$0xff]  ;;  %v2386_v38 = vld [vmem:[#allocation18 + $0xfb8] sm:$0xff] }
 0x49d   :  { %3041 = vmatpush.msra.mxu3 %v2262_v36  ;;  %3148 = vmatpush.msra.mxu0 %v2408_v3  ;;  %v2346_v36 = vld [vmem:[#allocation18 + $0xe78] sm:$0xff]  ;;  %v2384_v3 = vld [vmem:[#allocation18 + $0xfa8] sm:$0xff] }
 0x49e   :  { %3165 = vmatpush.msra.mxu1 %v2446_v19  ;;  %3025 = vmatpush.msra.mxu2 %v2222_v44 }
 0x49f   :  { %3042 = vmatpush.msra.mxu3 %v2260_v61  ;;  %3149 = vmatpush.msra.mxu0 %v2406_v30  ;;  %v2344_v61 = vld [vmem:[#allocation18 + $0xe68] sm:$0xff]  ;;  %v2382_v30 = vld [vmem:[#allocation18 + $0xf98] sm:$0xff] }
 0x4a0   :  { %3166 = vmatpush.msra.mxu1 %v2444_v58  ;;  %3026 = vmatpush.msra.mxu2 %v2220_v27  ;;  %v2556_v59 = vpop.f32.mrf.mxu2  ;;  %v2342_v27 = vld [vmem:[#allocation18 + $0xe58] sm:$0xff] }
 0x4a1   :  { %3043 = vmatpush.msra.mxu3 %v2258_v16  ;;  %3150 = vmatpush.msra.mxu0 %v2404_v28  ;;  %v2380_v16 = vld [vmem:[#allocation18 + $0xf88] sm:$0xff]  ;;  %v2596_v28 = vpop.f32.mrf.mxu0 }
 0x4a2   :  { %3167 = vmatpush.msra.mxu1 %v2442_v45  ;;  %3027 = vmatpush.msra.mxu2 %v2218_v31  ;;  %v2340_v45 = vld [vmem:[#allocation18 + $0xe48] sm:$0xff]  ;;  %v2378_v31 = vld [vmem:[#allocation18 + $0xf78] sm:$0xff] }
 0x4a3   :  { %3044 = vmatpush.msra.mxu3 %v2256_v29  ;;  %3151 = vmatpush.msra.mxu0 %v2402_v33  ;;  %v2338_v33 = vld [vmem:[#allocation18 + $0xe38] sm:$0xff] }
 0x4a4   :  { %3168 = vmatpush.msra.mxu1 %v2440_v13  ;;  %3028 = vmatpush.msra.mxu2 %v2216_v14  ;;  %v2376_v13 = vld [vmem:[#allocation18 + $0xf68] sm:$0xff]  ;;  %v2616_v14 = vpop.f32.mrf.mxu1 }
 0x4a5   :  { %3045 = vmatpush.msra.mxu3 %v2254_v5  ;;  %3152 = vmatpush.msra.mxu0 %v2400_v18  ;;  %v2336_v5 = vld [vmem:[#allocation18 + $0xe28] sm:$0xff]  ;;  %v2374_v18 = vld [vmem:[#allocation18 + $0xf58] sm:$0xff] }
 0x4a6   :  { %3169 = vmatpush.msra.mxu1 %v2438_v63  ;;  %3029 = vmatpush.msra.mxu2 %v2214_v21 }
 0x4a7   :  { %3046 = vmatpush.msra.mxu3 %v2252_v56  ;;  %3153 = vmatpush.msra.mxu0 %v2398_v0  ;;  %v2334_v56 = vld [vmem:[#allocation18 + $0xe18] sm:$0xff]  ;;  %v2372_v0 = vld [vmem:[#allocation18 + $0xf48] sm:$0xff] }
 0x4a8   :  { %3170 = vmatpush.msra.mxu1 %v2436_v52  ;;  %3030 = vmatpush.msra.mxu2 %v2212_v37  ;;  %v2636_v63 = vpop.f32.mrf.mxu2 }
 0x4a9   :  { %3047 = vmatpush.msra.mxu3 %v2250_v46  ;;  %3154 = vmatpush.msra.mxu0 %v2396_v62  ;;  %v2332_v46 = vld [vmem:[#allocation18 + $0xe08] sm:$0xff]  ;;  %v2370_v62 = vld [vmem:[#allocation18 + $0xf38] sm:$0xff] }
 0x4aa   :  { %3171 = vmatpush.msra.mxu1 %v2434_v34  ;;  %3031 = vmatpush.msra.mxu2 %v2210_v10  ;;  %v3204_v10 = vld [vmem:[#allocation21 + $0x78] sm:$0xff] }
 0x4ab   :  { %3048 = vmatpush.msra.mxu3 %v2248_v39  ;;  %3155 = vmatmul.f32.vlgmr.msra.gmra.mxu0 %v4862_v53  ;;  %v2360_v53 = vld [vmem:[#allocation18 + $0xee8] sm:$0xff] }
 0x4ac   :  { %3172 = vmatpush.msra.mxu1 %v2432_v26  ;;  %3032 = vmatpush.msra.mxu2 %v2208_v7  ;;  %v2368_v39 = vld [vmem:[#allocation18 + $0xf28] sm:$0xff]  ;;  %v3203_v26 = vld [vmem:[#allocation21 + $0x70] sm:$0xff] }
 0x4ad   :  { %3049 = vmatpush.msra.mxu3 %v2246_v25  ;;  %v2366_v7 = vld [vmem:[#allocation18 + $0xf18] sm:$0xff]  ;;  %v2676_v25 = vpop.f32.mrf.mxu0 }
 0x4ae   :  { %3173 = vmatpush.msra.mxu1 %v2430_v22  ;;  %3033 = vmatpush.msra.mxu2 %v2206_v41  ;;  %v3202_v41 = vld [vmem:[#allocation21 + $0x68] sm:$0xff] }
 0x4af   :  { %3050 = vmatpush.msra.mxu3 %v2244_v15  ;;  %v2364_v15 = vld [vmem:[#allocation18 + $0xf08] sm:$0xff] }
 0x4b0   :  { %3174 = vmatpush.msra.mxu1 %v2428_v8  ;;  %3034 = vmatpush.msra.mxu2 %v2204_v32  ;;  %v2696_v8 = vpop.f32.mrf.mxu1  ;;  %v2716_v32 = vpop.f32.mrf.mxu2 }
 0x4b1   :  { %3051 = vmatpush.msra.mxu3 %v2242_v35  ;;  %3175 = vmatmul.f32.vlgmr.msra.gmra.mxu1 %v4866_v2  ;;  %v2536_v2 = vpop.f32.mrf.mxu3 }
 0x4b2   :  { %3035 = vmatmul.f32.vlgmr.msra.gmra.mxu2 %v4839_v9  ;;  %v2497_v9 = vadd.f32 %v2496_v20, %v2476_v57  ;;  %v3201_v57 = vld [vmem:[#allocation21 + $0x60] sm:$0xff]  ;;  %v3200_v20 = vld [vmem:[#allocation21 + $0x58] sm:$0xff] }
 0x4b3   :  { %3099 = vmatpush.msrb.mxu2 %v2362_v51  ;;  %3052 = vmatpush.msra.mxu3 %v2240_v49  ;;  %v3199_v49 = vld [vmem:[#allocation21 + $0x50] sm:$0xff] }
 0x4b4   :  { %v2517_v23 = vadd.f32 %v2516_v55, %v2497_v9  ;;  %v3195_v55 = vld [vmem:[#allocation21 + $0x30] sm:$0xff] }
 0x4b5   :  { %3100 = vmatpush.msrb.mxu2 %v2360_v53  ;;  %3053 = vmatpush.msra.mxu3 %v2238_v54  ;;  %v3198_v54 = vld [vmem:[#allocation21 + $0x48] sm:$0xff] }
 0x4b7   :  { %3101 = vmatpush.msrb.mxu2 %v2358_v24  ;;  %3054 = vmatpush.msra.mxu3 %v2236_v50  ;;  %v3197_v24 = vld [vmem:[#allocation21 + $0x40] sm:$0xff]  ;;  %v2756_v50 = vpop.f32.mrf.mxu0 }
 0x4b8   :  { %3055 = vmatmul.f32.vlgmr.msra.gmra.mxu3 %v4842_v40  ;;  %v2537_v40 = vadd.f32 %v2536_v2, %v2517_v23  ;;  %v3194_v2 = vld [vmem:[#allocation21 + $0x28] sm:$0xff]  ;;  %v4883_v23 = vld [vmem:[#allocation19] sm:$0x3] }
 0x4b9   :  { %3102 = vmatpush.msrb.mxu2 %v2356_v48  ;;  %3119 = vmatpush.msrb.mxu3 %v2394_v60  ;;  %v2576_v19 = vpop.f32.mrf.mxu3  ;;  %v3196_v60 = vld [vmem:[#allocation21 + $0x38] sm:$0xff] }
 0x4ba   :  { %v2557_v44 = vadd.f32 %v2556_v59, %v2537_v40  ;;  %v3183_v59 = vperm.slane %v4883_v23, 0  ;;  %v3190_v40 = vld [vmem:[#allocation21 + $0x8] sm:$0xff] }
 0x4bb   :  { %3103 = vmatpush.msrb.mxu2 %v2354_v42  ;;  %3120 = vmatpush.msrb.mxu3 %v2392_v6  ;;  %v2776_v42 = vpop.f32.mrf.mxu1 }
 0x4bc   :  { %v2577_v58 = vadd.f32 %v2576_v19, %v2557_v44  ;;  %v3220_v19 = vld [vmem:[#allocation21 + $0xf8] sm:$0xff]  ;;  %v3219_v44 = vld [vmem:[#allocation21 + $0xf0] sm:$0xff] }
 0x4bd   :  { %3104 = vmatpush.msrb.mxu2 %v2352_v17  ;;  %3121 = vmatpush.msrb.mxu3 %v2390_v1  ;;  %v3193_v1 = vld [vmem:[#allocation21 + $0x20] sm:$0xff] }
 0x4be   :  { %v2597_v29 = vadd.f32 %v2596_v28, %v2577_v58  ;;  %v3216_v58 = vld [vmem:[#allocation21 + $0xd8] sm:$0xff] }
 0x4bf   :  { %3105 = vmatpush.msrb.mxu2 %v2350_v4  ;;  %3122 = vmatpush.msrb.mxu3 %v2388_v11  ;;  %v3192_v11 = vld [vmem:[#allocation21 + $0x18] sm:$0xff] }
 0x4c0   :  { %v2617_v21 = vadd.f32 %v2616_v14, %v2597_v29 }
 0x4c1   :  { %3106 = vmatpush.msrb.mxu2 %v2348_v43  ;;  %3123 = vmatpush.msrb.mxu3 %v2386_v38  ;;  %v2656_v52 = vpop.f32.mrf.mxu3  ;;  %v3191_v43 = vld [vmem:[#allocation21 + $0x10] sm:$0xff] }
 0x4c2   :  { %v2637_v37 = vadd.f32 %v2636_v63, %v2617_v21 }
 0x4c3   :  { %3107 = vmatpush.msrb.mxu2 %v2346_v36  ;;  %3124 = vmatpush.msrb.mxu3 %v2384_v3  ;;  %v3189_v36 = vld [vmem:[#allocation21] sm:$0xff]  ;;  %v2856_v28 = vpop.f32.mrf.mxu1 }
 0x4c4   :  { %v2657_v34 = vadd.f32 %v2656_v52, %v2637_v37  ;;  %v3209_v52 = vld [vmem:[#allocation21 + $0xa0] sm:$0xff] }
 0x4c5   :  { %3108 = vmatpush.msrb.mxu2 %v2344_v61  ;;  %3125 = vmatpush.msrb.mxu3 %v2382_v30  ;;  %v3218_v61 = vld [vmem:[#allocation21 + $0xe8] sm:$0xff]  ;;  %v3217_v30 = vld [vmem:[#allocation21 + $0xe0] sm:$0xff] }
 0x4c6   :  { %v2677_v22 = vadd.f32 %v2676_v25, %v2657_v34 }
 0x4c7   :  { %3109 = vmatpush.msrb.mxu2 %v2342_v27  ;;  %3126 = vmatpush.msrb.mxu3 %v2380_v16  ;;  %v3215_v27 = vld [vmem:[#allocation21 + $0xd0] sm:$0xff]  ;;  %v3214_v16 = vld [vmem:[#allocation21 + $0xc8] sm:$0xff] }
 0x4c8   :  { %v2697_v35 = vadd.f32 %v2696_v8, %v2677_v22  ;;  %v3205_v22 = vld [vmem:[#allocation21 + $0x80] sm:$0xff] }
 0x4c9   :  { %3110 = vmatpush.msrb.mxu2 %v2340_v45  ;;  %3127 = vmatpush.msrb.mxu3 %v2378_v31  ;;  %v2836_v45 = vpop.f32.mrf.mxu0 }
 0x4ca   :  { %v2717_v51 = vadd.f32 %v2716_v32, %v2697_v35  ;;  %v2857_v29 = vadd.f32 %v2856_v28, %v2836_v45 }
 0x4cb   :  { %3111 = vmatpush.msrb.mxu2 %v2338_v33  ;;  %3128 = vmatpush.msrb.mxu3 %v2376_v13  ;;  %v3213_v13 = vld [vmem:[#allocation21 + $0xc0] sm:$0xff]  ;;  %v2936_v37 = vpop.f32.mrf.mxu1 }
 0x4cd   :  { %3112 = vmatpush.msrb.mxu2 %v2336_v5  ;;  %3129 = vmatpush.msrb.mxu3 %v2374_v18  ;;  %v3212_v5 = vld [vmem:[#allocation21 + $0xb8] sm:$0xff]  ;;  %v3211_v18 = vld [vmem:[#allocation21 + $0xb0] sm:$0xff] }
 0x4cf   :  { %3113 = vmatpush.msrb.mxu2 %v2334_v56  ;;  %3130 = vmatpush.msrb.mxu3 %v2372_v0  ;;  %v3210_v56 = vld [vmem:[#allocation21 + $0xa8] sm:$0xff] }
 0x4d0   :  { %v2796_v6 = vpop.f32.mrf.mxu2 }
 0x4d1   :  { %3114 = vmatpush.msrb.mxu2 %v2332_v46  ;;  %3131 = vmatpush.msrb.mxu3 %v2370_v62  ;;  %v2916_v21 = vpop.f32.mrf.mxu0  ;;  %v3208_v62 = vld [vmem:[#allocation21 + $0x98] sm:$0xff] }
 0x4d2   :  { %3115 = vmatmul.f32.vlgmr.msrb.gmra.mxu2 %v4851_v47  ;;  %v2736_v47 = vpop.f32.mrf.mxu3 }
 0x4d3   :  { %3225 = vmatpush.msra.mxu2 %v3204_v10  ;;  %3132 = vmatpush.msrb.mxu3 %v2368_v39  ;;  %v2737_v53 = vadd.f32 %v2736_v47, %v2717_v51  ;;  %v3207_v39 = vld [vmem:[#allocation21 + $0x90] sm:$0xff] }
 0x4d5   :  { %3226 = vmatpush.msra.mxu2 %v3203_v26  ;;  %3133 = vmatpush.msrb.mxu3 %v2366_v7  ;;  %v2757_v48 = vadd.f32 %v2756_v50, %v2737_v53  ;;  %v3206_v7 = vld [vmem:[#allocation21 + $0x88] sm:$0xff]  ;;  %v3280_v53 = vld [vmem:[%s5001_s13 + $0x78] sm:$0xff] }
 0x4d6   :  { %3285 = vmatpush.msrb.mxu0 %v3280_v53  ;;  %v3358_v53 = vld [vmem:[%s5005_s17 + $0x20] sm:$0xff] }
 0x4d7   :  { %3227 = vmatpush.msra.mxu2 %v3202_v41  ;;  %3134 = vmatpush.msrb.mxu3 %v2364_v15 }
 0x4d8   :  { %3135 = vmatmul.f32.vlgmr.msrb.gmra.mxu3 %v4854_v12  ;;  %v2777_v12 = vadd.f32 %v2776_v42, %v2757_v48  ;;  %v3277_v42 = vld [vmem:[%s5001_s13 + $0x60] sm:$0xff] }
 0x4d9   :  { %3228 = vmatpush.msra.mxu2 %v3201_v57  ;;  %3245 = vmatpush.msra.mxu3 %v3220_v19  ;;  %v3270_v19 = vld [vmem:[%s5001_s13 + $0x28] sm:$0xff] }
 0x4da   :  { %v2816_v9 = vpop.f32.mrf.mxu3  ;;  %v2797_v17 = vadd.f32 %v2796_v6, %v2777_v12 }
 0x4db   :  { %3229 = vmatpush.msra.mxu2 %v3200_v20  ;;  %3246 = vmatpush.msra.mxu3 %v3219_v44  ;;  %v3269_v44 = vld [vmem:[%s5001_s13 + $0x20] sm:$0xff] }
 0x4dc   :  { %v2817_v4 = vadd.f32 %v2816_v9, %v2797_v17 }
 0x4dd   :  { %3230 = vmatpush.msra.mxu2 %v3199_v49  ;;  %3247 = vmatpush.msra.mxu3 %v3218_v61  ;;  %v3268_v61 = vld [vmem:[%s5001_s13 + $0x18] sm:$0xff] }
 0x4de   :  { %v3179_v38 = vmul.f32 0.015625, %v2817_v4 }
 0x4df   :  { %3231 = vmatpush.msra.mxu2 %v3198_v54  ;;  %3248 = vmatpush.msra.mxu3 %v3217_v30  ;;  %v3279_v54 = vld [vmem:[%s5001_s13 + $0x70] sm:$0xff] }
 0x4e0   :  { %v3187_v3 = vadd.f32 %v3183_v59, %v3179_v38  ;;  %3286 = vmatpush.msrb.mxu0 %v3279_v54  ;;  %v3274_v38 = vld [vmem:[%s5001_s13 + $0x48] sm:$0xff]  ;;  %v3267_v30 = vld [vmem:[%s5001_s13 + $0x10] sm:$0xff] }
 0x4e1   :  { %3232 = vmatpush.msra.mxu2 %v3197_v24  ;;  %3249 = vmatpush.msra.mxu3 %v3216_v58  ;;  %v3266_v58 = vld [vmem:[%s5001_s13 + $0x8] sm:$0xff] }
 0x4e3   :  { %3233 = vmatpush.msra.mxu2 %v3196_v60  ;;  %3250 = vmatpush.msra.mxu3 %v3215_v27  ;;  %v3278_v60 = vld [vmem:[%s5001_s13 + $0x68] sm:$0xff]  ;;  %v3265_v27 = vld [vmem:[%s5001_s13] sm:$0xff] }
 0x4e4   :  { %v2996_v41 = vpop.f32.mrf.mxu0  ;;  %3287 = vmatpush.msrb.mxu0 %v3278_v60 }
 0x4e5   :  { %3234 = vmatpush.msra.mxu2 %v3195_v55  ;;  %3251 = vmatpush.msra.mxu3 %v3214_v16  ;;  %v3482_v16 = vld [vmem:[#allocation22] ss:$0 sm:$0xff] }
 0x4e6   :  { %3288 = vmatpush.msrb.mxu0 %v3277_v42 }
 0x4e7   :  { %3235 = vmatpush.msra.mxu2 %v3194_v2  ;;  %3252 = vmatpush.msra.mxu3 %v3213_v13  ;;  %v3276_v2 = vld [vmem:[%s5001_s13 + $0x58] sm:$0xff] }
 0x4e8   :  { %3289 = vmatpush.msrb.mxu0 %v3276_v2 }
 0x4e9   :  { %3236 = vmatpush.msra.mxu2 %v3193_v1  ;;  %3253 = vmatpush.msra.mxu3 %v3212_v5  ;;  %v3275_v1 = vld [vmem:[%s5001_s13 + $0x50] sm:$0xff] }
 0x4ea   :  { %3290 = vmatpush.msrb.mxu0 %v3275_v1 }
 0x4eb   :  { %3237 = vmatpush.msra.mxu2 %v3192_v11  ;;  %3254 = vmatpush.msra.mxu3 %v3211_v18  ;;  %v3016_v57 = vpop.f32.mrf.mxu1  ;;  %v3184_v11 = vperm.slane %v4883_v23, 1  ;;  %v3271_v23 = vld [vmem:[%s5001_s13 + $0x30] sm:$0xff] }
 0x4ec   :  { %3291 = vmatpush.msrb.mxu0 %v3274_v38 }
 0x4ed   :  { %3238 = vmatpush.msra.mxu2 %v3191_v43  ;;  %3255 = vmatpush.msra.mxu3 %v3210_v56 }
 0x4ef   :  { %3239 = vmatpush.msra.mxu2 %v3190_v40  ;;  %3256 = vmatpush.msra.mxu3 %v3209_v52  ;;  %v3273_v40 = vld [vmem:[%s5001_s13 + $0x40] sm:$0xff] }
 0x4f0   :  { %3292 = vmatpush.msrb.mxu0 %v3273_v40 }
 0x4f1   :  { %3240 = vmatpush.msra.mxu2 %v3189_v36  ;;  %3257 = vmatpush.msra.mxu3 %v3208_v62  ;;  %v3366_v62 = vld [vmem:[%s5005_s17 + $0x60] sm:$0xf] }
 0x4f2   :  { %3241 = vmatmul.f32.vlgmr.msra.gmra.mxu2 %v3187_v3  ;;  %v2876_v31 = vpop.f32.mrf.mxu2  ;;  %v3272_v3 = vld [vmem:[%s5001_s13 + $0x38] sm:$0xff]  ;;  %3457 = vmatpush.msk.msrb.mxu1 %vm3375_vm6, %v3366_v62 }
 0x4f3   :  { %v2877_v14 = vadd.f32 %v2876_v31, %v2857_v29  ;;  %3258 = vmatpush.msra.mxu3 %v3207_v39  ;;  %3293 = vmatpush.msrb.mxu0 %v3272_v3  ;;  %v3365_v39 = vld [vmem:[%s5005_s17 + $0x58] sm:$0xff]  ;;  %v3485_v3 = vld [vmem:[#allocation27] ss:$0 sm:$0xff] }
 0x4f4   :  { %3383 = vmatpush.msrb.mxu1 %v3365_v39 }
 0x4f5   :  { %3259 = vmatpush.msra.mxu3 %v3206_v7  ;;  %3294 = vmatpush.msrb.mxu0 %v3271_v23  ;;  %v3364_v7 = vld [vmem:[%s5005_s17 + $0x50] sm:$0xff] }
 0x4f6   :  { %3384 = vmatpush.msrb.mxu1 %v3364_v7 }
 0x4f7   :  { %3260 = vmatpush.msra.mxu3 %v3205_v22  ;;  %3295 = vmatpush.msrb.mxu0 %v3270_v19 }
 0x4f9   :  { %v2896_v33 = vpop.f32.mrf.mxu3  ;;  %3296 = vmatpush.msrb.mxu0 %v3269_v44 }
 0x4fa   :  { %v2897_v63 = vadd.f32 %v2896_v33, %v2877_v14  ;;  %v4001_v33 = vmov 2.0   ;;  %v3483_v14 = vld [vmem:[#allocation24] ss:$0 sm:$0xff] }
 0x4fb   :  { %3297 = vmatpush.msrb.mxu0 %v3268_v61  ;;  %3487 = vrcp.f32 %v4001_v33  ;;  %v3486_v61 = vld [vmem:[#allocation28] ss:$0 sm:$0xff] }
 0x4fc   :  { %v2917_v0 = vadd.f32 %v2916_v21, %v2897_v63 }
 0x4fd   :  { %3298 = vmatpush.msrb.mxu0 %v3267_v30 }
 0x4fe   :  { %v2937_v34 = vadd.f32 %v2936_v37, %v2917_v0 }
 0x4ff   :  { %3299 = vmatpush.msrb.mxu0 %v3266_v58 }
 0x501   :  { %3300 = vmatpush.msrb.mxu0 %v3265_v27  ;;  %v3488_v13 = vpop.eup %3487 }
 0x502   :  { %v3314_v5 = vmul.f32 2.0, %v3488_v13  ;;  %vm3318_vm7 = vweird.f32 %v3488_v13 }
 0x504   :  { %v3315_v21 = vsub.f32 1.0, %v3314_v5 }
 0x506   :  { %v3076_v51 = vpop.f32.mrf.mxu0  ;;  %v3316_v52 = vmul.f32 %v3488_v13, %v3315_v21 }
 0x50d   :  { %v3096_v24 = vpop.f32.mrf.mxu1 }
 0x514   :  { %v2956_v46 = vpop.f32.mrf.mxu2 }
 0x515   :  { %v2957_v26 = vadd.f32 %v2956_v46, %v2937_v34  ;;  %v3317_v34 = vadd.f32 %v3488_v13, %v3316_v52 }
 0x51b   :  { %v2976_v10 = vpop.f32.mrf.mxu3 }
 0x51c   :  { %v2977_v25 = vadd.f32 %v2976_v10, %v2957_v26 }
 0x51e   :  { %v2997_v15 = vadd.f32 %v2996_v41, %v2977_v25  ;;  %v3319_v25 = vsel %vm3318_vm7, %v3488_v13, %v3317_v34  ;;  %v3363_v41 = vld [vmem:[%s5005_s17 + $0x48] sm:$0xff] }
 0x51f   :  { %3385 = vmatpush.msrb.mxu1 %v3363_v41 }
 0x520   :  { %v3017_v32 = vadd.f32 %v3016_v57, %v2997_v15  ;;  %v3362_v57 = vld [vmem:[%s5005_s17 + $0x40] sm:$0xff] }
 0x521   :  { %3386 = vmatpush.msrb.mxu1 %v3362_v57 }
 0x528   :  { %v3156_v9 = vpop.f32.mrf.mxu0 }
 0x52e   :  { %v3176_v4 = vpop.f32.mrf.mxu1 }
 0x535   :  { %v3036_v8 = vpop.f32.mrf.mxu2 }
 0x536   :  { %v3037_v20 = vadd.f32 %v3036_v8, %v3017_v32  ;;  %v3361_v32 = vld [vmem:[%s5005_s17 + $0x38] sm:$0xff] }
 0x537   :  { %3387 = vmatpush.msrb.mxu1 %v3361_v32 }
 0x53b   :  { %v3056_v35 = vpop.f32.mrf.mxu3 }
 0x53c   :  { %v3057_v47 = vadd.f32 %v3056_v35, %v3037_v20  ;;  %v3360_v20 = vld [vmem:[%s5005_s17 + $0x30] sm:$0xff] }
 0x53d   :  { %3388 = vmatpush.msrb.mxu1 %v3360_v20 }
 0x53e   :  { %v3077_v49 = vadd.f32 %v3076_v51, %v3057_v47  ;;  %v3359_v51 = vld [vmem:[%s5005_s17 + $0x28] sm:$0xff] }
 0x53f   :  { %3389 = vmatpush.msrb.mxu1 %v3359_v51 }
 0x540   :  { %v3097_v48 = vadd.f32 %v3096_v24, %v3077_v49  ;;  %v3357_v24 = vld [vmem:[%s5005_s17 + $0x18] sm:$0xff] }
 0x541   :  { %3390 = vmatpush.msrb.mxu1 %v3358_v53 }
 0x543   :  { %3391 = vmatpush.msrb.mxu1 %v3357_v24 }
 0x555   :  { %v3116_v50 = vpop.f32.mrf.mxu2 }
 0x556   :  { %v3117_v55 = vadd.f32 %v3116_v50, %v3097_v48  ;;  %v3356_v48 = vld [vmem:[%s5005_s17 + $0x10] sm:$0xff] }
 0x557   :  { %3392 = vmatpush.msrb.mxu1 %v3356_v48 }
 0x55b   :  { %v3136_v6 = vpop.f32.mrf.mxu3 }
 0x55c   :  { %v3137_v12 = vadd.f32 %v3136_v6, %v3117_v55  ;;  %v3355_v55 = vld [vmem:[%s5005_s17 + $0x8] sm:$0xff]  ;;  %v3354_v6 = vld [vmem:[%s5005_s17] sm:$0xff]  ;;  %s4002_s17 = smov [#allocation30]  }
 0x55d   :  { %3393 = vmatpush.msrb.mxu1 %v3355_v55  ;;  %s3418_s13 = sshll.u32 %s4002_s17, 4  ;;  %s3419_s13 = int_to_ptr.vmem [resolvable:$true] %s3418_s13 }
 0x55e   :  { %v3157_v17 = vadd.f32 %v3156_v9, %v3137_v12  ;;  %3426 = dma.vmem_to_hbm [thread:$0]  %s3419_s13, 4096, %s3421_s3, [#allocation6], %s5021_s10, %s5021_s10, %s3983_s29  }
 0x55f   :  { %3394 = vmatpush.msrb.mxu1 %v3354_v6 }
 0x560   :  { %v3177_v43 = vadd.f32 %v3176_v4, %v3157_v17 }
 0x562   :  { %v3180_v59 = vmul.f32 0.015625, %v3177_v43 }
 0x564   :  { %v3188_v36 = vadd.f32 %v3184_v11, %v3180_v59  ;;  %v3484_v59 = vld [vmem:[#allocation25] ss:$0 sm:$0xff] }
 0x566   :  { %3261 = vmatmul.f32.vlgmr.msra.gmra.mxu3 %v3188_v36 }
 0x575   :  { %v3242_v28 = vpop.f32.mrf.mxu2 }
 0x576   :  { %v3243_v45 = vadd.f32 %v3482_v16, %v3242_v28 }
 0x5e9   :  { %v3262_v31 = vpop.f32.mrf.mxu3 }
 0x5ea   :  { %v3263_v29 = vadd.f32 %v3262_v31, %v3243_v45 }
 0x5ec   :  { %3301 = vmatmul.f32.vlgmr.msrb.gmra.mxu0 %v3263_v29 }
 0x669   :  { %v3302_v18 = vpop.f32.mrf.mxu0 }
 0x66a   :  { %v3303_v63 = vadd.f32 %v3483_v14, %v3302_v18 }
 0x66c   :  { %v3306_v56 = vsel %vm3305_vm5, %v3303_v63, 0.0 }
 0x66d   :  { %v3307_v0 = vrot.slane %v3306_v56, 4 }
 0x66f   :  { %v3308_v37 = vadd.f32 %v3307_v0, %v3306_v56 }
 0x671   :  { %v3309_v46 = vrot.slane %v3308_v37, 2 }
 0x673   :  { %v3310_v10 = vadd.f32 %v3309_v46, %v3308_v37 }
 0x675   :  { %v3311_v26 = vrot.slane %v3310_v10, 1 }
 0x677   :  { %v3312_v22 = vadd.f32 %v3311_v26, %v3310_v10 }
 0x679   :  { %v3320_v15 = vmul.f32 %v3319_v25, %v3312_v22 }
 0x67b   :  { %v3321_v8 = vsub.f32 %v3303_v63, %v3320_v15 }
 0x67d   :  { %v3322_v35 = vmul.f32 %v3321_v8, %v3321_v8 }
 0x67f   :  { %v3323_v47 = vsel %vm3305_vm5, %v3322_v35, 0.0 }
 0x680   :  { %v3324_v49 = vrot.slane %v3323_v47, 4 }
 0x682   :  { %v3325_v54 = vadd.f32 %v3324_v49, %v3323_v47 }
 0x684   :  { %v3326_v50 = vrot.slane %v3325_v54, 2 }
 0x686   :  { %v3327_v60 = vadd.f32 %v3326_v50, %v3325_v54 }
 0x688   :  { %v3328_v42 = vrot.slane %v3327_v60, 1 }
 0x68a   :  { %v3329_v12 = vadd.f32 %v3328_v42, %v3327_v60 }
 0x68c   :  { %v3330_v2 = vmul.f32 %v3329_v12, %v3319_v25 }
 0x68e   :  { %v3331_v9 = vadd.f32 1e-05, %v3330_v2 }
 0x690   :  { %3489 = vrsqrt.f32 %v3331_v9  ;;  %vm3338_vm9 = vweird.f32 %v3331_v9 }
 0x696   :  { %v3490_v17 = vpop.eup %3489 }
 0x697   :  { %v3333_v1 = vmul.f32 %v3490_v17, %v3331_v9  ;;  %vm3339_vm8 = vweird.f32 %v3490_v17 }
 0x698   :  { %vm3340_vm10 = vmor %vm3338_vm9, %vm3339_vm8 }
 0x699   :  { %v3334_v4 = vmul.f32 %v3490_v17, %v3333_v1 }
 0x69b   :  { %v3335_v11 = vmul.f32 0.5, %v3334_v4 }
 0x69d   :  { %v3336_v43 = vsub.f32 1.5, %v3335_v11 }
 0x69f   :  { %v3337_v38 = vmul.f32 %v3490_v17, %v3336_v43 }
 0x6a1   :  { %v3341_v40 = vsel %vm3340_vm10, %v3490_v17, %v3337_v38 }
 0x6a2   :  { %v3342_v36 = vmul.f32 %v3341_v40, %v3321_v8 }
 0x6a4   :  { %v3347_v23 = vmul.f32 %v3484_v59, %v3342_v36 }
 0x6a6   :  { %v3352_v19 = vadd.f32 %v3485_v3, %v3347_v23 }
 0x6a8   :  { %v3353_v44 = vmax.f32 %v3352_v19, 0.0 }
 0x6aa   :  { %3458 = vmatmul.msk.f32.vlgmr.msrb.gmra.mxu1 %vm3371_vm11, %v3353_v44 }
 0x727   :  { %v3396_v30 = vpop.f32.mrf.mxu1 }
 0x728   :  { %v3397_v58 = vadd.f32 %v3486_v61, %v3396_v30 }
 0x72a   :  { %v3400_v27 = vsel %vm3399_vm12, %v3397_v58, -inf }
 0x72b   :  { %3401 = vmax.xlane.f32.xlu1 %v3400_v27 }
 0x79e   :  { %v3402_v16 = vpop.xlane.xlu1 %3401 }
 0x79f   :  { %v3403_v28 = vsub.f32 %v3397_v58, %v3402_v16 }
 0x7a1   :  { %v3404_v45 = vmul.f32 1.442695, %v3403_v28 }
 0x7a3   :  { %3491 = vpow2.f32 %v3404_v45 }
 0x7a9   :  { %v3492_v31 = vpop.eup %3491 }
 0x7aa   :  { %v3406_v29 = vsel %vm3399_vm12, %v3492_v31, 0.0 }
 0x7ab   :  { %3407 = vadd.xlane.f32.xlu2 %v3406_v29 }
 0x81e   :  { %v3408_v33 = vpop.xlane.xlu2 %3407 }
 0x81f   :  { %3493 = vlog2.f32 %v3408_v33 }
 0x825   :  { %v3494_v13 = vpop.eup %3493 }
 0x826   :  { %v3410_v14 = vmul.f32 0.6931472, %v3494_v13 }
 0x828   :  { %v3411_v5 = vadd.f32 %v3410_v14, %v3402_v16 }
 0x82a   :  { %v3412_v18 = vsub.f32 %v3397_v58, %v3411_v5 }
 0x82c   :  { %3413 = vst.msk [vmem:[#allocation31] sm:$0x3] %vm3399_vm12, %v3412_v18 }
 0x82d   :  { %3437 = dma.vmem_to_hbm [thread:$0]  %s3433_s25, 32, %s3435_s5, [#allocation32]  }
 0x82e   :  { %3977 = dma.done.wait [#allocation6], 4096  }
 0x82f   :  { %3978 = vsyncadd [#allocation6], 4294963200 }
 0x830   :  { %3979 = dma.done.wait [#allocation32], 32  }
 0x831   :  { %3980 = vsyncadd [#allocation32], 4294967264 }
 0x832   :  { %3446 = vsyncpa [#allocation5], 1 }
 0x833   :  { %3447 = vsyncpa [#allocation8], 1 }
 0x834   :  { %3448 = vsyncpa [#allocation11], 1 }
 0x835   :  { %3449 = vsyncpa [#allocation14], 1 }
 0x836   :  { %3450 = vsyncpa [#allocation17], 1 }
 0x837   :  { %3451 = vsyncpa [#allocation20], 1 }
 0x838   :  { %3452 = vsyncpa [#allocation23], 1 }
 0x839   :  { %3453 = vsyncpa [#allocation26], 1 }
 0x83a   :  { %3454 = vsyncpa [#allocation29], 1 }
 0x83b   :  { %3455 = vsyncpa [#allocation6], 1 }
 0x83c   :  { %3456 = vsyncpa [#allocation32], 1 }

</bundles_post_ra>
